<compile_context>
chip_gen: v7x
topology: tpu7x:2x2x1
jax: 0.10.0
libtpu: 0.0.40
codegen_flags: <defaults>
</compile_context>

<pallas_src>
import functools
import math

import numpy as np

import jax
import jax.numpy as jnp
from jax.experimental import pallas as pl
from jax.experimental.pallas import tpu as pltpu

BN_EPS = 1e-5


# ---------------------------------------------------------------------------
# Layout helpers.
#
# Spatial layout trick: each image is zero-padded (2 rows top, a few rows bottom,
# 2 cols left, Wp-W-2 cols right) and flattened with row stride Wp.  With that
# layout the 3x3 tap (dy, dx) of a pad-1 conv is a static slice at offset
# dy*Wp + dx, and every out-of-image read lands on zero padding (including the
# row-wrap positions), so no im2col / gather is needed.  conv1 is evaluated over
# the full pad-1 output range and masked, so the masked result IS the zero-padded
# input of conv2 at offset 0.
# ---------------------------------------------------------------------------
def _round_up(x, m):
    return (x + m - 1) // m * m


def _pick_wp(H, W):
    """Row stride of the flattened padded layout: >= W+2, rounded so the output
    slab length H*Wp is a multiple of 128 (lane-dense stores) when that costs at
    most 32 extra (zero) columns per row."""
    base = W + 2
    g = 128 // math.gcd(128, H)          # need Wp % g == 0 for H*Wp % 128 == 0
    wp = _round_up(base, g)
    return wp if wp - base <= 32 else base


def _vmem_bytes(NB, C, Lx, Lh, L2):
    """Rough per-grid-step VMEM working set (bytes)."""
    b = 2 * NB * C * Lx * 4              # input block, double buffered
    b += 2 * NB * C * L2 * 4             # output block, double buffered
    b += NB * C * Lx * (4 + 2)           # f32 input value + bf16 copy
    b += 9 * C * NB * Lh * 2             # stacked conv1 operand (scratch)
    b += 9 * C * NB * L2 * 2             # stacked conv2 operand (scratch)
    b += NB * C * Lh * (4 + 2)           # conv1 f32 accum + bf16 copy
    b += NB * C * L2 * 4                 # conv2 f32 accum
    return b


def _pick_nb(N, C, Lx, Lh, L2, budget):
    """Images per grid step: amortize weight loads over more MXU columns while
    keeping >= 2 grid steps (feeds both v7x TensorCores) and fitting VMEM."""
    best = 1
    for nb in range(2, min(N, 8) + 1):
        if N % nb:
            continue
        if N // nb < 2:
            continue
        if _vmem_bytes(nb, C, Lx, Lh, L2) <= budget:
            best = nb
    return best


# ---------------------------------------------------------------------------
# Fused ResBlock kernel (NB batch images per grid step).
# ---------------------------------------------------------------------------
def _resblock_kernel(xp_ref, w1_ref, s1_ref, b1_ref, w2_ref, s2_ref, b2_ref,
                     mask_ref, o_ref, stk1_ref, stk2_ref, *, H, Wp, Lh,
                     neg_slope):
    NB, C, _ = xp_ref.shape
    L2 = H * Wp
    offs = tuple(dy * Wp + dx for dy in range(3) for dx in range(3))

    xpf = xp_ref[...]                                 # (NB, C, Lx) f32
    xpb = xpf.astype(jnp.bfloat16)                    # bf16 MXU operands

    # ---- conv1: ONE stacked-K matmul, K = 9*C, columns = NB * Lh -------------
    for b in range(NB):
        for t, off in enumerate(offs):
            stk1_ref[t * C:(t + 1) * C, b * Lh:(b + 1) * Lh] = \
                xpb[b, :, off:off + Lh]
    acc1 = jnp.dot(w1_ref[...], stk1_ref[...],
                   preferred_element_type=jnp.float32)        # (C, NB*Lh) f32

    # ---- BN1 (folded, eval mode) + LeakyReLU + interior mask -----------------
    h = acc1 * s1_ref[...] + b1_ref[...]
    h = jnp.maximum(h, neg_slope * h)                 # LeakyReLU, slope in (0,1)
    # Zero everything outside the valid interior: those positions become the
    # zero padding of conv2 (and kill the row-wrap garbage columns).
    h = h * mask_ref[...]
    hb = h.astype(jnp.bfloat16)

    # ---- conv2: ONE stacked-K matmul + BN2 (folded) ---------------------------
    for b in range(NB):
        for t, off in enumerate(offs):
            stk2_ref[t * C:(t + 1) * C, b * L2:(b + 1) * L2] = \
                hb[:, b * Lh + off: b * Lh + off + L2]
    acc2 = jnp.dot(w2_ref[...], stk2_ref[...],
                   preferred_element_type=jnp.float32)        # (C, NB*L2) f32
    y = acc2 * s2_ref[...] + b2_ref[...]

    # ---- residual add (f32) ---------------------------------------------------
    r0 = 2 * Wp + 2                                   # offset of image pixel (0,0)
    for b in range(NB):
        o_ref[b] = (y[:, b * L2:(b + 1) * L2]
                    + xpf[b, :, r0:r0 + L2]).astype(o_ref.dtype)


# ---------------------------------------------------------------------------
# Parameter helpers.
# ---------------------------------------------------------------------------
def _fold_bn(bn):
    scale = bn["gamma"] / jnp.sqrt(bn["var"] + BN_EPS)
    shift = bn["beta"] - bn["mean"] * scale
    return scale, shift


def _stack_weights(w):
    # PyTorch (Cout, Cin, 3, 3) -> (Cout, 9*Cin), K ordered (tap t = dy*3+dx, Cin).
    cout, cin = w.shape[0], w.shape[1]
    return jnp.transpose(w, (0, 2, 3, 1)).reshape(cout, 9 * cin).astype(jnp.bfloat16)


def resblock_forward(x, params, neg_slope=0.2):
    """x: (N, C, H, W) f32 -> (N, C, H, W) f32 (ResBlock forward, eval-mode BN)."""
    N, C, H, W = x.shape
    Wp = _pick_wp(H, W)
    L2 = H * Wp                                   # conv2 / output slab per image
    Lh = _round_up((H + 2) * Wp + 2, 128)         # conv1 slab (== conv2 padded input)
    rows_in = -(-(Lh + 2 * Wp + 2) // Wp)         # padded-input rows needed
    Lx = rows_in * Wp
    pad_bot = rows_in - (H + 2)

    try:
        phys_vmem = pltpu.get_tpu_info().vmem_capacity_bytes
    except Exception:
        phys_vmem = 64 * 1024 * 1024              # conservative (v7x per-TC VMEM)

    NB = _pick_nb(N, C, Lx, Lh, L2, budget=int(phys_vmem * 0.45))
    est = _vmem_bytes(NB, C, Lx, Lh, L2)
    if est > int(phys_vmem * 0.75):
        # TODO(synk): spatial row-block tiling (2-row halo) for large C*H*W.
        raise ValueError(
            f"ResBlock working set (~{est>>20} MiB) exceeds VMEM; row-block "
            "tiling not implemented yet.")
    vmem_limit = min(int(phys_vmem * 0.75), max(32 * 1024 * 1024, 2 * est))

    s1, b1 = _fold_bn(params["bn1"])
    s2, b2 = _fold_bn(params["bn2"])
    w1 = _stack_weights(params["w1"])
    w2 = _stack_weights(params["w2"])

    # Zero-pad (2 top / pad_bot bottom rows, 2 left / Wp-W-2 right cols) and
    # flatten spatial: channels on sublanes, flattened spatial on lanes.
    # TODO(synk): fold this pad and the final crop into the kernel (strided DMA
    # into a zeroed VMEM scratch) to drop the extra wrapper HBM passes.
    xp = jnp.pad(x, ((0, 0), (0, 0), (2, pad_bot), (2, Wp - W - 2))).reshape(N, C, Lx)

    # Valid-interior mask for the conv1 output slab, tiled over the NB images.
    idx = np.arange(Lh)
    row, col = idx // Wp, idx % Wp
    m = ((row >= 1) & (row <= H) & (col >= 1) & (col <= W)).astype(np.float32)
    mask = jnp.asarray(np.tile(m, NB)[None, :])   # (1, NB*Lh)

    kernel = functools.partial(_resblock_kernel, H=H, Wp=Wp, Lh=Lh,
                               neg_slope=neg_slope)
    out = pl.pallas_call(
        kernel,
        out_shape=jax.ShapeDtypeStruct((N, C, L2), jnp.float32),
        grid=(N // NB,),
        in_specs=[
            pl.BlockSpec((NB, C, Lx), lambda g: (g, 0, 0)),   # padded input (f32)
            pl.BlockSpec((C, 9 * C), lambda g: (0, 0)),       # conv1 weights (bf16)
            pl.BlockSpec((C, 1), lambda g: (0, 0)),           # BN1 scale
            pl.BlockSpec((C, 1), lambda g: (0, 0)),           # BN1 shift
            pl.BlockSpec((C, 9 * C), lambda g: (0, 0)),       # conv2 weights (bf16)
            pl.BlockSpec((C, 1), lambda g: (0, 0)),           # BN2 scale
            pl.BlockSpec((C, 1), lambda g: (0, 0)),           # BN2 shift
            pl.BlockSpec((1, NB * Lh), lambda g: (0, 0)),     # interior mask
        ],
        out_specs=pl.BlockSpec((NB, C, L2), lambda g: (g, 0, 0)),
        scratch_shapes=[
            pltpu.VMEM((9 * C, NB * Lh), jnp.bfloat16),       # stacked conv1 operand
            pltpu.VMEM((9 * C, NB * L2), jnp.bfloat16),       # stacked conv2 operand
        ],
        compiler_params=pltpu.CompilerParams(
            dimension_semantics=("parallel",),
            vmem_limit_bytes=int(vmem_limit)),
    )(xp, w1, s1.reshape(C, 1), b1.reshape(C, 1),
      w2, s2.reshape(C, 1), b2.reshape(C, 1), mask)

    # Drop the layout-padding columns per row (cheap glue; see TODO above).
    return out.reshape(N, C, H, Wp)[:, :, :, :W]


# ---------------------------------------------------------------------------
# Deterministic parameters (PyTorch-like conv init, generic BN stats) + reference.
# ---------------------------------------------------------------------------
def init_params(key, C):
    k = jax.random.split(key, 10)
    bound = float(1.0 / (9 * C) ** 0.5)
    return {
        "w1": jax.random.uniform(k[0], (C, C, 3, 3), jnp.float32, -bound, bound),
        "w2": jax.random.uniform(k[1], (C, C, 3, 3), jnp.float32, -bound, bound),
        "bn1": {"gamma": jax.random.uniform(k[2], (C,), jnp.float32, 0.5, 1.5),
                "beta":  jax.random.uniform(k[3], (C,), jnp.float32, -0.1, 0.1),
                "mean":  jax.random.uniform(k[4], (C,), jnp.float32, -0.1, 0.1),
                "var":   jax.random.uniform(k[5], (C,), jnp.float32, 0.5, 1.5)},
        "bn2": {"gamma": jax.random.uniform(k[6], (C,), jnp.float32, 0.5, 1.5),
                "beta":  jax.random.uniform(k[7], (C,), jnp.float32, -0.1, 0.1),
                "mean":  jax.random.uniform(k[8], (C,), jnp.float32, -0.1, 0.1),
                "var":   jax.random.uniform(k[9], (C,), jnp.float32, 0.5, 1.5)},
    }


def resblock_ref(x, params, neg_slope=0.2):
    s1, b1 = _fold_bn(params["bn1"])
    s2, b2 = _fold_bn(params["bn2"])
    dn = ("NCHW", "OIHW", "NCHW")

    def conv(z, w):
        return jax.lax.conv_general_dilated(
            z, w, (1, 1), ((1, 1), (1, 1)), dimension_numbers=dn,
            precision=jax.lax.Precision.HIGHEST)

    h = conv(x, params["w1"]) * s1[None, :, None, None] + b1[None, :, None, None]
    h = jnp.where(h >= 0, h, neg_slope * h)
    y = conv(h, params["w2"]) * s2[None, :, None, None] + b2[None, :, None, None]
    return x + y


if __name__ == "__main__":
    N, C, H, W = 4, 32, 16, 16
    kx, kp = jax.random.split(jax.random.PRNGKey(0))
    x = jax.random.uniform(kx, (N, C, H, W), jnp.float32)
    params = init_params(kp, C)

    fwd = jax.jit(lambda inp: resblock_forward(inp, params))
    y = jax.block_until_ready(fwd(x))

    assert y.shape == (N, C, H, W)
    assert bool(jnp.all(jnp.isfinite(y)))

    y_ref = resblock_ref(x, params)
    err = float(jnp.max(jnp.abs(y - y_ref)))
    assert err < 5e-2, f"max abs error vs reference: {err}"
    print("KERNEL_OK")
</pallas_src>

<mosaic_0001>
module attributes {stable_mosaic.version = 11 : i64} {
  func.func @_resblock_kernel(%arg0: i32, %arg1: memref<2x32x576xf32, #tpu.memory_space<vmem>>, %arg2: memref<32x288xbf16, #tpu.memory_space<vmem>>, %arg3: memref<32x1xf32, #tpu.memory_space<vmem>>, %arg4: memref<32x1xf32, #tpu.memory_space<vmem>>, %arg5: memref<32x288xbf16, #tpu.memory_space<vmem>>, %arg6: memref<32x1xf32, #tpu.memory_space<vmem>>, %arg7: memref<32x1xf32, #tpu.memory_space<vmem>>, %arg8: memref<1x1024xf32, #tpu.memory_space<vmem>>, %arg9: memref<2x32x384xf32, #tpu.memory_space<vmem>>, %arg10: memref<288x1024xbf16, #tpu.memory_space<vmem>>, %arg11: memref<288x768xbf16, #tpu.memory_space<vmem>>) attributes {dimension_semantics = [#tpu.dimension_semantics<parallel>], iteration_bounds = array<i64: 2>, scalar_prefetch = 0 : i64, scratch_operands = 2 : i64, tpu.core_type = #tpu.core_type<tc>, window_params = [{transform_indices = @transform_0, window_bounds = array<i64: 2, 32, 576>}, {pipeline_mode = #tpu.pipeline_mode<synchronous>, transform_indices = @transform_1, window_bounds = array<i64: 32, 288>}, {pipeline_mode = #tpu.pipeline_mode<synchronous>, transform_indices = @transform_2, window_bounds = array<i64: 32, 1>}, {pipeline_mode = #tpu.pipeline_mode<synchronous>, transform_indices = @transform_3, window_bounds = array<i64: 32, 1>}, {pipeline_mode = #tpu.pipeline_mode<synchronous>, transform_indices = @transform_4, window_bounds = array<i64: 32, 288>}, {pipeline_mode = #tpu.pipeline_mode<synchronous>, transform_indices = @transform_5, window_bounds = array<i64: 32, 1>}, {pipeline_mode = #tpu.pipeline_mode<synchronous>, transform_indices = @transform_6, window_bounds = array<i64: 32, 1>}, {pipeline_mode = #tpu.pipeline_mode<synchronous>, transform_indices = @transform_7, window_bounds = array<i64: 1, 1024>}, {transform_indices = @transform_8, window_bounds = array<i64: 2, 32, 384>}]} {
    %c0 = arith.constant 0 : index
    %c0_0 = arith.constant 0 : index
    %c0_1 = arith.constant 0 : index
    %0 = vector.load %arg1[%c0, %c0_0, %c0_1] : memref<2x32x576xf32, #tpu.memory_space<vmem>>, vector<2x32x576xf32>
    %1 = arith.truncf %0 : vector<2x32x576xf32> to vector<2x32x576xbf16>
    %2 = vector.extract_strided_slice %1 {offsets = [0, 0, 0], sizes = [1, 32, 512], strides = [1, 1, 1]} : vector<2x32x576xbf16> to vector<1x32x512xbf16>
    %3 = vector.shape_cast %2 : vector<1x32x512xbf16> to vector<32x512xbf16>
    %c0_2 = arith.constant 0 : index
    %c0_3 = arith.constant 0 : index
    %4 = vector.load %arg10[%c0_2, %c0_3] : memref<288x1024xbf16, #tpu.memory_space<vmem>>, vector<32x512xbf16>
    tpu.vector_store %arg10[%c0_2, %c0_3], %3 {strides = array<i32>} : memref<288x1024xbf16, #tpu.memory_space<vmem>>, vector<32x512xbf16>,
    %5 = vector.extract_strided_slice %1 {offsets = [0, 0, 1], sizes = [1, 32, 512], strides = [1, 1, 1]} : vector<2x32x576xbf16> to vector<1x32x512xbf16>
    %6 = vector.shape_cast %5 : vector<1x32x512xbf16> to vector<32x512xbf16>
    %c32 = arith.constant 32 : index
    %c0_4 = arith.constant 0 : index
    %7 = vector.load %arg10[%c32, %c0_4] : memref<288x1024xbf16, #tpu.memory_space<vmem>>, vector<32x512xbf16>
    tpu.vector_store %arg10[%c32, %c0_4], %6 {strides = array<i32>} : memref<288x1024xbf16, #tpu.memory_space<vmem>>, vector<32x512xbf16>,
    %8 = vector.extract_strided_slice %1 {offsets = [0, 0, 2], sizes = [1, 32, 512], strides = [1, 1, 1]} : vector<2x32x576xbf16> to vector<1x32x512xbf16>
    %9 = vector.shape_cast %8 : vector<1x32x512xbf16> to vector<32x512xbf16>
    %c64 = arith.constant 64 : index
    %c0_5 = arith.constant 0 : index
    %10 = vector.load %arg10[%c64, %c0_5] : memref<288x1024xbf16, #tpu.memory_space<vmem>>, vector<32x512xbf16>
    tpu.vector_store %arg10[%c64, %c0_5], %9 {strides = array<i32>} : memref<288x1024xbf16, #tpu.memory_space<vmem>>, vector<32x512xbf16>,
    %11 = vector.extract_strided_slice %1 {offsets = [0, 0, 24], sizes = [1, 32, 512], strides = [1, 1, 1]} : vector<2x32x576xbf16> to vector<1x32x512xbf16>
    %12 = vector.shape_cast %11 : vector<1x32x512xbf16> to vector<32x512xbf16>
    %c96 = arith.constant 96 : index
    %c0_6 = arith.constant 0 : index
    %13 = vector.load %arg10[%c96, %c0_6] : memref<288x1024xbf16, #tpu.memory_space<vmem>>, vector<32x512xbf16>
    tpu.vector_store %arg10[%c96, %c0_6], %12 {strides = array<i32>} : memref<288x1024xbf16, #tpu.memory_space<vmem>>, vector<32x512xbf16>,
    %14 = vector.extract_strided_slice %1 {offsets = [0, 0, 25], sizes = [1, 32, 512], strides = [1, 1, 1]} : vector<2x32x576xbf16> to vector<1x32x512xbf16>
    %15 = vector.shape_cast %14 : vector<1x32x512xbf16> to vector<32x512xbf16>
    %c128 = arith.constant 128 : index
    %c0_7 = arith.constant 0 : index
    %16 = vector.load %arg10[%c128, %c0_7] : memref<288x1024xbf16, #tpu.memory_space<vmem>>, vector<32x512xbf16>
    tpu.vector_store %arg10[%c128, %c0_7], %15 {strides = array<i32>} : memref<288x1024xbf16, #tpu.memory_space<vmem>>, vector<32x512xbf16>,
    %17 = vector.extract_strided_slice %1 {offsets = [0, 0, 26], sizes = [1, 32, 512], strides = [1, 1, 1]} : vector<2x32x576xbf16> to vector<1x32x512xbf16>
    %18 = vector.shape_cast %17 : vector<1x32x512xbf16> to vector<32x512xbf16>
    %c160 = arith.constant 160 : index
    %c0_8 = arith.constant 0 : index
    %19 = vector.load %arg10[%c160, %c0_8] : memref<288x1024xbf16, #tpu.memory_space<vmem>>, vector<32x512xbf16>
    tpu.vector_store %arg10[%c160, %c0_8], %18 {strides = array<i32>} : memref<288x1024xbf16, #tpu.memory_space<vmem>>, vector<32x512xbf16>,
    %20 = vector.extract_strided_slice %1 {offsets = [0, 0, 48], sizes = [1, 32, 512], strides = [1, 1, 1]} : vector<2x32x576xbf16> to vector<1x32x512xbf16>
    %21 = vector.shape_cast %20 : vector<1x32x512xbf16> to vector<32x512xbf16>
    %c192 = arith.constant 192 : index
    %c0_9 = arith.constant 0 : index
    %22 = vector.load %arg10[%c192, %c0_9] : memref<288x1024xbf16, #tpu.memory_space<vmem>>, vector<32x512xbf16>
    tpu.vector_store %arg10[%c192, %c0_9], %21 {strides = array<i32>} : memref<288x1024xbf16, #tpu.memory_space<vmem>>, vector<32x512xbf16>,
    %23 = vector.extract_strided_slice %1 {offsets = [0, 0, 49], sizes = [1, 32, 512], strides = [1, 1, 1]} : vector<2x32x576xbf16> to vector<1x32x512xbf16>
    %24 = vector.shape_cast %23 : vector<1x32x512xbf16> to vector<32x512xbf16>
    %c224 = arith.constant 224 : index
    %c0_10 = arith.constant 0 : index
    %25 = vector.load %arg10[%c224, %c0_10] : memref<288x1024xbf16, #tpu.memory_space<vmem>>, vector<32x512xbf16>
    tpu.vector_store %arg10[%c224, %c0_10], %24 {strides = array<i32>} : memref<288x1024xbf16, #tpu.memory_space<vmem>>, vector<32x512xbf16>,
    %26 = vector.extract_strided_slice %1 {offsets = [0, 0, 50], sizes = [1, 32, 512], strides = [1, 1, 1]} : vector<2x32x576xbf16> to vector<1x32x512xbf16>
    %27 = vector.shape_cast %26 : vector<1x32x512xbf16> to vector<32x512xbf16>
    %c256 = arith.constant 256 : index
    %c0_11 = arith.constant 0 : index
    %28 = vector.load %arg10[%c256, %c0_11] : memref<288x1024xbf16, #tpu.memory_space<vmem>>, vector<32x512xbf16>
    tpu.vector_store %arg10[%c256, %c0_11], %27 {strides = array<i32>} : memref<288x1024xbf16, #tpu.memory_space<vmem>>, vector<32x512xbf16>,
    %29 = vector.extract_strided_slice %1 {offsets = [1, 0, 0], sizes = [1, 32, 512], strides = [1, 1, 1]} : vector<2x32x576xbf16> to vector<1x32x512xbf16>
    %30 = vector.shape_cast %29 : vector<1x32x512xbf16> to vector<32x512xbf16>
    %c0_12 = arith.constant 0 : index
    %c512 = arith.constant 512 : index
    %31 = vector.load %arg10[%c0_12, %c512] : memref<288x1024xbf16, #tpu.memory_space<vmem>>, vector<32x512xbf16>
    tpu.vector_store %arg10[%c0_12, %c512], %30 {strides = array<i32>} : memref<288x1024xbf16, #tpu.memory_space<vmem>>, vector<32x512xbf16>,
    %32 = vector.extract_strided_slice %1 {offsets = [1, 0, 1], sizes = [1, 32, 512], strides = [1, 1, 1]} : vector<2x32x576xbf16> to vector<1x32x512xbf16>
    %33 = vector.shape_cast %32 : vector<1x32x512xbf16> to vector<32x512xbf16>
    %c32_13 = arith.constant 32 : index
    %c512_14 = arith.constant 512 : index
    %34 = vector.load %arg10[%c32_13, %c512_14] : memref<288x1024xbf16, #tpu.memory_space<vmem>>, vector<32x512xbf16>
    tpu.vector_store %arg10[%c32_13, %c512_14], %33 {strides = array<i32>} : memref<288x1024xbf16, #tpu.memory_space<vmem>>, vector<32x512xbf16>,
    %35 = vector.extract_strided_slice %1 {offsets = [1, 0, 2], sizes = [1, 32, 512], strides = [1, 1, 1]} : vector<2x32x576xbf16> to vector<1x32x512xbf16>
    %36 = vector.shape_cast %35 : vector<1x32x512xbf16> to vector<32x512xbf16>
    %c64_15 = arith.constant 64 : index
    %c512_16 = arith.constant 512 : index
    %37 = vector.load %arg10[%c64_15, %c512_16] : memref<288x1024xbf16, #tpu.memory_space<vmem>>, vector<32x512xbf16>
    tpu.vector_store %arg10[%c64_15, %c512_16], %36 {strides = array<i32>} : memref<288x1024xbf16, #tpu.memory_space<vmem>>, vector<32x512xbf16>,
    %38 = vector.extract_strided_slice %1 {offsets = [1, 0, 24], sizes = [1, 32, 512], strides = [1, 1, 1]} : vector<2x32x576xbf16> to vector<1x32x512xbf16>
    %39 = vector.shape_cast %38 : vector<1x32x512xbf16> to vector<32x512xbf16>
    %c96_17 = arith.constant 96 : index
    %c512_18 = arith.constant 512 : index
    %40 = vector.load %arg10[%c96_17, %c512_18] : memref<288x1024xbf16, #tpu.memory_space<vmem>>, vector<32x512xbf16>
    tpu.vector_store %arg10[%c96_17, %c512_18], %39 {strides = array<i32>} : memref<288x1024xbf16, #tpu.memory_space<vmem>>, vector<32x512xbf16>,
    %41 = vector.extract_strided_slice %1 {offsets = [1, 0, 25], sizes = [1, 32, 512], strides = [1, 1, 1]} : vector<2x32x576xbf16> to vector<1x32x512xbf16>
    %42 = vector.shape_cast %41 : vector<1x32x512xbf16> to vector<32x512xbf16>
    %c128_19 = arith.constant 128 : index
    %c512_20 = arith.constant 512 : index
    %43 = vector.load %arg10[%c128_19, %c512_20] : memref<288x1024xbf16, #tpu.memory_space<vmem>>, vector<32x512xbf16>
    tpu.vector_store %arg10[%c128_19, %c512_20], %42 {strides = array<i32>} : memref<288x1024xbf16, #tpu.memory_space<vmem>>, vector<32x512xbf16>,
    %44 = vector.extract_strided_slice %1 {offsets = [1, 0, 26], sizes = [1, 32, 512], strides = [1, 1, 1]} : vector<2x32x576xbf16> to vector<1x32x512xbf16>
    %45 = vector.shape_cast %44 : vector<1x32x512xbf16> to vector<32x512xbf16>
    %c160_21 = arith.constant 160 : index
    %c512_22 = arith.constant 512 : index
    %46 = vector.load %arg10[%c160_21, %c512_22] : memref<288x1024xbf16, #tpu.memory_space<vmem>>, vector<32x512xbf16>
    tpu.vector_store %arg10[%c160_21, %c512_22], %45 {strides = array<i32>} : memref<288x1024xbf16, #tpu.memory_space<vmem>>, vector<32x512xbf16>,
    %47 = vector.extract_strided_slice %1 {offsets = [1, 0, 48], sizes = [1, 32, 512], strides = [1, 1, 1]} : vector<2x32x576xbf16> to vector<1x32x512xbf16>
    %48 = vector.shape_cast %47 : vector<1x32x512xbf16> to vector<32x512xbf16>
    %c192_23 = arith.constant 192 : index
    %c512_24 = arith.constant 512 : index
    %49 = vector.load %arg10[%c192_23, %c512_24] : memref<288x1024xbf16, #tpu.memory_space<vmem>>, vector<32x512xbf16>
    tpu.vector_store %arg10[%c192_23, %c512_24], %48 {strides = array<i32>} : memref<288x1024xbf16, #tpu.memory_space<vmem>>, vector<32x512xbf16>,
    %50 = vector.extract_strided_slice %1 {offsets = [1, 0, 49], sizes = [1, 32, 512], strides = [1, 1, 1]} : vector<2x32x576xbf16> to vector<1x32x512xbf16>
    %51 = vector.shape_cast %50 : vector<1x32x512xbf16> to vector<32x512xbf16>
    %c224_25 = arith.constant 224 : index
    %c512_26 = arith.constant 512 : index
    %52 = vector.load %arg10[%c224_25, %c512_26] : memref<288x1024xbf16, #tpu.memory_space<vmem>>, vector<32x512xbf16>
    tpu.vector_store %arg10[%c224_25, %c512_26], %51 {strides = array<i32>} : memref<288x1024xbf16, #tpu.memory_space<vmem>>, vector<32x512xbf16>,
    %53 = vector.extract_strided_slice %1 {offsets = [1, 0, 50], sizes = [1, 32, 512], strides = [1, 1, 1]} : vector<2x32x576xbf16> to vector<1x32x512xbf16>
    %54 = vector.shape_cast %53 : vector<1x32x512xbf16> to vector<32x512xbf16>
    %c256_27 = arith.constant 256 : index
    %c512_28 = arith.constant 512 : index
    %55 = vector.load %arg10[%c256_27, %c512_28] : memref<288x1024xbf16, #tpu.memory_space<vmem>>, vector<32x512xbf16>
    tpu.vector_store %arg10[%c256_27, %c512_28], %54 {strides = array<i32>} : memref<288x1024xbf16, #tpu.memory_space<vmem>>, vector<32x512xbf16>,
    %c0_29 = arith.constant 0 : index
    %c0_30 = arith.constant 0 : index
    %56 = vector.load %arg2[%c0_29, %c0_30] : memref<32x288xbf16, #tpu.memory_space<vmem>>, vector<32x288xbf16>
    %c0_31 = arith.constant 0 : index
    %c0_32 = arith.constant 0 : index
    %57 = vector.load %arg10[%c0_31, %c0_32] : memref<288x1024xbf16, #tpu.memory_space<vmem>>, vector<288x1024xbf16>
    %cst = arith.constant dense<0.000000e+00> : vector<32x1024xf32>
    %58 = tpu.matmul %56, %57, %cst {dimension_numbers = #tpu.dot_dimension_numbers<[1], [0], [0], [1], [0, 0, 1, 1], [], []>} : vector<32x288xbf16>, vector<288x1024xbf16>, vector<32x1024xf32> -> vector<32x1024xf32>
    %c0_33 = arith.constant 0 : index
    %c0_34 = arith.constant 0 : index
    %59 = vector.load %arg3[%c0_33, %c0_34] : memref<32x1xf32, #tpu.memory_space<vmem>>, vector<32x1xf32>
    %60 = vector.broadcast %59 : vector<32x1xf32> to vector<32x1024xf32>
    %61 = arith.mulf %58, %60 : vector<32x1024xf32>
    %c0_35 = arith.constant 0 : index
    %c0_36 = arith.constant 0 : index
    %62 = vector.load %arg4[%c0_35, %c0_36] : memref<32x1xf32, #tpu.memory_space<vmem>>, vector<32x1xf32>
    %63 = vector.broadcast %62 : vector<32x1xf32> to vector<32x1024xf32>
    %64 = arith.addf %61, %63 : vector<32x1024xf32>
    %cst_37 = arith.constant 2.000000e-01 : f32
    %65 = vector.broadcast %cst_37 : f32 to vector<32x1024xf32>
    %66 = arith.mulf %65, %64 : vector<32x1024xf32>
    %67 = arith.maximumf %64, %66 : vector<32x1024xf32>
    %c0_38 = arith.constant 0 : index
    %c0_39 = arith.constant 0 : index
    %68 = vector.load %arg8[%c0_38, %c0_39] : memref<1x1024xf32, #tpu.memory_space<vmem>>, vector<1x1024xf32>
    %69 = vector.broadcast %68 : vector<1x1024xf32> to vector<32x1024xf32>
    %70 = arith.mulf %67, %69 : vector<32x1024xf32>
    %71 = arith.truncf %70 : vector<32x1024xf32> to vector<32x1024xbf16>
    %72 = vector.extract_strided_slice %71 {offsets = [0, 0], sizes = [32, 384], strides = [1, 1]} : vector<32x1024xbf16> to vector<32x384xbf16>
    %c0_40 = arith.constant 0 : index
    %c0_41 = arith.constant 0 : index
    %73 = vector.load %arg11[%c0_40, %c0_41] : memref<288x768xbf16, #tpu.memory_space<vmem>>, vector<32x384xbf16>
    tpu.vector_store %arg11[%c0_40, %c0_41], %72 {strides = array<i32>} : memref<288x768xbf16, #tpu.memory_space<vmem>>, vector<32x384xbf16>,
    %74 = vector.extract_strided_slice %71 {offsets = [0, 1], sizes = [32, 384], strides = [1, 1]} : vector<32x1024xbf16> to vector<32x384xbf16>
    %c32_42 = arith.constant 32 : index
    %c0_43 = arith.constant 0 : index
    %75 = vector.load %arg11[%c32_42, %c0_43] : memref<288x768xbf16, #tpu.memory_space<vmem>>, vector<32x384xbf16>
    tpu.vector_store %arg11[%c32_42, %c0_43], %74 {strides = array<i32>} : memref<288x768xbf16, #tpu.memory_space<vmem>>, vector<32x384xbf16>,
    %76 = vector.extract_strided_slice %71 {offsets = [0, 2], sizes = [32, 384], strides = [1, 1]} : vector<32x1024xbf16> to vector<32x384xbf16>
    %c64_44 = arith.constant 64 : index
    %c0_45 = arith.constant 0 : index
    %77 = vector.load %arg11[%c64_44, %c0_45] : memref<288x768xbf16, #tpu.memory_space<vmem>>, vector<32x384xbf16>
    tpu.vector_store %arg11[%c64_44, %c0_45], %76 {strides = array<i32>} : memref<288x768xbf16, #tpu.memory_space<vmem>>, vector<32x384xbf16>,
    %78 = vector.extract_strided_slice %71 {offsets = [0, 24], sizes = [32, 384], strides = [1, 1]} : vector<32x1024xbf16> to vector<32x384xbf16>
    %c96_46 = arith.constant 96 : index
    %c0_47 = arith.constant 0 : index
    %79 = vector.load %arg11[%c96_46, %c0_47] : memref<288x768xbf16, #tpu.memory_space<vmem>>, vector<32x384xbf16>
    tpu.vector_store %arg11[%c96_46, %c0_47], %78 {strides = array<i32>} : memref<288x768xbf16, #tpu.memory_space<vmem>>, vector<32x384xbf16>,
    %80 = vector.extract_strided_slice %71 {offsets = [0, 25], sizes = [32, 384], strides = [1, 1]} : vector<32x1024xbf16> to vector<32x384xbf16>
    %c128_48 = arith.constant 128 : index
    %c0_49 = arith.constant 0 : index
    %81 = vector.load %arg11[%c128_48, %c0_49] : memref<288x768xbf16, #tpu.memory_space<vmem>>, vector<32x384xbf16>
    tpu.vector_store %arg11[%c128_48, %c0_49], %80 {strides = array<i32>} : memref<288x768xbf16, #tpu.memory_space<vmem>>, vector<32x384xbf16>,
    %82 = vector.extract_strided_slice %71 {offsets = [0, 26], sizes = [32, 384], strides = [1, 1]} : vector<32x1024xbf16> to vector<32x384xbf16>
    %c160_50 = arith.constant 160 : index
    %c0_51 = arith.constant 0 : index
    %83 = vector.load %arg11[%c160_50, %c0_51] : memref<288x768xbf16, #tpu.memory_space<vmem>>, vector<32x384xbf16>
    tpu.vector_store %arg11[%c160_50, %c0_51], %82 {strides = array<i32>} : memref<288x768xbf16, #tpu.memory_space<vmem>>, vector<32x384xbf16>,
    %84 = vector.extract_strided_slice %71 {offsets = [0, 48], sizes = [32, 384], strides = [1, 1]} : vector<32x1024xbf16> to vector<32x384xbf16>
    %c192_52 = arith.constant 192 : index
    %c0_53 = arith.constant 0 : index
    %85 = vector.load %arg11[%c192_52, %c0_53] : memref<288x768xbf16, #tpu.memory_space<vmem>>, vector<32x384xbf16>
    tpu.vector_store %arg11[%c192_52, %c0_53], %84 {strides = array<i32>} : memref<288x768xbf16, #tpu.memory_space<vmem>>, vector<32x384xbf16>,
    %86 = vector.extract_strided_slice %71 {offsets = [0, 49], sizes = [32, 384], strides = [1, 1]} : vector<32x1024xbf16> to vector<32x384xbf16>
    %c224_54 = arith.constant 224 : index
    %c0_55 = arith.constant 0 : index
    %87 = vector.load %arg11[%c224_54, %c0_55] : memref<288x768xbf16, #tpu.memory_space<vmem>>, vector<32x384xbf16>
    tpu.vector_store %arg11[%c224_54, %c0_55], %86 {strides = array<i32>} : memref<288x768xbf16, #tpu.memory_space<vmem>>, vector<32x384xbf16>,
    %88 = vector.extract_strided_slice %71 {offsets = [0, 50], sizes = [32, 384], strides = [1, 1]} : vector<32x1024xbf16> to vector<32x384xbf16>
    %c256_56 = arith.constant 256 : index
    %c0_57 = arith.constant 0 : index
    %89 = vector.load %arg11[%c256_56, %c0_57] : memref<288x768xbf16, #tpu.memory_space<vmem>>, vector<32x384xbf16>
    tpu.vector_store %arg11[%c256_56, %c0_57], %88 {strides = array<i32>} : memref<288x768xbf16, #tpu.memory_space<vmem>>, vector<32x384xbf16>,
    %90 = vector.extract_strided_slice %71 {offsets = [0, 512], sizes = [32, 384], strides = [1, 1]} : vector<32x1024xbf16> to vector<32x384xbf16>
    %c0_58 = arith.constant 0 : index
    %c384 = arith.constant 384 : index
    %91 = vector.load %arg11[%c0_58, %c384] : memref<288x768xbf16, #tpu.memory_space<vmem>>, vector<32x384xbf16>
    tpu.vector_store %arg11[%c0_58, %c384], %90 {strides = array<i32>} : memref<288x768xbf16, #tpu.memory_space<vmem>>, vector<32x384xbf16>,
    %92 = vector.extract_strided_slice %71 {offsets = [0, 513], sizes = [32, 384], strides = [1, 1]} : vector<32x1024xbf16> to vector<32x384xbf16>
    %c32_59 = arith.constant 32 : index
    %c384_60 = arith.constant 384 : index
    %93 = vector.load %arg11[%c32_59, %c384_60] : memref<288x768xbf16, #tpu.memory_space<vmem>>, vector<32x384xbf16>
    tpu.vector_store %arg11[%c32_59, %c384_60], %92 {strides = array<i32>} : memref<288x768xbf16, #tpu.memory_space<vmem>>, vector<32x384xbf16>,
    %94 = vector.extract_strided_slice %71 {offsets = [0, 514], sizes = [32, 384], strides = [1, 1]} : vector<32x1024xbf16> to vector<32x384xbf16>
    %c64_61 = arith.constant 64 : index
    %c384_62 = arith.constant 384 : index
    %95 = vector.load %arg11[%c64_61, %c384_62] : memref<288x768xbf16, #tpu.memory_space<vmem>>, vector<32x384xbf16>
    tpu.vector_store %arg11[%c64_61, %c384_62], %94 {strides = array<i32>} : memref<288x768xbf16, #tpu.memory_space<vmem>>, vector<32x384xbf16>,
    %96 = vector.extract_strided_slice %71 {offsets = [0, 536], sizes = [32, 384], strides = [1, 1]} : vector<32x1024xbf16> to vector<32x384xbf16>
    %c96_63 = arith.constant 96 : index
    %c384_64 = arith.constant 384 : index
    %97 = vector.load %arg11[%c96_63, %c384_64] : memref<288x768xbf16, #tpu.memory_space<vmem>>, vector<32x384xbf16>
    tpu.vector_store %arg11[%c96_63, %c384_64], %96 {strides = array<i32>} : memref<288x768xbf16, #tpu.memory_space<vmem>>, vector<32x384xbf16>,
    %98 = vector.extract_strided_slice %71 {offsets = [0, 537], sizes = [32, 384], strides = [1, 1]} : vector<32x1024xbf16> to vector<32x384xbf16>
    %c128_65 = arith.constant 128 : index
    %c384_66 = arith.constant 384 : index
    %99 = vector.load %arg11[%c128_65, %c384_66] : memref<288x768xbf16, #tpu.memory_space<vmem>>, vector<32x384xbf16>
    tpu.vector_store %arg11[%c128_65, %c384_66], %98 {strides = array<i32>} : memref<288x768xbf16, #tpu.memory_space<vmem>>, vector<32x384xbf16>,
    %100 = vector.extract_strided_slice %71 {offsets = [0, 538], sizes = [32, 384], strides = [1, 1]} : vector<32x1024xbf16> to vector<32x384xbf16>
    %c160_67 = arith.constant 160 : index
    %c384_68 = arith.constant 384 : index
    %101 = vector.load %arg11[%c160_67, %c384_68] : memref<288x768xbf16, #tpu.memory_space<vmem>>, vector<32x384xbf16>
    tpu.vector_store %arg11[%c160_67, %c384_68], %100 {strides = array<i32>} : memref<288x768xbf16, #tpu.memory_space<vmem>>, vector<32x384xbf16>,
    %102 = vector.extract_strided_slice %71 {offsets = [0, 560], sizes = [32, 384], strides = [1, 1]} : vector<32x1024xbf16> to vector<32x384xbf16>
    %c192_69 = arith.constant 192 : index
    %c384_70 = arith.constant 384 : index
    %103 = vector.load %arg11[%c192_69, %c384_70] : memref<288x768xbf16, #tpu.memory_space<vmem>>, vector<32x384xbf16>
    tpu.vector_store %arg11[%c192_69, %c384_70], %102 {strides = array<i32>} : memref<288x768xbf16, #tpu.memory_space<vmem>>, vector<32x384xbf16>,
    %104 = vector.extract_strided_slice %71 {offsets = [0, 561], sizes = [32, 384], strides = [1, 1]} : vector<32x1024xbf16> to vector<32x384xbf16>
    %c224_71 = arith.constant 224 : index
    %c384_72 = arith.constant 384 : index
    %105 = vector.load %arg11[%c224_71, %c384_72] : memref<288x768xbf16, #tpu.memory_space<vmem>>, vector<32x384xbf16>
    tpu.vector_store %arg11[%c224_71, %c384_72], %104 {strides = array<i32>} : memref<288x768xbf16, #tpu.memory_space<vmem>>, vector<32x384xbf16>,
    %106 = vector.extract_strided_slice %71 {offsets = [0, 562], sizes = [32, 384], strides = [1, 1]} : vector<32x1024xbf16> to vector<32x384xbf16>
    %c256_73 = arith.constant 256 : index
    %c384_74 = arith.constant 384 : index
    %107 = vector.load %arg11[%c256_73, %c384_74] : memref<288x768xbf16, #tpu.memory_space<vmem>>, vector<32x384xbf16>
    tpu.vector_store %arg11[%c256_73, %c384_74], %106 {strides = array<i32>} : memref<288x768xbf16, #tpu.memory_space<vmem>>, vector<32x384xbf16>,
    %c0_75 = arith.constant 0 : index
    %c0_76 = arith.constant 0 : index
    %108 = vector.load %arg5[%c0_75, %c0_76] : memref<32x288xbf16, #tpu.memory_space<vmem>>, vector<32x288xbf16>
    %c0_77 = arith.constant 0 : index
    %c0_78 = arith.constant 0 : index
    %109 = vector.load %arg11[%c0_77, %c0_78] : memref<288x768xbf16, #tpu.memory_space<vmem>>, vector<288x768xbf16>
    %cst_79 = arith.constant dense<0.000000e+00> : vector<32x768xf32>
    %110 = tpu.matmul %108, %109, %cst_79 {dimension_numbers = #tpu.dot_dimension_numbers<[1], [0], [0], [1], [0, 0, 1, 1], [], []>} : vector<32x288xbf16>, vector<288x768xbf16>, vector<32x768xf32> -> vector<32x768xf32>
    %c0_80 = arith.constant 0 : index
    %c0_81 = arith.constant 0 : index
    %111 = vector.load %arg6[%c0_80, %c0_81] : memref<32x1xf32, #tpu.memory_space<vmem>>, vector<32x1xf32>
    %112 = vector.broadcast %111 : vector<32x1xf32> to vector<32x768xf32>
    %113 = arith.mulf %110, %112 : vector<32x768xf32>
    %c0_82 = arith.constant 0 : index
    %c0_83 = arith.constant 0 : index
    %114 = vector.load %arg7[%c0_82, %c0_83] : memref<32x1xf32, #tpu.memory_space<vmem>>, vector<32x1xf32>
    %115 = vector.broadcast %114 : vector<32x1xf32> to vector<32x768xf32>
    %116 = arith.addf %113, %115 : vector<32x768xf32>
    %117 = vector.extract_strided_slice %116 {offsets = [0, 0], sizes = [32, 384], strides = [1, 1]} : vector<32x768xf32> to vector<32x384xf32>
    %118 = vector.extract_strided_slice %0 {offsets = [0, 0, 50], sizes = [1, 32, 384], strides = [1, 1, 1]} : vector<2x32x576xf32> to vector<1x32x384xf32>
    %119 = vector.shape_cast %118 : vector<1x32x384xf32> to vector<32x384xf32>
    %120 = arith.addf %117, %119 : vector<32x384xf32>
    %c0_84 = arith.constant 0 : index
    %c0_85 = arith.constant 0 : index
    %c0_86 = arith.constant 0 : index
    %121 = vector.load %arg9[%c0_84, %c0_85, %c0_86] : memref<2x32x384xf32, #tpu.memory_space<vmem>>, vector<1x32x384xf32>
    %122 = vector.shape_cast %121 : vector<1x32x384xf32> to vector<32x384xf32>
    %123 = vector.shape_cast %120 : vector<32x384xf32> to vector<1x32x384xf32>
    tpu.vector_store %arg9[%c0_84, %c0_85, %c0_86], %123 {strides = array<i32>} : memref<2x32x384xf32, #tpu.memory_space<vmem>>, vector<1x32x384xf32>,
    %124 = vector.extract_strided_slice %116 {offsets = [0, 384], sizes = [32, 384], strides = [1, 1]} : vector<32x768xf32> to vector<32x384xf32>
    %125 = vector.extract_strided_slice %0 {offsets = [1, 0, 50], sizes = [1, 32, 384], strides = [1, 1, 1]} : vector<2x32x576xf32> to vector<1x32x384xf32>
    %126 = vector.shape_cast %125 : vector<1x32x384xf32> to vector<32x384xf32>
    %127 = arith.addf %124, %126 : vector<32x384xf32>
    %c1 = arith.constant 1 : index
    %c0_87 = arith.constant 0 : index
    %c0_88 = arith.constant 0 : index
    %128 = vector.load %arg9[%c1, %c0_87, %c0_88] : memref<2x32x384xf32, #tpu.memory_space<vmem>>, vector<1x32x384xf32>
    %129 = vector.shape_cast %128 : vector<1x32x384xf32> to vector<32x384xf32>
    %130 = vector.shape_cast %127 : vector<32x384xf32> to vector<1x32x384xf32>
    tpu.vector_store %arg9[%c1, %c0_87, %c0_88], %130 {strides = array<i32>} : memref<2x32x384xf32, #tpu.memory_space<vmem>>, vector<1x32x384xf32>,
    return
  }
  func.func @transform_0(%arg0: i32) -> (i32, i32, i32) {
    %c0_i32 = arith.constant 0 : i32
    %c0_i32_0 = arith.constant 0 : i32
    %c0_i32_1 = arith.constant 0 : i32
    return %arg0, %c0_i32, %c0_i32_0 : i32, i32, i32
  }
  func.func @transform_1(%arg0: i32) -> (i32, i32) {
    %c0_i32 = arith.constant 0 : i32
    %c0_i32_0 = arith.constant 0 : i32
    %c0_i32_1 = arith.constant 0 : i32
    return %c0_i32, %c0_i32_0 : i32, i32
  }
  func.func @transform_2(%arg0: i32) -> (i32, i32) {
    %c0_i32 = arith.constant 0 : i32
    %c0_i32_0 = arith.constant 0 : i32
    %c0_i32_1 = arith.constant 0 : i32
    return %c0_i32, %c0_i32_0 : i32, i32
  }
  func.func @transform_3(%arg0: i32) -> (i32, i32) {
    %c0_i32 = arith.constant 0 : i32
    %c0_i32_0 = arith.constant 0 : i32
    %c0_i32_1 = arith.constant 0 : i32
    return %c0_i32, %c0_i32_0 : i32, i32
  }
  func.func @transform_4(%arg0: i32) -> (i32, i32) {
    %c0_i32 = arith.constant 0 : i32
    %c0_i32_0 = arith.constant 0 : i32
    %c0_i32_1 = arith.constant 0 : i32
    return %c0_i32, %c0_i32_0 : i32, i32
  }
  func.func @transform_5(%arg0: i32) -> (i32, i32) {
    %c0_i32 = arith.constant 0 : i32
    %c0_i32_0 = arith.constant 0 : i32
    %c0_i32_1 = arith.constant 0 : i32
    return %c0_i32, %c0_i32_0 : i32, i32
  }
  func.func @transform_6(%arg0: i32) -> (i32, i32) {
    %c0_i32 = arith.constant 0 : i32
    %c0_i32_0 = arith.constant 0 : i32
    %c0_i32_1 = arith.constant 0 : i32
    return %c0_i32, %c0_i32_0 : i32, i32
  }
  func.func @transform_7(%arg0: i32) -> (i32, i32) {
    %c0_i32 = arith.constant 0 : i32
    %c0_i32_0 = arith.constant 0 : i32
    %c0_i32_1 = arith.constant 0 : i32
    return %c0_i32, %c0_i32_0 : i32, i32
  }
  func.func @transform_8(%arg0: i32) -> (i32, i32, i32) {
    %c0_i32 = arith.constant 0 : i32
    %c0_i32_0 = arith.constant 0 : i32
    %c0_i32_1 = arith.constant 0 : i32
    return %arg0, %c0_i32, %c0_i32_0 : i32, i32, i32
  }
}

</mosaic_0001>

<bundles_post_ra>
// kernel: _lambda_.1
= control target key start
LH: loop header
LB: loop body
LE: loop exit
PB: predicated region body
PF: predicated region fallthrough
CT: control target
= control target key end

     0   :  { %s3628_s27 = smov 0   ;;  %s5462_s0 = inlined_call_operand.vmem [shape: f32[4,32,576], index: 0, kind: input, shape index: {}]   ;;  %s5463_s1 = inlined_call_operand.vmem [shape: bf16[32,288], index: 1, kind: input, shape index: {}]   ;;  %s5464_s2 = inlined_call_operand.vmem [shape: f32[32,1], index: 2, kind: input, shape index: {}]   ;;  %s5465_s3 = inlined_call_operand.vmem [shape: f32[32,1], index: 3, kind: input, shape index: {}]   ;;  %s5466_s4 = inlined_call_operand.vmem [shape: bf16[32,288], index: 4, kind: input, shape index: {}]   ;;  %s5467_s5 = inlined_call_operand.vmem [shape: f32[32,1], index: 5, kind: input, shape index: {}]   ;;  %s5468_s6 = inlined_call_operand.vmem [shape: f32[32,1], index: 6, kind: input, shape index: {}]   ;;  %s5469_s7 = inlined_call_operand.vmem [shape: f32[1,1024], index: 7, kind: input, shape index: {}]   ;;  %s5470_s8 = inlined_call_operand.vmem [shape: f32[4,32,384], index: 8, kind: output, shape index: {}]  }
   0x1 LB: > { %s3392_s28 = sadd.s32 4294967295, %s3572_s27   ;;  %p3396_p0 = scmp.ge.s32.totalorder %s3572_s27, 1  ;;  %s3572_s27 = sphi %s3628_s27, %s18_s27  }
   0x2   : > { %p264_p1 = scmp.lt.s32.totalorder %s3572_s27, 3 }
   0x4   : > { %p265_p2 = pnand %p3396_p0, %p264_p1 }
   0x6   : > { %268 = sbr.rel (%p265_p2) target bundleno = 1199 (0x4af), region = 52 }
   0xd   : > { %s3397_s29 = sshll.u32 %s3392_s28, 1  ;;  %s3574_s12 = smov 127   ;;  %v3747_v18 = vld [vmem:[%s5463_s1 + $0x4] ss:$12 sps:$4 sm:$0xff]   ;;  %v5471_v33 = vmov 0   ;;  %vm413_vm0 = vcmask 1039360  }
   0xe   : > { %p301_p3 = scmp.lt.s32.totalorder %s3397_s29, 3  ;;  %s3575_s13 = smov 126   ;;  %1344 = vmatprep.mubr.bf16.mxu1 %v3747_v18  ;;  %1397 = vmatprep.mubr.bf16.mxu0 %v5471_v33  ;;  %vm458_vm1 = vcmask 1031168   ;;  %vm503_vm2 = vcmask 850944   ;;  %vm548_vm3 = vcmask 842752   ;;  %vm593_vm4 = vcmask 834560  }
   0xf   : > { %s3576_s14 = smov 104   ;;  %s3577_s15 = smov 103   ;;  %3516 = vset.pattern.permute.xlu0 %v5471_v33  ;;  %3517 = vset.pattern.permute.xlu1 %v5471_v33  ;;  %vm638_vm5 = vcmask 654336   ;;  %vm683_vm6 = vcmask 646144   ;;  %vm728_vm7 = vcmask 637952   ;;  %vm1305_vm8 = vcmask 261120  }
  0x10   : > { %s5481_s29 = smov (!%p301_p3, %s3397_s29), 3  ;;  %s3578_s16 = smov 102  }
  0x11   : > { %s3497_s30 = smul.u32 160, %s5481_s29  ;;  %s3579_s17 = smov 80  }
  0x12   : > { %s3580_s20 = smov 79   ;;  %s3581_s21 = smov 78  }
  0x13   : > { %s3642_s11 = scalar_lea.vmem %s5462_s0, %s3497_s30 }
  0x14   : > { %v316_v0 = vld [vmem:[%s3642_s11 + $0x8] sm:$0xff]  ;;  %v321_v1 = vld [vmem:[%s3642_s11 + $0x30] sm:$0xff]  ;;  %v315_v2 = vld [vmem:[%s3642_s11] sm:$0xff] }
  0x15   : > { %v3647_v3 = vpack.c.bf16 %v321_v1, %v316_v0  ;;  %v320_v4 = vld [vmem:[%s3642_s11 + $0x28] sm:$0xff]  ;;  %v317_v5 = vld [vmem:[%s3642_s11 + $0x10] sm:$0xff]  ;;  %v322_v6 = vld [vmem:[%s3642_s11 + $0x38] sm:$0xff] }
  0x16   : > { %v3652_v7 = vpack.c.bf16 %v320_v4, %v315_v2  ;;  %v326_v8 = vld [vmem:[%s3642_s11 + $0x58] sm:$0xff]  ;;  %v331_v9 = vld [vmem:[%s3642_s11 + $0x80] sm:$0xff]  ;;  %v3658_v10 = vpack.c.bf16 %v322_v6, %v317_v5  ;;  %v325_v12 = vld [vmem:[%s3642_s11 + $0x50] sm:$0xff] }
  0x17   : > { %395 = vrot.lane.b32.xlu0 %v3647_v3, %s3574_s12  ;;  %v3660_v11 = vpack.c.bf16 %v331_v9, %v326_v8  ;;  %v330_v13 = vld [vmem:[%s3642_s11 + $0x78] sm:$0xff]  ;;  %1312 = vmatprep.subr.bf16.mxu1 %v3647_v3  ;;  %v327_v14 = vld [vmem:[%s3642_s11 + $0x60] sm:$0xff]  ;;  %v332_v15 = vld [vmem:[%s3642_s11 + $0x88] sm:$0xff] }
  0x18   : > { %393 = vrot.lane.b32.xlu1 %v3652_v7, %s3574_s12  ;;  %1313 = vmatpush1.bf16.msra.mxu1 %v3652_v7  ;;  %v3671_v16 = vpack.c.bf16 %v330_v13, %v325_v12  ;;  %v3675_v17 = vpack.c.bf16 %v332_v15, %v327_v14  ;;  %v318_v19 = vld [vmem:[%s3642_s11 + $0x18] sm:$0xff]  ;;  %v323_v20 = vld [vmem:[%s3642_s11 + $0x40] sm:$0xff]  ;;  %v324_v22 = vld [vmem:[%s3642_s11 + $0x48] sm:$0xff] }
  0x19   : > { %1314 = vmatprep.subr.bf16.mxu1 %v3660_v11  ;;  %v319_v21 = vld [vmem:[%s3642_s11 + $0x20] sm:$0xff]  ;;  %v3764_v23 = vpack.c.bf16 %v323_v20, %v318_v19  ;;  %v328_v25 = vld [vmem:[%s3642_s11 + $0x68] sm:$0xff]  ;;  %v333_v26 = vld [vmem:[%s3642_s11 + $0x90] sm:$0xff] }
  0x1a   : > { %v3768_v24 = vpack.c.bf16 %v324_v22, %v319_v21  ;;  %v329_v27 = vld [vmem:[%s3642_s11 + $0x70] sm:$0xff]  ;;  %v334_v28 = vld [vmem:[%s3642_s11 + $0x98] sm:$0xff]  ;;  %v3776_v29 = vpack.c.bf16 %v333_v26, %v328_v25  ;;  %v336_v58 = vld [vmem:[%s3642_s11 + $0xa8] sm:$0xff] }
  0x1b   : > { %397 = vrot.lane.b32.xlu0 %v3658_v10, %s3574_s12  ;;  %v3780_v30 = vpack.c.bf16 %v334_v28, %v329_v27  ;;  %v341_v59 = vld [vmem:[%s3642_s11 + $0xd0] sm:$0xff]  ;;  %v342_v62 = vld [vmem:[%s3642_s11 + $0xd8] sm:$0xff]  ;;  %v335_v4 = vld [vmem:[%s3642_s11 + $0xa0] sm:$0xff] }
  0x1c   : > { %405 = vrot.lane.b32.xlu1 %v3660_v11, %s3574_s12  ;;  %1315 = vmatpush1.bf16.msra.mxu1 %v3671_v16  ;;  %v337_v61 = vld [vmem:[%s3642_s11 + $0xb0] sm:$0xff]  ;;  %v3881_v2 = vpack.c.bf16 %v341_v59, %v336_v58  ;;  %v340_v5 = vld [vmem:[%s3642_s11 + $0xc8] sm:$0xff]  ;;  %v346_v12 = vld [vmem:[%s3642_s11 + $0xf8] sm:$0xff] }
  0x1d   : > { %v3895_v9 = vpack.c.bf16 %v340_v5, %v335_v4  ;;  %v351_v13 = vld [vmem:[%s3642_s11 + $0x120] sm:$0xff]  ;;  %v352_v20 = vld [vmem:[%s3642_s11 + $0x128] sm:$0xff]  ;;  %v345_v22 = vld [vmem:[%s3642_s11 + $0xf0] sm:$0xff] }
  0x1e   : > { %v347_v19 = vld [vmem:[%s3642_s11 + $0x100] sm:$0xff]  ;;  %v350_v25 = vld [vmem:[%s3642_s11 + $0x118] sm:$0xff] }
  0x1f   : > { %407 = vrot.lane.b32.xlu0 %v3675_v17, %s3574_s12 }
  0x20   : > { %403 = vrot.lane.b32.xlu1 %v3671_v16, %s3574_s12 }
  0x23   : > { %440 = vrot.lane.b32.xlu0 %v3647_v3, %s3575_s13 }
  0x24   : > { %442 = vrot.lane.b32.xlu1 %v3658_v10, %s3575_s13 }
  0x27   : > { %438 = vrot.lane.b32.xlu0 %v3652_v7, %s3575_s13 }
  0x28   : > { %450 = vrot.lane.b32.xlu1 %v3660_v11, %s3575_s13 }
  0x2b   : > { %452 = vrot.lane.b32.xlu0 %v3675_v17, %s3575_s13 }
  0x2c   : > { %448 = vrot.lane.b32.xlu1 %v3671_v16, %s3575_s13 }
  0x2f   : > { %485 = vrot.lane.b32.xlu0 %v3647_v3, %s3576_s14 }
  0x30   : > { %487 = vrot.lane.b32.xlu1 %v3658_v10, %s3576_s14 }
  0x33   : > { %483 = vrot.lane.b32.xlu0 %v3652_v7, %s3576_s14 }
  0x34   : > { %495 = vrot.lane.b32.xlu1 %v3660_v11, %s3576_s14 }
  0x37   : > { %497 = vrot.lane.b32.xlu0 %v3675_v17, %s3576_s14 }
  0x38   : > { %493 = vrot.lane.b32.xlu1 %v3671_v16, %s3576_s14 }
  0x3b   : > { %530 = vrot.lane.b32.xlu0 %v3647_v3, %s3577_s15 }
  0x3c   : > { %532 = vrot.lane.b32.xlu1 %v3658_v10, %s3577_s15 }
  0x3f   : > { %528 = vrot.lane.b32.xlu0 %v3652_v7, %s3577_s15 }
  0x40   : > { %540 = vrot.lane.b32.xlu1 %v3660_v11, %s3577_s15 }
  0x43   : > { %542 = vrot.lane.b32.xlu0 %v3675_v17, %s3577_s15 }
  0x44   : > { %538 = vrot.lane.b32.xlu1 %v3671_v16, %s3577_s15 }
  0x47   : > { %575 = vrot.lane.b32.xlu0 %v3647_v3, %s3578_s16 }
  0x48   : > { %577 = vrot.lane.b32.xlu1 %v3658_v10, %s3578_s16 }
  0x4b   : > { %573 = vrot.lane.b32.xlu0 %v3652_v7, %s3578_s16 }
  0x4c   : > { %585 = vrot.lane.b32.xlu1 %v3660_v11, %s3578_s16 }
  0x4f   : > { %587 = vrot.lane.b32.xlu0 %v3675_v17, %s3578_s16 }
  0x50   : > { %583 = vrot.lane.b32.xlu1 %v3671_v16, %s3578_s16 }
  0x53   : > { %620 = vrot.lane.b32.xlu0 %v3647_v3, %s3579_s17 }
  0x54   : > { %622 = vrot.lane.b32.xlu1 %v3658_v10, %s3579_s17 }
  0x57   : > { %618 = vrot.lane.b32.xlu0 %v3652_v7, %s3579_s17 }
  0x58   : > { %630 = vrot.lane.b32.xlu1 %v3660_v11, %s3579_s17 }
  0x5b   : > { %632 = vrot.lane.b32.xlu0 %v3675_v17, %s3579_s17 }
  0x5c   : > { %628 = vrot.lane.b32.xlu1 %v3671_v16, %s3579_s17 }
  0x5f   : > { %665 = vrot.lane.b32.xlu0 %v3647_v3, %s3580_s20 }
  0x60   : > { %667 = vrot.lane.b32.xlu1 %v3658_v10, %s3580_s20 }
  0x63   : > { %663 = vrot.lane.b32.xlu0 %v3652_v7, %s3580_s20 }
  0x64   : > { %675 = vrot.lane.b32.xlu1 %v3660_v11, %s3580_s20 }
  0x67   : > { %677 = vrot.lane.b32.xlu0 %v3675_v17, %s3580_s20 }
  0x68   : > { %673 = vrot.lane.b32.xlu1 %v3671_v16, %s3580_s20 }
  0x6b   : > { %399 = vrot.lane.b32.xlu0 %v3764_v23, %s3574_s12 }
  0x6c   : > { %401 = vrot.lane.b32.xlu1 %v3768_v24, %s3574_s12 }
  0x6f   : > { %409 = vrot.lane.b32.xlu0 %v3776_v29, %s3574_s12 }
  0x70   : > { %411 = vrot.lane.b32.xlu1 %v3780_v30, %s3574_s12 }
  0x73   : > { %444 = vrot.lane.b32.xlu0 %v3764_v23, %s3575_s13 }
  0x74   : > { %446 = vrot.lane.b32.xlu1 %v3768_v24, %s3575_s13 }
  0x77   : > { %454 = vrot.lane.b32.xlu0 %v3776_v29, %s3575_s13 }
  0x78   : > { %456 = vrot.lane.b32.xlu1 %v3780_v30, %s3575_s13 }
  0x7b   : > { %710 = vrot.lane.b32.xlu0 %v3647_v3, %s3581_s21  ;;  %v3885_v3 = vpack.c.bf16 %v342_v62, %v337_v61 }
  0x7c   : > { %712 = vrot.lane.b32.xlu1 %v3658_v10, %s3581_s21 }
  0x7f   : > { %489 = vrot.lane.b32.xlu0 %v3764_v23, %s3576_s14 }
  0x80   : > { %491 = vrot.lane.b32.xlu1 %v3768_v24, %s3576_s14 }
  0x83   : > { %708 = vrot.lane.b32.xlu0 %v3652_v7, %s3581_s21 }
  0x84   : > { %720 = vrot.lane.b32.xlu1 %v3660_v11, %s3581_s21 }
  0x87   : > { %722 = vrot.lane.b32.xlu0 %v3675_v17, %s3581_s21 }
  0x88   : > { %499 = vrot.lane.b32.xlu1 %v3776_v29, %s3576_s14 }
  0x89   : > { %v396_v31 = vpop.permute.xlu0 %395 }
  0x8a   : > { %v394_v32 = vpop.permute.xlu1 %393 }
  0x8b   : > { %501 = vrot.lane.b32.xlu0 %v3780_v30, %s3576_s14  ;;  %v414_v37 = vsel %vm413_vm0, %v394_v32, %v396_v31  ;;  %v3923_v32 = vpack.c.bf16 %v350_v25, %v345_v22  ;;  %v4021_v25 = vld [vmem:[%s5463_s1 + $0x18] ss:$12 sps:$4 sm:$0xff]  }
  0x8c   : > { %718 = vrot.lane.b32.xlu1 %v3671_v16, %s3581_s21  ;;  %v3906_v16 = vpack.c.bf16 %v351_v13, %v346_v12  ;;  %v338_v13 = vld [vmem:[%s3642_s11 + $0xb8] sm:$0xff] }
  0x8d   : > { %v3816_v34 = vpop.permute.xlu0 %397 }
  0x8e   : > { %v406_v35 = vpop.permute.xlu1 %405  ;;  %v415_v36 = vsel %vm413_vm0, %v396_v31, %v3816_v34  ;;  %v3919_v31 = vpack.c.bf16 %v352_v20, %v347_v19  ;;  %v344_v19 = vld [vmem:[%s3642_s11 + $0xe8] sm:$0xff] }
  0x8f   : > { %534 = vrot.lane.b32.xlu0 %v3764_v23, %s3577_s15  ;;  %1316 = vmatprep.subr.bf16.mxu1 %v415_v36 }
  0x90   : > { %536 = vrot.lane.b32.xlu1 %v3768_v24, %s3577_s15  ;;  %1317 = vmatpush1.bf16.msra.mxu1 %v414_v37 }
  0x91   : > { %v3826_v38 = vpop.permute.xlu0 %407 }
  0x92   : > { %v404_v39 = vpop.permute.xlu1 %403  ;;  %v419_v40 = vsel %vm413_vm0, %v406_v35, %v3826_v38 }
  0x93   : > { %544 = vrot.lane.b32.xlu0 %v3776_v29, %s3577_s15  ;;  %1318 = vmatprep.subr.bf16.mxu1 %v419_v40  ;;  %v418_v41 = vsel %vm413_vm0, %v404_v39, %v406_v35 }
  0x94   : > { %546 = vrot.lane.b32.xlu1 %v3780_v30, %s3577_s15  ;;  %1319 = vmatpush1.bf16.msra.mxu1 %v418_v41 }
  0x95   : > { %v441_v42 = vpop.permute.xlu0 %440 }
  0x96   : > { %v3835_v43 = vpop.permute.xlu1 %442 }
  0x97   : > { %714 = vrot.lane.b32.xlu0 %v3764_v23, %s3581_s21  ;;  %v460_v44 = vsel %vm458_vm1, %v441_v42, %v3835_v43 }
  0x98   : > { %716 = vrot.lane.b32.xlu1 %v3768_v24, %s3581_s21  ;;  %1320 = vmatprep.subr.bf16.mxu1 %v460_v44 }
  0x99   : > { %v439_v45 = vpop.permute.xlu0 %438 }
  0x9a   : > { %v451_v46 = vpop.permute.xlu1 %450  ;;  %v459_v47 = vsel %vm458_vm1, %v439_v45, %v441_v42 }
  0x9b   : > { %579 = vrot.lane.b32.xlu0 %v3764_v23, %s3578_s16  ;;  %1321 = vmatpush1.bf16.msra.mxu1 %v459_v47 }
  0x9c   : > { %581 = vrot.lane.b32.xlu1 %v3768_v24, %s3578_s16 }
  0x9d   : > { %v3848_v48 = vpop.permute.xlu0 %452 }
  0x9e   : > { %v449_v49 = vpop.permute.xlu1 %448  ;;  %v464_v50 = vsel %vm458_vm1, %v451_v46, %v3848_v48 }
  0x9f   : > { %724 = vrot.lane.b32.xlu0 %v3776_v29, %s3581_s21  ;;  %1322 = vmatprep.subr.bf16.mxu1 %v464_v50  ;;  %v463_v51 = vsel %vm458_vm1, %v449_v49, %v451_v46 }
  0xa0   : > { %726 = vrot.lane.b32.xlu1 %v3780_v30, %s3581_s21  ;;  %1323 = vmatpush1.bf16.msra.mxu1 %v463_v51 }
  0xa1   : > { %v486_v52 = vpop.permute.xlu0 %485 }
  0xa2   : > { %v3857_v53 = vpop.permute.xlu1 %487 }
  0xa3   : > { %589 = vrot.lane.b32.xlu0 %v3776_v29, %s3578_s16  ;;  %v505_v54 = vsel %vm503_vm2, %v486_v52, %v3857_v53 }
  0xa4   : > { %591 = vrot.lane.b32.xlu1 %v3780_v30, %s3578_s16  ;;  %1324 = vmatprep.subr.bf16.mxu1 %v505_v54 }
  0xa5   : > { %v484_v55 = vpop.permute.xlu0 %483 }
  0xa6   : > { %v496_v56 = vpop.permute.xlu1 %495  ;;  %v504_v57 = vsel %vm503_vm2, %v484_v55, %v486_v52 }
  0xa7   : > { %624 = vrot.lane.b32.xlu0 %v3764_v23, %s3579_s17  ;;  %1325 = vmatpush1.bf16.msra.mxu1 %v504_v57 }
  0xa8   : > { %626 = vrot.lane.b32.xlu1 %v3768_v24, %s3579_s17 }
  0xa9   : > { %v3872_v60 = vpop.permute.xlu0 %497 }
  0xaa   : > { %v494_v63 = vpop.permute.xlu1 %493  ;;  %v509_v0 = vsel %vm503_vm2, %v496_v56, %v3872_v60 }
  0xab   : > { %634 = vrot.lane.b32.xlu0 %v3776_v29, %s3579_s17  ;;  %1326 = vmatprep.subr.bf16.mxu1 %v509_v0  ;;  %v508_v1 = vsel %vm503_vm2, %v494_v63, %v496_v56 }
  0xac   : > { %636 = vrot.lane.b32.xlu1 %v3780_v30, %s3579_s17  ;;  %1327 = vmatpush1.bf16.msra.mxu1 %v508_v1 }
  0xad   : > { %v531_v6 = vpop.permute.xlu0 %530 }
  0xae   : > { %v3889_v7 = vpop.permute.xlu1 %532 }
  0xaf   : > { %773 = vrot.lane.b32.xlu0 %v3881_v2, %s3574_s12  ;;  %v550_v8 = vsel %vm548_vm3, %v531_v6, %v3889_v7 }
  0xb0   : > { %775 = vrot.lane.b32.xlu1 %v3885_v3, %s3574_s12  ;;  %1328 = vmatprep.subr.bf16.mxu1 %v550_v8 }
  0xb1   : > { %v529_v11 = vpop.permute.xlu0 %528 }
  0xb2   : > { %v541_v14 = vpop.permute.xlu1 %540  ;;  %v549_v15 = vsel %vm548_vm3, %v529_v11, %v531_v6  ;;  %v3992_v6 = vld [vmem:[%s5463_s1] ss:$12 sps:$4 sm:$0xff]   ;;  %v4000_v11 = vld [vmem:[%s5463_s1 + $0x1c] ss:$12 sps:$4 sm:$0xff]  }
  0xb3   : > { %771 = vrot.lane.b32.xlu0 %v3895_v9, %s3574_s12  ;;  %1329 = vmatpush1.bf16.msra.mxu1 %v549_v15 }
  0xb4   : > { %669 = vrot.lane.b32.xlu1 %v3764_v23, %s3580_s20 }
  0xb5   : > { %v3910_v21 = vpop.permute.xlu0 %542 }
  0xb6   : > { %v539_v26 = vpop.permute.xlu1 %538  ;;  %v554_v27 = vsel %vm548_vm3, %v541_v14, %v3910_v21 }
  0xb7   : > { %671 = vrot.lane.b32.xlu0 %v3768_v24, %s3580_s20  ;;  %1330 = vmatprep.subr.bf16.mxu1 %v554_v27  ;;  %v553_v28 = vsel %vm548_vm3, %v539_v26, %v541_v14  ;;  %v343_v14 = vld [vmem:[%s3642_s11 + $0xe0] sm:$0xff] }
  0xb8   : > { %783 = vrot.lane.b32.xlu1 %v3906_v16, %s3574_s12  ;;  %1331 = vmatpush1.bf16.msra.mxu1 %v553_v28  ;;  %v4016_v22 = vpack.c.bf16 %v343_v14, %v338_v13 }
  0xb9   : > { %v576_v35 = vpop.permute.xlu0 %575 }
  0xba   : > { %v3925_v36 = vpop.permute.xlu1 %577 }
  0xbb   : > { %785 = vrot.lane.b32.xlu0 %v3919_v31, %s3574_s12  ;;  %v595_v24 = vsel %vm593_vm4, %v576_v35, %v3925_v36 }
  0xbc   : > { %781 = vrot.lane.b32.xlu1 %v3923_v32, %s3574_s12  ;;  %1332 = vmatprep.subr.bf16.mxu1 %v595_v24  ;;  %v348_v24 = vld [vmem:[%s3642_s11 + $0x108] sm:$0xff] }
  0xbd   : > { %v574_v37 = vpop.permute.xlu0 %573 }
  0xbe   : > { %v586_v39 = vpop.permute.xlu1 %585  ;;  %v594_v40 = vsel %vm593_vm4, %v574_v37, %v576_v35  ;;  %v353_v37 = vld [vmem:[%s3642_s11 + $0x130] sm:$0xff] }
  0xbf   : > { %679 = vrot.lane.b32.xlu0 %v3776_v29, %s3580_s20  ;;  %1333 = vmatpush1.bf16.msra.mxu1 %v594_v40 }
  0xc0   : > { %681 = vrot.lane.b32.xlu1 %v3780_v30, %s3580_s20 }
  0xc1   : > { %v3938_v41 = vpop.permute.xlu0 %587 }
  0xc2   : > { %v584_v42 = vpop.permute.xlu1 %583  ;;  %v599_v44 = vsel %vm593_vm4, %v586_v39, %v3938_v41 }
  0xc3   : > { %817 = vrot.lane.b32.xlu0 %v3881_v2, %s3575_s13  ;;  %1334 = vmatprep.subr.bf16.mxu1 %v599_v44  ;;  %v598_v45 = vsel %vm593_vm4, %v584_v42, %v586_v39  ;;  %v4047_v42 = vpack.c.bf16 %v353_v37, %v348_v24  ;;  %v349_v44 = vld [vmem:[%s3642_s11 + $0x110] sm:$0xff] }
  0xc4   : > { %819 = vrot.lane.b32.xlu1 %v3885_v3, %s3575_s13  ;;  %1335 = vmatpush1.bf16.msra.mxu1 %v598_v45  ;;  %v354_v45 = vld [vmem:[%s3642_s11 + $0x138] sm:$0xff] }
  0xc5   : > { %v621_v46 = vpop.permute.xlu0 %620 }
  0xc6   : > { %v3947_v47 = vpop.permute.xlu1 %622 }
  0xc7   : > { %815 = vrot.lane.b32.xlu0 %v3895_v9, %s3575_s13  ;;  %v640_v30 = vsel %vm638_vm5, %v621_v46, %v3947_v47 }
  0xc8   : > { %827 = vrot.lane.b32.xlu1 %v3906_v16, %s3575_s13  ;;  %1336 = vmatprep.subr.bf16.mxu1 %v640_v30 }
  0xc9   : > { %v619_v49 = vpop.permute.xlu0 %618 }
  0xca   : > { %v631_v50 = vpop.permute.xlu1 %630  ;;  %v639_v51 = vsel %vm638_vm5, %v619_v49, %v621_v46  ;;  %v4057_v49 = vpack.c.bf16 %v354_v45, %v349_v44 }
  0xcb   : > { %829 = vrot.lane.b32.xlu0 %v3919_v31, %s3575_s13  ;;  %1337 = vmatpush1.bf16.msra.mxu1 %v639_v51 }
  0xcc   : > { %825 = vrot.lane.b32.xlu1 %v3923_v32, %s3575_s13 }
  0xcd   : > { %v3960_v52 = vpop.permute.xlu0 %632 }
  0xce   : > { %v629_v54 = vpop.permute.xlu1 %628  ;;  %v644_v55 = vsel %vm638_vm5, %v631_v50, %v3960_v52 }
  0xcf   : > { %861 = vrot.lane.b32.xlu0 %v3881_v2, %s3576_s14  ;;  %1338 = vmatprep.subr.bf16.mxu1 %v644_v55  ;;  %v643_v56 = vsel %vm638_vm5, %v629_v54, %v631_v50 }
  0xd0   : > { %863 = vrot.lane.b32.xlu1 %v3885_v3, %s3576_s14  ;;  %1339 = vmatpush1.bf16.msra.mxu1 %v643_v56 }
  0xd1   : > { %v666_v57 = vpop.permute.xlu0 %665 }
  0xd2   : > { %v3969_v58 = vpop.permute.xlu1 %667 }
  0xd3   : > { %859 = vrot.lane.b32.xlu0 %v3895_v9, %s3576_s14  ;;  %v685_v59 = vsel %vm683_vm6, %v666_v57, %v3969_v58 }
  0xd4   : > { %871 = vrot.lane.b32.xlu1 %v3906_v16, %s3576_s14  ;;  %1340 = vmatprep.subr.bf16.mxu1 %v685_v59 }
  0xd5   : > { %v664_v61 = vpop.permute.xlu0 %663 }
  0xd6   : > { %v676_v62 = vpop.permute.xlu1 %675  ;;  %v684_v63 = vsel %vm683_vm6, %v664_v61, %v666_v57 }
  0xd7   : > { %873 = vrot.lane.b32.xlu0 %v3919_v31, %s3576_s14  ;;  %1341 = vmatpush1.bf16.msra.mxu1 %v684_v63 }
  0xd8   : > { %869 = vrot.lane.b32.xlu1 %v3923_v32, %s3576_s14 }
  0xd9   : > { %v3982_v0 = vpop.permute.xlu0 %677 }
  0xda   : > { %v674_v1 = vpop.permute.xlu1 %673  ;;  %v689_v4 = vsel %vm683_vm6, %v676_v62, %v3982_v0 }
  0xdb   : > { %905 = vrot.lane.b32.xlu0 %v3881_v2, %s3577_s15  ;;  %1342 = vmatprep.subr.bf16.mxu1 %v689_v4  ;;  %v688_v5 = vsel %vm683_vm6, %v674_v1, %v676_v62 }
  0xdc   : > { %907 = vrot.lane.b32.xlu1 %v3885_v3, %s3577_s15  ;;  %1343 = vmatpush1.bf16.msra.mxu1 %v688_v5 }
  0xdd   : > { %v400_v8 = vpop.permute.xlu0 %399  ;;  %1418 = vmatprep.subr.bf16.mxu1 %v3764_v23  ;;  %v339_v23 = vld [vmem:[%s3642_s11 + $0xc0] sm:$0xff] }
  0xde   : > { %v402_v12 = vpop.permute.xlu1 %401  ;;  %v416_v28 = vsel %vm413_vm0, %v3816_v34, %v400_v8 }
  0xdf   : > { %903 = vrot.lane.b32.xlu0 %v3895_v9, %s3577_s15  ;;  %1345 = vmatmul.mubr.bf16.vlgmr.msra.gmra.mrb[0].mxu1 %v3992_v6 }
  0xe0   : > { %915 = vrot.lane.b32.xlu1 %v3906_v16, %s3577_s15  ;;  %1419 = vmatpush1.bf16.msra.mxu1 %v3658_v10  ;;  %v417_v10 = vsel %vm413_vm0, %v400_v8, %v402_v12  ;;  %v4090_v12 = vld [vmem:[%s5463_s1 + $0x8] ss:$12 sps:$4 sm:$0xff]  }
  0xe1   : > { %v410_v15 = vpop.permute.xlu0 %409  ;;  %1420 = vmatprep.subr.bf16.mxu1 %v3776_v29  ;;  %1354 = vmatprep.mubr.bf16.mxu1 %v4000_v11  ;;  %v4027_v29 = vpack.c.bf16 %v344_v19, %v339_v23 }
  0xe2   : > { %v412_v20 = vpop.permute.xlu1 %411  ;;  %v420_v34 = vsel %vm413_vm0, %v3826_v38, %v410_v15 }
  0xe3   : > { %917 = vrot.lane.b32.xlu0 %v3919_v31, %s3577_s15 }
  0xe4   : > { %913 = vrot.lane.b32.xlu1 %v3923_v32, %s3577_s15  ;;  %1421 = vmatpush1.bf16.msra.mxu1 %v3675_v17  ;;  %v421_v17 = vsel %vm413_vm0, %v410_v15, %v412_v20 }
  0xe5   : > { %v445_v26 = vpop.permute.xlu0 %444  ;;  %1422 = vmatprep.subr.bf16.mxu1 %v417_v10 }
  0xe6   : > { %v447_v27 = vpop.permute.xlu1 %446  ;;  %v461_v50 = vsel %vm458_vm1, %v3835_v43, %v445_v26 }
  0xe7   : > { %777 = vrot.lane.b32.xlu0 %v4016_v22, %s3574_s12  ;;  %1355 = vmatmul.mubr.bf16.gmra.mrb[4].mxu1 %v4021_v25  ;;  %v462_v40 = vsel %vm458_vm1, %v445_v26, %v447_v27  ;;  %v4114_v26 = vld [vmem:[%s5463_s1 + $0x20] ss:$12 sps:$4 sm:$0xff]  }
  0xe8   : > { %779 = vrot.lane.b32.xlu1 %v4027_v29, %s3574_s12  ;;  %1423 = vmatpush1.bf16.msra.mxu1 %v416_v28 }
  0xe9   : > { %v455_v35 = vpop.permute.xlu0 %454  ;;  %1424 = vmatprep.subr.bf16.mxu1 %v421_v17  ;;  %1450 = vmatprep.mubr.bf16.mxu1 %v3747_v18 }
  0xea   : > { %v457_v39 = vpop.permute.xlu1 %456  ;;  %v465_v56 = vsel %vm458_vm1, %v3848_v48, %v455_v35 }
  0xeb   : > { %949 = vrot.lane.b32.xlu0 %v3881_v2, %s3578_s16  ;;  %v466_v54 = vsel %vm458_vm1, %v455_v35, %v457_v39 }
  0xec   : > { %951 = vrot.lane.b32.xlu1 %v3885_v3, %s3578_s16  ;;  %1425 = vmatpush1.bf16.msra.mxu1 %v420_v34 }
  0xed   : > { %v711_v46 = vpop.permute.xlu0 %710  ;;  %1426 = vmatprep.subr.bf16.mxu1 %v462_v40 }
  0xee   : > { %v4051_v30 = vpop.permute.xlu1 %712 }
  0xef   : > { %947 = vrot.lane.b32.xlu0 %v3895_v9, %s3578_s16  ;;  %v730_v38 = vsel %vm728_vm7, %v711_v46, %v4051_v30 }
  0xf0   : > { %787 = vrot.lane.b32.xlu1 %v4047_v42, %s3574_s12  ;;  %1365 = vmatprep.subr.bf16.mxu0 %v730_v38 }
  0xf1   : > { %1427 = vmatpush1.bf16.msra.mxu1 %v461_v50  ;;  %v490_v51 = vpop.permute.xlu0 %489 }
  0xf2   : > { %v492_v55 = vpop.permute.xlu1 %491  ;;  %1428 = vmatprep.subr.bf16.mxu1 %v466_v54  ;;  %v506_v62 = vsel %vm503_vm2, %v3857_v53, %v490_v51 }
  0xf3   : > { %789 = vrot.lane.b32.xlu0 %v4057_v49, %s3574_s12  ;;  %v507_v59 = vsel %vm503_vm2, %v490_v51, %v492_v55 }
  0xf4   : > { %959 = vrot.lane.b32.xlu1 %v3906_v16, %s3578_s16 }
  0xf5   : > { %1429 = vmatpush1.bf16.msra.mxu1 %v465_v56  ;;  %v709_v57 = vpop.permute.xlu0 %708 }
  0xf6   : > { %v721_v43 = vpop.permute.xlu1 %720  ;;  %1430 = vmatprep.subr.bf16.mxu1 %v507_v59  ;;  %v729_v61 = vsel %vm728_vm7, %v709_v57, %v711_v46 }
  0xf7   : > { %961 = vrot.lane.b32.xlu0 %v3919_v31, %s3578_s16  ;;  %1366 = vmatpush1.bf16.msra.mxu0 %v729_v61 }
  0xf8   : > { %957 = vrot.lane.b32.xlu1 %v3923_v32, %s3578_s16 }
  0xf9   : > { %1431 = vmatpush1.bf16.msra.mxu1 %v506_v62  ;;  %v723_v48 = vpop.permute.xlu0 %722 }
  0xfa   : > { %v500_v63 = vpop.permute.xlu1 %499  ;;  %v734_v1 = vsel %vm728_vm7, %v721_v43, %v723_v48 }
  0xfb   : > { %821 = vrot.lane.b32.xlu0 %v4016_v22, %s3575_s13  ;;  %1367 = vmatprep.subr.bf16.mxu0 %v734_v1  ;;  %v510_v13 = vsel %vm503_vm2, %v3872_v60, %v500_v63 }
  0xfc   : > { %823 = vrot.lane.b32.xlu1 %v4027_v29, %s3575_s13 }
  0xfd   : > { %v502_v4 = vpop.permute.xlu0 %501 }
  0xfe   : > { %v719_v5 = vpop.permute.xlu1 %718  ;;  %v511_v8 = vsel %vm503_vm2, %v500_v63, %v502_v4 }
  0xff   : > { %993 = vrot.lane.b32.xlu0 %v3881_v2, %s3579_s17  ;;  %v733_v53 = vsel %vm728_vm7, %v719_v5, %v721_v43  ;;  %1432 = vmatprep.subr.bf16.mxu1 %v511_v8 }
 0x100   : > { %995 = vrot.lane.b32.xlu1 %v3885_v3, %s3579_s17  ;;  %1368 = vmatpush1.bf16.msra.mxu0 %v733_v53 }
 0x101   : > { %1433 = vmatpush1.bf16.msra.mxu1 %v510_v13  ;;  %v535_v14 = vpop.permute.xlu0 %534 }
 0x102   : > { %v537_v15 = vpop.permute.xlu1 %536  ;;  %v551_v23 = vsel %vm548_vm3, %v3889_v7, %v535_v14 }
 0x103   : > { %991 = vrot.lane.b32.xlu0 %v3895_v9, %s3579_s17  ;;  %v552_v19 = vsel %vm548_vm3, %v535_v14, %v537_v15  ;;  %3407 = vmatmul.mubr.msk.bf16.vlgmr.msra.gmra.mrb[0].mxu0 %vm1305_vm8, %v4090_v12 }
 0x104   : > { %831 = vrot.lane.b32.xlu1 %v4047_v42, %s3575_s13  ;;  %1434 = vmatprep.subr.bf16.mxu1 %v552_v19 }
 0x105   : > { %1435 = vmatpush1.bf16.msra.mxu1 %v551_v23  ;;  %v545_v60 = vpop.permute.xlu0 %544  ;;  %1407 = vmatprep.mubr.bf16.mxu0 %v5471_v33 }
 0x106   : > { %v547_v20 = vpop.permute.xlu1 %546  ;;  %v555_v7 = vsel %vm548_vm3, %v3910_v21, %v545_v60 }
 0x107   : > { %833 = vrot.lane.b32.xlu0 %v4057_v49, %s3575_s13  ;;  %v556_v10 = vsel %vm548_vm3, %v545_v60, %v547_v20 }
 0x108   : > { %1003 = vrot.lane.b32.xlu1 %v3906_v16, %s3579_s17  ;;  %1436 = vmatprep.subr.bf16.mxu1 %v556_v10 }
 0x109   : > { %1437 = vmatpush1.bf16.msra.mxu1 %v555_v7  ;;  %v715_v27 = vpop.permute.xlu0 %714 }
 0x10a   : > { %v717_v28 = vpop.permute.xlu1 %716  ;;  %v731_v21 = vsel %vm728_vm7, %v4051_v30, %v715_v27 }
 0x10b   : > { %1005 = vrot.lane.b32.xlu0 %v3919_v31, %s3579_s17  ;;  %v732_v17 = vsel %vm728_vm7, %v715_v27, %v717_v28  ;;  %3408 = vmatmul.mubr.msk.bf16.gmra.mrb[4].mxu0 %vm1305_vm8, %v4114_v26 }
 0x10c   : > { %1001 = vrot.lane.b32.xlu1 %v3923_v32, %s3579_s17  ;;  %1471 = vmatprep.subr.bf16.mxu0 %v732_v17 }
 0x10d   : > { %1472 = vmatpush1.bf16.msra.mxu0 %v731_v21  ;;  %v580_v35 = vpop.permute.xlu0 %579  ;;  %1503 = vmatprep.mubr.bf16.mxu0 %v5471_v33 }
 0x10e   : > { %v582_v24 = vpop.permute.xlu1 %581  ;;  %v596_v37 = vsel %vm593_vm4, %v3925_v36, %v580_v35 }
 0x10f   : > { %865 = vrot.lane.b32.xlu0 %v4016_v22, %s3576_s14  ;;  %v597_v39 = vsel %vm593_vm4, %v580_v35, %v582_v24 }
 0x110   : > { %867 = vrot.lane.b32.xlu1 %v4027_v29, %s3576_s14  ;;  %1438 = vmatprep.subr.bf16.mxu1 %v597_v39 }
 0x111   : > { %1439 = vmatpush1.bf16.msra.mxu1 %v596_v37  ;;  %v725_v34 = vpop.permute.xlu0 %724 }
 0x112   : > { %v727_v40 = vpop.permute.xlu1 %726  ;;  %v735_v44 = vsel %vm728_vm7, %v723_v48, %v725_v34 }
 0x113   : > { %1037 = vrot.lane.b32.xlu0 %v3881_v2, %s3580_s20  ;;  %v736_v45 = vsel %vm728_vm7, %v725_v34, %v727_v40 }
 0x114   : > { %1039 = vrot.lane.b32.xlu1 %v3885_v3, %s3580_s20  ;;  %1473 = vmatprep.subr.bf16.mxu0 %v736_v45 }
 0x115   : > { %1474 = vmatpush1.bf16.msra.mxu0 %v735_v44  ;;  %v590_v36 = vpop.permute.xlu0 %589 }
 0x116   : > { %v592_v46 = vpop.permute.xlu1 %591  ;;  %v600_v30 = vsel %vm593_vm4, %v3938_v41, %v590_v36  ;;  %1524 = vmatprep.subr.bf16.mxu0 %v3881_v2 }
 0x117   : > { %1035 = vrot.lane.b32.xlu0 %v3895_v9, %s3580_s20  ;;  %v601_v38 = vsel %vm593_vm4, %v590_v36, %v592_v46 }
 0x118   : > { %875 = vrot.lane.b32.xlu1 %v4047_v42, %s3576_s14  ;;  %1440 = vmatprep.subr.bf16.mxu1 %v601_v38 }
 0x119   : > { %1441 = vmatpush1.bf16.msra.mxu1 %v600_v30  ;;  %v625_v50 = vpop.permute.xlu0 %624  ;;  %3409 = vmatmul.mubr.msk.bf16.vlgmr.msra.gmra.mrb[8].mxu0 %vm1305_vm8, %v4090_v12  ;;  %v1737_v30 = vld [vmem:[%s5464_s2 + $0x8] sm:$0xff] }
 0x11a   : > { %v627_v51 = vpop.permute.xlu1 %626  ;;  %v641_v41 = vsel %vm638_vm5, %v3947_v47, %v625_v50  ;;  %1525 = vmatpush1.bf16.msra.mxu0 %v3895_v9  ;;  %1513 = vmatprep.mubr.bf16.mxu0 %v5471_v33 }
 0x11b   : > { %877 = vrot.lane.b32.xlu0 %v4057_v49, %s3576_s14  ;;  %v642_v54 = vsel %vm638_vm5, %v625_v50, %v627_v51  ;;  %1526 = vmatprep.subr.bf16.mxu0 %v3906_v16 }
 0x11c   : > { %1047 = vrot.lane.b32.xlu1 %v3906_v16, %s3580_s20  ;;  %1442 = vmatprep.subr.bf16.mxu1 %v642_v54 }
 0x11d   : > { %1443 = vmatpush1.bf16.msra.mxu1 %v641_v41  ;;  %v635_v55 = vpop.permute.xlu0 %634  ;;  %v1792_v41 = vld [vmem:[%s5465_s3] sm:$0xff] }
 0x11e   : > { %v637_v56 = vpop.permute.xlu1 %636  ;;  %v645_v47 = vsel %vm638_vm5, %v3960_v52, %v635_v55  ;;  %1527 = vmatpush1.bf16.msra.mxu0 %v3923_v32 }
 0x11f   : > { %1049 = vrot.lane.b32.xlu0 %v3919_v31, %s3580_s20  ;;  %v646_v57 = vsel %vm638_vm5, %v635_v55, %v637_v56 }
 0x120   : > { %1045 = vrot.lane.b32.xlu1 %v3923_v32, %s3580_s20  ;;  %1444 = vmatprep.subr.bf16.mxu1 %v646_v57 }
 0x121   : > { %1445 = vmatpush1.bf16.msra.mxu1 %v645_v47  ;;  %v774_v59 = vpop.permute.xlu0 %773  ;;  %3410 = vmatmul.mubr.msk.bf16.gmra.mrb[12].mxu0 %vm1305_vm8, %v4114_v26  ;;  %v1739_v47 = vld [vmem:[%s5464_s2 + $0x18] sm:$0xff] }
 0x122   : > { %v4171_v43 = vpop.permute.xlu1 %775  ;;  %1556 = vmatprep.mubr.bf16.mxu0 %v3747_v18 }
 0x123   : > { %909 = vrot.lane.b32.xlu0 %v4016_v22, %s3577_s15  ;;  %v792_v52 = vsel %vm413_vm0, %v774_v59, %v4171_v43 }
 0x124   : > { %911 = vrot.lane.b32.xlu1 %v4027_v29, %s3577_s15  ;;  %1528 = vmatprep.subr.bf16.mxu0 %v792_v52 }
 0x125   : > { %v772_v61 = vpop.permute.xlu0 %771 }
 0x126   : > { %v791_v62 = vsel %vm413_vm0, %v772_v61, %v774_v59  ;;  %v670_v48 = vpop.permute.xlu1 %669  ;;  %v1738_v59 = vld [vmem:[%s5464_s2 + $0x10] sm:$0xff]  ;;  %v1795_v61 = vld [vmem:[%s5465_s3 + $0x18] sm:$0xff] }
 0x127   : > { %919 = vrot.lane.b32.xlu0 %v4047_v42, %s3577_s15  ;;  %1529 = vmatpush1.bf16.msra.mxu0 %v791_v62  ;;  %v686_v5 = vsel %vm683_vm6, %v3969_v58, %v670_v48 }
 0x128   : > { %921 = vrot.lane.b32.xlu1 %v4057_v49, %s3577_s15 }
 0x129   : > { %v672_v63 = vpop.permute.xlu0 %671 }
 0x12a   : > { %v784_v1 = vpop.permute.xlu1 %783  ;;  %v687_v4 = vsel %vm683_vm6, %v670_v48, %v672_v63  ;;  %v1794_v48 = vld [vmem:[%s5465_s3 + $0x10] sm:$0xff] }
 0x12b   : > { %953 = vrot.lane.b32.xlu0 %v4016_v22, %s3578_s16  ;;  %1446 = vmatprep.subr.bf16.mxu1 %v687_v4 }
 0x12c   : > { %955 = vrot.lane.b32.xlu1 %v4027_v29, %s3578_s16  ;;  %1447 = vmatpush1.bf16.msra.mxu1 %v686_v5 }
 0x12d   : > { %v4192_v8 = vpop.permute.xlu0 %785 }
 0x12e   : > { %v782_v53 = vpop.permute.xlu1 %781  ;;  %v796_v13 = vsel %vm413_vm0, %v784_v1, %v4192_v8 }
 0x12f   : > { %v795_v14 = vsel %vm413_vm0, %v782_v53, %v784_v1  ;;  %1081 = vrot.lane.b32.xlu0 %v3881_v2, %s3581_s21  ;;  %1530 = vmatprep.subr.bf16.mxu0 %v796_v13 }
 0x130   : > { %1083 = vrot.lane.b32.xlu1 %v3885_v3, %s3581_s21  ;;  %1531 = vmatpush1.bf16.msra.mxu0 %v795_v14 }
 0x131   : > { %v680_v58 = vpop.permute.xlu0 %679 }
 0x132   : > { %v682_v15 = vpop.permute.xlu1 %681  ;;  %v690_v23 = vsel %vm683_vm6, %v3982_v0, %v680_v58 }
 0x133   : > { %1079 = vrot.lane.b32.xlu0 %v3895_v9, %s3581_s21  ;;  %v691_v19 = vsel %vm683_vm6, %v680_v58, %v682_v15 }
 0x134   : > { %963 = vrot.lane.b32.xlu1 %v4047_v42, %s3578_s16  ;;  %1448 = vmatprep.subr.bf16.mxu1 %v691_v19 }
 0x135   : > { %1449 = vmatpush1.bf16.msra.mxu1 %v690_v23  ;;  %v818_v2 = vpop.permute.xlu0 %817 }
 0x136   : > { %v4208_v60 = vpop.permute.xlu1 %819  ;;  %1630 = vmatprep.subr.bf16.mxu1 %v4016_v22 }
 0x137   : > { %965 = vrot.lane.b32.xlu0 %v4057_v49, %s3578_s16  ;;  %v836_v0 = vsel %vm458_vm1, %v818_v2, %v4208_v60 }
 0x138   : > { %1091 = vrot.lane.b32.xlu1 %v3906_v16, %s3581_s21  ;;  %1532 = vmatprep.subr.bf16.mxu0 %v836_v0 }
 0x139   : > { %v816_v9 = vpop.permute.xlu0 %815  ;;  %1451 = vmatmul.mubr.bf16.vlgmr.msra.gmra.mrb[8].mxu1 %v3992_v6 }
 0x13a   : > { %v835_v20 = vsel %vm458_vm1, %v816_v9, %v818_v2  ;;  %v828_v7 = vpop.permute.xlu1 %827  ;;  %1631 = vmatpush1.bf16.msra.mxu1 %v3885_v3  ;;  %1460 = vmatprep.mubr.bf16.mxu1 %v4000_v11 }
 0x13b   : > { %1093 = vrot.lane.b32.xlu0 %v3919_v31, %s3581_s21  ;;  %1533 = vmatpush1.bf16.msra.mxu0 %v835_v20 }
 0x13c   : > { %1089 = vrot.lane.b32.xlu1 %v3923_v32, %s3581_s21  ;;  %1632 = vmatprep.subr.bf16.mxu1 %v4047_v42 }
 0x13d   : > { %v4226_v16 = vpop.permute.xlu0 %829 }
 0x13e   : > { %v826_v10 = vpop.permute.xlu1 %825  ;;  %v840_v27 = vsel %vm458_vm1, %v828_v7, %v4226_v16  ;;  %1633 = vmatpush1.bf16.msra.mxu1 %v3919_v31 }
 0x13f   : > { %v839_v3 = vsel %vm458_vm1, %v826_v10, %v828_v7  ;;  %997 = vrot.lane.b32.xlu0 %v4016_v22, %s3579_s17  ;;  %1534 = vmatprep.subr.bf16.mxu0 %v840_v27 }
 0x140   : > { %999 = vrot.lane.b32.xlu1 %v4027_v29, %s3579_s17  ;;  %1535 = vmatpush1.bf16.msra.mxu0 %v839_v3 }
 0x141   : > { %v862_v32 = vpop.permute.xlu0 %861  ;;  %1461 = vmatmul.mubr.bf16.gmra.mrb[12].mxu1 %v4021_v25 }
 0x142   : > { %v4237_v28 = vpop.permute.xlu1 %863  ;;  %1662 = vmatprep.mubr.bf16.mxu1 %v3747_v18 }
 0x143   : > { %1007 = vrot.lane.b32.xlu0 %v4047_v42, %s3579_s17  ;;  %v880_v31 = vsel %vm503_vm2, %v862_v32, %v4237_v28 }
 0x144   : > { %1009 = vrot.lane.b32.xlu1 %v4057_v49, %s3579_s17  ;;  %1536 = vmatprep.subr.bf16.mxu0 %v880_v31 }
 0x145   : > { %v860_v21 = vpop.permute.xlu0 %859 }
 0x146   : > { %v879_v17 = vsel %vm503_vm2, %v860_v21, %v862_v32  ;;  %v872_v35 = vpop.permute.xlu1 %871 }
 0x147   : > { %1041 = vrot.lane.b32.xlu0 %v4016_v22, %s3580_s20  ;;  %1537 = vmatpush1.bf16.msra.mxu0 %v879_v17 }
 0x148   : > { %1043 = vrot.lane.b32.xlu1 %v4027_v29, %s3580_s20 }
 0x149   : > { %v4251_v18 = vpop.permute.xlu0 %873 }
 0x14a   : > { %v870_v24 = vpop.permute.xlu1 %869  ;;  %v884_v37 = vsel %vm503_vm2, %v872_v35, %v4251_v18 }
 0x14b   : > { %v883_v39 = vsel %vm503_vm2, %v870_v24, %v872_v35  ;;  %1085 = vrot.lane.b32.xlu0 %v4016_v22, %s3581_s21  ;;  %1538 = vmatprep.subr.bf16.mxu0 %v884_v37 }
 0x14c   : > { %1087 = vrot.lane.b32.xlu1 %v4027_v29, %s3581_s21  ;;  %1539 = vmatpush1.bf16.msra.mxu0 %v883_v39  ;;  %v1736_v29 = vld [vmem:[%s5464_s2] sm:$0xff] }
 0x14d   : > { %v906_v34 = vpop.permute.xlu0 %905 }
 0x14e   : > { %v4260_v40 = vpop.permute.xlu1 %907 }
 0x14f   : > { %1051 = vrot.lane.b32.xlu0 %v4047_v42, %s3580_s20  ;;  %v924_v44 = vsel %vm548_vm3, %v906_v34, %v4260_v40 }
 0x150   : > { %1053 = vrot.lane.b32.xlu1 %v4057_v49, %s3580_s20  ;;  %1540 = vmatprep.subr.bf16.mxu0 %v924_v44 }
 0x151   : > { %v904_v45 = vpop.permute.xlu0 %903 }
 0x152   : > { %v923_v22 = vsel %vm548_vm3, %v904_v45, %v906_v34  ;;  %v916_v36 = vpop.permute.xlu1 %915 }
 0x153   : > { %1095 = vrot.lane.b32.xlu0 %v4047_v42, %s3581_s21  ;;  %1541 = vmatpush1.bf16.msra.mxu0 %v923_v22 }
 0x154   : > { %1097 = vrot.lane.b32.xlu1 %v4057_v49, %s3581_s21  ;;  %v1793_v49 = vld [vmem:[%s5465_s3 + $0x8] sm:$0xff] }
 0x155   : > { %v4276_v46 = vpop.permute.xlu0 %917 }
 0x156   : > { %v914_v38 = vpop.permute.xlu1 %913  ;;  %v928_v50 = vsel %vm548_vm3, %v916_v36, %v4276_v46 }
 0x157   : > { %v927_v42 = vsel %vm548_vm3, %v914_v38, %v916_v36  ;;  %1542 = vmatprep.subr.bf16.mxu0 %v928_v50  ;;  %1742 = vperm.xlu0 %3516, %v1736_v29  }
 0x158   : > { %1543 = vmatpush1.bf16.msra.mxu0 %v927_v42  ;;  %1747 = vperm.xlu1 %3517, %v1737_v30  }
 0x159   : > { %v778_v51 = vpop.permute.xlu0 %777 }
 0x15a   : > { %v780_v54 = vpop.permute.xlu1 %779  ;;  %v793_v55 = vsel %vm413_vm0, %v4171_v43, %v778_v51 }
 0x15b   : > { %v794_v56 = vsel %vm413_vm0, %v778_v51, %v780_v54  ;;  %1803 = vperm.xlu0 %3516, %v1793_v49  }
 0x15c   : > { %1634 = vmatprep.subr.bf16.mxu1 %v794_v56  ;;  %1798 = vperm.xlu1 %3517, %v1792_v41  }
 0x15d   : > { %1635 = vmatpush1.bf16.msra.mxu1 %v793_v55  ;;  %v950_v57 = vpop.permute.xlu0 %949 }
 0x15e   : > { %v4299_v52 = vpop.permute.xlu1 %951 }
 0x15f   : > { %v968_v43 = vsel %vm593_vm4, %v950_v57, %v4299_v52  ;;  %1757 = vperm.xlu0 %3516, %v1739_v47  }
 0x160   : > { %1544 = vmatprep.subr.bf16.mxu0 %v968_v43  ;;  %1752 = vperm.xlu1 %3517, %v1738_v59  }
 0x161   : > { %v948_v62 = vpop.permute.xlu0 %947 }
 0x162   : > { %v967_v63 = vsel %vm593_vm4, %v948_v62, %v950_v57  ;;  %v788_v1 = vpop.permute.xlu1 %787 }
 0x163   : > { %1545 = vmatpush1.bf16.msra.mxu0 %v967_v63  ;;  %1813 = vperm.xlu0 %3516, %v1795_v61   ;;  %v797_v13 = vsel %vm413_vm0, %v4192_v8, %v788_v1 }
 0x164   : > { %1808 = vperm.xlu1 %3517, %v1794_v48  }
 0x165   : > { %v790_v4 = vpop.permute.xlu0 %789 }
 0x166   : > { %v960_v5 = vpop.permute.xlu1 %959  ;;  %v798_v53 = vsel %vm413_vm0, %v788_v1, %v790_v4 }
 0x167   : > { %1636 = vmatprep.subr.bf16.mxu1 %v798_v53 }
 0x168   : > { %1637 = vmatpush1.bf16.msra.mxu1 %v797_v13 }
 0x169   : > { %v4313_v14 = vpop.permute.xlu0 %961 }
 0x16a   : > { %v958_v58 = vpop.permute.xlu1 %957  ;;  %v972_v15 = vsel %vm593_vm4, %v960_v5, %v4313_v14 }
 0x16b   : > { %v971_v23 = vsel %vm593_vm4, %v958_v58, %v960_v5  ;;  %1546 = vmatprep.subr.bf16.mxu0 %v972_v15 }
 0x16c   : > { %1547 = vmatpush1.bf16.msra.mxu0 %v971_v23 }
 0x16d   : > { %v822_v19 = vpop.permute.xlu0 %821 }
 0x16e   : > { %v824_v2 = vpop.permute.xlu1 %823  ;;  %v837_v0 = vsel %vm458_vm1, %v4208_v60, %v822_v19 }
 0x16f   : > { %v838_v9 = vsel %vm458_vm1, %v822_v19, %v824_v2 }
 0x170   : > { %1638 = vmatprep.subr.bf16.mxu1 %v838_v9 }
 0x171   : > { %1639 = vmatpush1.bf16.msra.mxu1 %v837_v0  ;;  %v994_v8 = vpop.permute.xlu0 %993 }
 0x172   : > { %v4321_v20 = vpop.permute.xlu1 %995 }
 0x173   : > { %v1012_v7 = vsel %vm638_vm5, %v994_v8, %v4321_v20 }
 0x174   : > { %1548 = vmatprep.subr.bf16.mxu0 %v1012_v7 }
 0x175   : > { %v992_v10 = vpop.permute.xlu0 %991 }
 0x176   : > { %v1011_v27 = vsel %vm638_vm5, %v992_v10, %v994_v8  ;;  %v832_v3 = vpop.permute.xlu1 %831 }
 0x177   : > { %1549 = vmatpush1.bf16.msra.mxu0 %v1011_v27  ;;  %v841_v21 = vsel %vm458_vm1, %v4226_v16, %v832_v3 }
 0x179   : > { %v834_v32 = vpop.permute.xlu0 %833 }
 0x17a   : > { %v1004_v31 = vpop.permute.xlu1 %1003  ;;  %v842_v60 = vsel %vm458_vm1, %v832_v3, %v834_v32 }
 0x17b   : > { %1640 = vmatprep.subr.bf16.mxu1 %v842_v60 }
 0x17c   : > { %1641 = vmatpush1.bf16.msra.mxu1 %v841_v21 }
 0x17d   : > { %v4329_v17 = vpop.permute.xlu0 %1005 }
 0x17e   : > { %v1002_v35 = vpop.permute.xlu1 %1001  ;;  %v1016_v24 = vsel %vm638_vm5, %v1004_v31, %v4329_v17 }
 0x17f   : > { %v1015_v37 = vsel %vm638_vm5, %v1002_v35, %v1004_v31  ;;  %1550 = vmatprep.subr.bf16.mxu0 %v1016_v24 }
 0x180   : > { %1551 = vmatpush1.bf16.msra.mxu0 %v1015_v37 }
 0x181   : > { %v866_v39 = vpop.permute.xlu0 %865 }
 0x182   : > { %v868_v34 = vpop.permute.xlu1 %867  ;;  %v881_v44 = vsel %vm503_vm2, %v4237_v28, %v866_v39 }
 0x183   : > { %v882_v45 = vsel %vm503_vm2, %v866_v39, %v868_v34 }
 0x184   : > { %1642 = vmatprep.subr.bf16.mxu1 %v882_v45 }
 0x185   : > { %1643 = vmatpush1.bf16.msra.mxu1 %v881_v44  ;;  %v1038_v16 = vpop.permute.xlu0 %1037 }
 0x186   : > { %v4337_v22 = vpop.permute.xlu1 %1039 }
 0x187   : > { %v1056_v36 = vsel %vm683_vm6, %v1038_v16, %v4337_v22 }
 0x188   : > { %1552 = vmatprep.subr.bf16.mxu0 %v1056_v36 }
 0x189   : > { %v1036_v29 = vpop.permute.xlu0 %1035 }
 0x18a   : > { %v1055_v30 = vsel %vm683_vm6, %v1036_v29, %v1038_v16  ;;  %v876_v38 = vpop.permute.xlu1 %875 }
 0x18b   : > { %1553 = vmatpush1.bf16.msra.mxu0 %v1055_v30  ;;  %v885_v49 = vsel %vm503_vm2, %v4251_v18, %v876_v38 }
 0x18d   : > { %v878_v50 = vpop.permute.xlu0 %877 }
 0x18e   : > { %v1048_v42 = vpop.permute.xlu1 %1047  ;;  %v886_v28 = vsel %vm503_vm2, %v876_v38, %v878_v50 }
 0x18f   : > { %1644 = vmatprep.subr.bf16.mxu1 %v886_v28 }
 0x190   : > { %1645 = vmatpush1.bf16.msra.mxu1 %v885_v49 }
 0x191   : > { %v4345_v51 = vpop.permute.xlu0 %1049 }
 0x192   : > { %v1046_v41 = vpop.permute.xlu1 %1045  ;;  %v1060_v54 = vsel %vm683_vm6, %v1048_v42, %v4345_v51 }
 0x193   : > { %v1059_v55 = vsel %vm683_vm6, %v1046_v41, %v1048_v42  ;;  %1554 = vmatprep.subr.bf16.mxu0 %v1060_v54 }
 0x194   : > { %1555 = vmatpush1.bf16.msra.mxu0 %v1059_v55 }
 0x195   : > { %v910_v56 = vpop.permute.xlu0 %909 }
 0x196   : > { %v912_v47 = vpop.permute.xlu1 %911  ;;  %v925_v57 = vsel %vm548_vm3, %v4260_v40, %v910_v56 }
 0x197   : > { %v926_v59 = vsel %vm548_vm3, %v910_v56, %v912_v47  ;;  %1557 = vmatmul.mubr.bf16.vlgmr.msra.gmra.mrb[16].mxu0 %v3992_v6 }
 0x198   : > { %1646 = vmatprep.subr.bf16.mxu1 %v926_v59  ;;  %1566 = vmatprep.mubr.bf16.mxu0 %v4000_v11 }
 0x199   : > { %1647 = vmatpush1.bf16.msra.mxu1 %v925_v57  ;;  %v920_v18 = vpop.permute.xlu0 %919 }
 0x19a   : > { %v922_v43 = vpop.permute.xlu1 %921  ;;  %v929_v61 = vsel %vm548_vm3, %v4276_v46, %v920_v18 }
 0x19b   : > { %v930_v62 = vsel %vm548_vm3, %v920_v18, %v922_v43 }
 0x19c   : > { %1648 = vmatprep.subr.bf16.mxu1 %v930_v62 }
 0x19d   : > { %1649 = vmatpush1.bf16.msra.mxu1 %v929_v61  ;;  %v954_v48 = vpop.permute.xlu0 %953 }
 0x19e   : > { %v956_v63 = vpop.permute.xlu1 %955  ;;  %v969_v40 = vsel %vm593_vm4, %v4299_v52, %v954_v48 }
 0x19f   : > { %v970_v1 = vsel %vm593_vm4, %v954_v48, %v956_v63  ;;  %1567 = vmatmul.mubr.bf16.gmra.mrb[20].mxu0 %v4021_v25 }
 0x1a0   : > { %1650 = vmatprep.subr.bf16.mxu1 %v970_v1  ;;  %1609 = vmatprep.mubr.bf16.mxu0 %v5471_v33 }
 0x1a1   : > { %1651 = vmatpush1.bf16.msra.mxu1 %v969_v40  ;;  %v1082_v4 = vpop.permute.xlu0 %1081 }
 0x1a2   : > { %v1084_v5 = vpop.permute.xlu1 %1083 }
 0x1a3   : > { %v1100_v46 = vsel %vm728_vm7, %v1082_v4, %v1084_v5 }
 0x1a4   : > { %1577 = vmatprep.subr.bf16.mxu0 %v1100_v46 }
 0x1a5   : > { %v1080_v53 = vpop.permute.xlu0 %1079 }
 0x1a6   : > { %v1099_v13 = vsel %vm728_vm7, %v1080_v53, %v1082_v4  ;;  %v964_v58 = vpop.permute.xlu1 %963 }
 0x1a7   : > { %1578 = vmatpush1.bf16.msra.mxu0 %v1099_v13  ;;  %v973_v19 = vsel %vm593_vm4, %v4313_v14, %v964_v58 }
 0x1a9   : > { %v966_v15 = vpop.permute.xlu0 %965 }
 0x1aa   : > { %v1092_v52 = vpop.permute.xlu1 %1091  ;;  %v974_v23 = vsel %vm593_vm4, %v964_v58, %v966_v15 }
 0x1ab   : > { %1652 = vmatprep.subr.bf16.mxu1 %v974_v23 }
 0x1ac   : > { %1653 = vmatpush1.bf16.msra.mxu1 %v973_v19 }
 0x1ad   : > { %v1094_v2 = vpop.permute.xlu0 %1093 }
 0x1ae   : > { %v1090_v0 = vpop.permute.xlu1 %1089  ;;  %v1104_v9 = vsel %vm728_vm7, %v1092_v52, %v1094_v2 }
 0x1af   : > { %v1103_v8 = vsel %vm728_vm7, %v1090_v0, %v1092_v52  ;;  %1579 = vmatprep.subr.bf16.mxu0 %v1104_v9 }
 0x1b0   : > { %1580 = vmatpush1.bf16.msra.mxu0 %v1103_v8 }
 0x1b1   : > { %v998_v7 = vpop.permute.xlu0 %997 }
 0x1b2   : > { %v1000_v10 = vpop.permute.xlu1 %999  ;;  %v1013_v27 = vsel %vm638_vm5, %v4321_v20, %v998_v7  ;;  %v1346_v3 = vpop.f32.mrb[0].mxu1 }
 0x1b3   : > { %3411 = vmatmul.mubr.msk.bf16.vlgmr.msra.gmra.mrb[16].mxu0 %vm1305_vm8, %v4090_v12  ;;  %v1014_v14 = vsel %vm638_vm5, %v998_v7, %v1000_v10  ;;  %v1348_v32 = vpop.f32.mrb[1].mxu1 }
 0x1b4   : > { %1654 = vmatprep.subr.bf16.mxu1 %v1014_v14  ;;  %1619 = vmatprep.mubr.bf16.mxu0 %v5471_v33  ;;  %v1350_v31 = vpop.f32.mrb[2].mxu1 }
 0x1b5   : > { %1655 = vmatpush1.bf16.msra.mxu1 %v1013_v27  ;;  %v1008_v60 = vpop.permute.xlu0 %1007  ;;  %v1352_v21 = vpop.f32.mrb[3].mxu1 }
 0x1b6   : > { %v1010_v35 = vpop.permute.xlu1 %1009  ;;  %v1017_v24 = vsel %vm638_vm5, %v4329_v17, %v1008_v60 }
 0x1b7   : > { %v1018_v20 = vsel %vm638_vm5, %v1008_v60, %v1010_v35 }
 0x1b8   : > { %1656 = vmatprep.subr.bf16.mxu1 %v1018_v20 }
 0x1b9   : > { %1657 = vmatpush1.bf16.msra.mxu1 %v1017_v24  ;;  %v1042_v37 = vpop.permute.xlu0 %1041 }
 0x1ba   : > { %v1044_v39 = vpop.permute.xlu1 %1043  ;;  %v1057_v34 = vsel %vm683_vm6, %v4337_v22, %v1042_v37  ;;  %v4381_v44 = vpop.f32.mrb[4].mxu1 }
 0x1bb   : > { %3412 = vmatmul.mubr.msk.bf16.gmra.mrb[20].mxu0 %vm1305_vm8, %v4114_v26  ;;  %v1058_v45 = vsel %vm683_vm6, %v1042_v37, %v1044_v39  ;;  %v4386_v16 = vpop.f32.mrb[5].mxu1 }
 0x1bc   : > { %1658 = vmatprep.subr.bf16.mxu1 %v1058_v45  ;;  %1715 = vmatprep.mubr.bf16.mxu0 %v5471_v33  ;;  %v4389_v17 = vpop.f32.mrb[6].mxu1 }
 0x1bd   : > { %1659 = vmatpush1.bf16.msra.mxu1 %v1057_v34  ;;  %v1086_v36 = vpop.permute.xlu0 %1085  ;;  %v4391_v29 = vpop.f32.mrb[7].mxu1 }
 0x1be   : > { %v1088_v30 = vpop.permute.xlu1 %1087  ;;  %v1101_v22 = vsel %vm728_vm7, %v1084_v5, %v1086_v36 }
 0x1bf   : > { %v1102_v38 = vsel %vm728_vm7, %v1086_v36, %v1088_v30 }
 0x1c0   : > { %1683 = vmatprep.subr.bf16.mxu0 %v1102_v38 }
 0x1c1   : > { %1684 = vmatpush1.bf16.msra.mxu0 %v1101_v22  ;;  %v1052_v50 = vpop.permute.xlu0 %1051 }
 0x1c2   : > { %v1054_v42 = vpop.permute.xlu1 %1053  ;;  %v1061_v28 = vsel %vm683_vm6, %v4345_v51, %v1052_v50  ;;  %v1914_v51 = vlaneseq }
 0x1c3   : > { %v1062_v49 = vsel %vm683_vm6, %v1052_v50, %v1054_v42 }
 0x1c4   : > { %1660 = vmatprep.subr.bf16.mxu1 %v1062_v49  ;;  %v4408_v47 = vshrl.u32 %v1914_v51, 7 }
 0x1c5   : > { %1661 = vmatpush1.bf16.msra.mxu1 %v1061_v28  ;;  %v1096_v41 = vpop.permute.xlu0 %1095 }
 0x1c6   : > { %v1098_v54 = vpop.permute.xlu1 %1097  ;;  %v1105_v55 = vsel %vm728_vm7, %v1094_v2, %v1096_v41  ;;  %v1920_v4 = vsub.s32 1, %v4408_v47 }
 0x1c7   : > { %v1106_v56 = vsel %vm728_vm7, %v1096_v41, %v1098_v54 }
 0x1c8   : > { %1685 = vmatprep.subr.bf16.mxu0 %v1106_v56  ;;  %1663 = vmatmul.mubr.bf16.vlgmr.msra.gmra.mrb[16].mxu1 %v3992_v6 }
 0x1c9   : > { %1686 = vmatpush1.bf16.msra.mxu0 %v1105_v55  ;;  %1672 = vmatprep.mubr.bf16.mxu1 %v4000_v11 }
 0x1cc   : > { %3413 = vmatmul.mubr.msk.bf16.vlgmr.msra.gmra.mrb[24].mxu0 %vm1305_vm8, %v4090_v12 }
 0x1cd   : > { %1725 = vmatprep.mubr.bf16.mxu0 %v5471_v33 }
 0x1d0   : > { %1673 = vmatmul.mubr.bf16.gmra.mrb[20].mxu1 %v4021_v25  ;;  %v1916_v25 = vsub.s32 0, %v4408_v47 }
 0x1d4   : > { %3414 = vmatmul.mubr.msk.bf16.gmra.mrb[28].mxu0 %vm1305_vm8, %v4114_v26  ;;  %v4419_v26 = vld [vmem:[%s5469_s7] sm:$0xff] }
 0x1d5   : > { %v1917_v15 = vrot.slane %v4419_v26, %v1916_v25  ;;  %v1921_v0 = vrot.slane %v4419_v26, %v1920_v4 }
 0x1d6   : > { %v1399_v57 = vpop.f32.mrb[0].mxu0  ;;  %v4410_v59 = vpop.permute.xlu0 %1742 }
 0x1d7   : > { %v1400_v6 = vadd.f32 %v1399_v57, %v1346_v3  ;;  %v1401_v18 = vpop.f32.mrb[1].mxu0  ;;  %v4412_v43 = vpop.permute.xlu1 %1747 }
 0x1d8   : > { %v1402_v11 = vadd.f32 %v1401_v18, %v1348_v32  ;;  %v1403_v61 = vpop.f32.mrb[2].mxu0 }
 0x1d9   : > { %v1760_v12 = vmul.f32 %v4410_v59, %v1400_v6  ;;  %v1404_v62 = vadd.f32 %v1403_v61, %v1350_v31  ;;  %v1405_v48 = vpop.f32.mrb[3].mxu0 }
 0x1da   : > { %v4421_v63 = vpop.permute.xlu0 %1803  ;;  %v1406_v40 = vadd.f32 %v1405_v48, %v1352_v21  ;;  %v1761_v1 = vmul.f32 %v4410_v59, %v1402_v11 }
 0x1db   : > { %v1768_v5 = vmul.f32 %v4412_v43, %v1404_v62  ;;  %v4426_v46 = vpop.permute.xlu1 %1798 }
 0x1dc   : > { %v1816_v53 = vadd.f32 %v4426_v46, %v1760_v12  ;;  %v1769_v13 = vmul.f32 %v4412_v43, %v1406_v40  ;;  %v1817_v58 = vadd.f32 %v4426_v46, %v1761_v1 }
 0x1dd   : > { %v1824_v52 = vadd.f32 %v4421_v63, %v1768_v5 }
 0x1de   : > { %v1848_v23 = vmul.f32 0.2, %v1816_v53  ;;  %v1825_v19 = vadd.f32 %v4421_v63, %v1769_v13  ;;  %v1849_v2 = vmul.f32 0.2, %v1817_v58  ;;  %v1409_v9 = vpop.f32.mrb[4].mxu0  ;;  %v4435_v8 = vpop.permute.xlu0 %1757 }
 0x1df   : > { %v1856_v7 = vmul.f32 0.2, %v1824_v52  ;;  %v1410_v10 = vadd.f32 %v1409_v9, %v4381_v44  ;;  %v1411_v27 = vpop.f32.mrb[5].mxu0  ;;  %v4438_v3 = vpop.permute.xlu1 %1752 }
 0x1e0   : > { %v1880_v14 = vmax.f32 %v1816_v53, %v1848_v23  ;;  %v1857_v32 = vmul.f32 0.2, %v1825_v19  ;;  %v1881_v31 = vmax.f32 %v1817_v58, %v1849_v2  ;;  %v1412_v60 = vadd.f32 %v1411_v27, %v4386_v16  ;;  %v1413_v21 = vpop.f32.mrb[6].mxu0 }
 0x1e1   : > { %v1888_v35 = vmax.f32 %v1824_v52, %v1856_v7  ;;  %v1776_v24 = vmul.f32 %v4438_v3, %v1410_v10  ;;  %v1414_v20 = vadd.f32 %v1413_v21, %v4389_v17  ;;  %v1415_v37 = vpop.f32.mrb[7].mxu0  ;;  %v1924_v27 = vsub.s32 2, %v4408_v47 }
 0x1e2   : > { %v1954_v39 = vmul.f32 %v1917_v15, %v1880_v14  ;;  %v1889_v34 = vmax.f32 %v1825_v19, %v1857_v32  ;;  %v1955_v45 = vmul.f32 %v1921_v0, %v1881_v31  ;;  %v4443_v36 = vpop.permute.xlu0 %1813  ;;  %v1416_v44 = vadd.f32 %v1415_v37, %v4391_v29 }
 0x1e3   : > { %v1962_v30 = vmul.f32 %v1917_v15, %v1888_v35  ;;  %v1784_v22 = vmul.f32 %v4435_v8, %v1414_v20  ;;  %v4447_v38 = vpop.permute.xlu1 %1808  ;;  %v1777_v16 = vmul.f32 %v4438_v3, %v1412_v60  ;;  %v1928_v60 = vsub.s32 3, %v4408_v47 }
 0x1e4   : > { %v1963_v50 = vmul.f32 %v1921_v0, %v1889_v34  ;;  %v1832_v42 = vadd.f32 %v4447_v38, %v1776_v24  ;;  %v1785_v17 = vmul.f32 %v4435_v8, %v1416_v44  ;;  %v1925_v34 = vrot.slane %v4419_v26, %v1924_v27 }
 0x1e5   : > { %v1986_v28 = vpack.c.bf16 %v1962_v30, %v1954_v39  ;;  %v1840_v49 = vadd.f32 %v4443_v36, %v1784_v22  ;;  %v1833_v41 = vadd.f32 %v4447_v38, %v1777_v16  ;;  %v1929_v30 = vrot.slane %v4419_v26, %v1928_v60 }
 0x1e6   : > { %v4454_v54 = vpack.c.bf16 %v1963_v50, %v1955_v45  ;;  %v1864_v29 = vmul.f32 0.2, %v1832_v42  ;;  %v1841_v55 = vadd.f32 %v4443_v36, %v1785_v17 }
 0x1e7   : > { %v1872_v56 = vmul.f32 0.2, %v1840_v49  ;;  %2016 = vrot.lane.b32.xlu1 %v1986_v28, %s3574_s12  ;;  %v1865_v51 = vmul.f32 0.2, %v1833_v41 }
 0x1e8   : > { %v1896_v57 = vmax.f32 %v1832_v42, %v1864_v29  ;;  %v1873_v6 = vmul.f32 0.2, %v1841_v55  ;;  %2726 = vmatprep.subr.bf16.mxu0 %v4454_v54 }
 0x1e9   : > { %v1904_v18 = vmax.f32 %v1840_v49, %v1872_v56  ;;  %v1897_v11 = vmax.f32 %v1833_v41, %v1865_v51  ;;  %2727 = vmatpush1.bf16.msra.mxu0 %v1986_v28 }
 0x1ea   : > { %v1970_v61 = vmul.f32 %v1917_v15, %v1896_v57  ;;  %v1905_v12 = vmax.f32 %v1841_v55, %v1873_v6 }
 0x1eb   : > { %v1978_v62 = vmul.f32 %v1917_v15, %v1904_v18  ;;  %2050 = vrot.lane.b32.xlu1 %v1986_v28, %s3575_s13  ;;  %v1971_v25 = vmul.f32 %v1921_v0, %v1897_v11 }
 0x1ec   : > { %v1979_v48 = vmul.f32 %v1921_v0, %v1905_v12  ;;  %v1505_v40 = vpop.f32.mrb[8].mxu0 }
 0x1ed   : > { %v1994_v1 = vpack.c.bf16 %v1978_v62, %v1970_v61  ;;  %v1507_v4 = vpop.f32.mrb[9].mxu0 }
 0x1ee   : > { %v4460_v5 = vpack.c.bf16 %v1979_v48, %v1971_v25  ;;  %v1509_v53 = vpop.f32.mrb[10].mxu0 }
 0x1ef   : > { %2084 = vrot.lane.b32.xlu1 %v1986_v28, %s3576_s14  ;;  %2024 = vrot.lane.b32.xlu0 %v1994_v1, %s3574_s12  ;;  %v1511_v13 = vpop.f32.mrb[11].mxu0 }
 0x1f0   : > { %2728 = vmatprep.subr.bf16.mxu0 %v4460_v5 }
 0x1f1   : > { %2729 = vmatpush1.bf16.msra.mxu0 %v1994_v1 }
 0x1f3   : > { %2118 = vrot.lane.b32.xlu1 %v1986_v28, %s3577_s15  ;;  %2058 = vrot.lane.b32.xlu0 %v1994_v1, %s3575_s13 }
 0x1f4   : > { %v1515_v58 = vpop.f32.mrb[12].mxu0 }
 0x1f5   : > { %v1517_v15 = vpop.f32.mrb[13].mxu0 }
 0x1f6   : > { %v1519_v52 = vpop.f32.mrb[14].mxu0 }
 0x1f7   : > { %2152 = vrot.lane.b32.xlu1 %v1986_v28, %s3578_s16  ;;  %2092 = vrot.lane.b32.xlu0 %v1994_v1, %s3576_s14  ;;  %v1521_v23 = vpop.f32.mrb[15].mxu0 }
 0x1fb   : > { %2186 = vrot.lane.b32.xlu1 %v1986_v28, %s3579_s17  ;;  %2126 = vrot.lane.b32.xlu0 %v1994_v1, %s3577_s15 }
 0x1ff   : > { %2220 = vrot.lane.b32.xlu1 %v1986_v28, %s3580_s20  ;;  %2160 = vrot.lane.b32.xlu0 %v1994_v1, %s3578_s16 }
 0x203   : > { %2254 = vrot.lane.b32.xlu1 %v1986_v28, %s3581_s21  ;;  %2194 = vrot.lane.b32.xlu0 %v1994_v1, %s3579_s17 }
 0x207   : > { %2018 = vrot.lane.b32.xlu1 %v4454_v54, %s3574_s12  ;;  %2228 = vrot.lane.b32.xlu0 %v1994_v1, %s3580_s20 }
 0x20b   : > { %2052 = vrot.lane.b32.xlu1 %v4454_v54, %s3575_s13  ;;  %2262 = vrot.lane.b32.xlu0 %v1994_v1, %s3581_s21 }
 0x20c   : > { %v1452_v19 = vpop.f32.mrb[8].mxu1 }
 0x20d   : > { %v1506_v2 = vadd.f32 %v1505_v40, %v1452_v19  ;;  %v1454_v0 = vpop.f32.mrb[9].mxu1 }
 0x20e   : > { %v1508_v9 = vadd.f32 %v1507_v4, %v1454_v0  ;;  %v1456_v7 = vpop.f32.mrb[10].mxu1 }
 0x20f   : > { %2086 = vrot.lane.b32.xlu1 %v4454_v54, %s3576_s14  ;;  %2026 = vrot.lane.b32.xlu0 %v4460_v5, %s3574_s12  ;;  %v1762_v10 = vmul.f32 %v4410_v59, %v1506_v2  ;;  %v1510_v14 = vadd.f32 %v1509_v53, %v1456_v7  ;;  %v1458_v32 = vpop.f32.mrb[11].mxu1 }
 0x210   : > { %v1763_v31 = vmul.f32 %v4410_v59, %v1508_v9  ;;  %v1512_v21 = vadd.f32 %v1511_v13, %v1458_v32 }
 0x211   : > { %v1818_v35 = vadd.f32 %v4426_v46, %v1762_v10  ;;  %v1770_v24 = vmul.f32 %v4412_v43, %v1510_v14 }
 0x212   : > { %v1819_v20 = vadd.f32 %v4426_v46, %v1763_v31  ;;  %v1771_v37 = vmul.f32 %v4412_v43, %v1512_v21 }
 0x213   : > { %2120 = vrot.lane.b32.xlu1 %v4454_v54, %s3577_s15  ;;  %2060 = vrot.lane.b32.xlu0 %v4460_v5, %s3575_s13  ;;  %v1850_v39 = vmul.f32 0.2, %v1818_v35  ;;  %v1826_v45 = vadd.f32 %v4421_v63, %v1770_v24 }
 0x214   : > { %v1851_v44 = vmul.f32 0.2, %v1819_v20  ;;  %v1827_v22 = vadd.f32 %v4421_v63, %v1771_v37  ;;  %v1462_v16 = vpop.f32.mrb[12].mxu1 }
 0x215   : > { %v1882_v50 = vmax.f32 %v1818_v35, %v1850_v39  ;;  %v1858_v42 = vmul.f32 0.2, %v1826_v45  ;;  %v1516_v17 = vadd.f32 %v1515_v58, %v1462_v16  ;;  %v1464_v28 = vpop.f32.mrb[13].mxu1  ;;  %v1936_v16 = vsub.s32 5, %v4408_v47 }
 0x216   : > { %v1883_v49 = vmax.f32 %v1819_v20, %v1851_v44  ;;  %v1859_v41 = vmul.f32 0.2, %v1827_v22  ;;  %v1518_v29 = vadd.f32 %v1517_v15, %v1464_v28  ;;  %v1466_v55 = vpop.f32.mrb[14].mxu1 }
 0x217   : > { %2154 = vrot.lane.b32.xlu1 %v4454_v54, %s3578_s16  ;;  %2094 = vrot.lane.b32.xlu0 %v4460_v5, %s3576_s14  ;;  %v1956_v56 = vmul.f32 %v1925_v34, %v1882_v50  ;;  %v1890_v51 = vmax.f32 %v1826_v45, %v1858_v42  ;;  %v1778_v57 = vmul.f32 %v4438_v3, %v1516_v17  ;;  %v1468_v6 = vpop.f32.mrb[15].mxu1  ;;  %v1932_v45 = vsub.s32 4, %v4408_v47 }
 0x218   : > { %v1957_v18 = vmul.f32 %v1929_v30, %v1883_v49  ;;  %v1891_v11 = vmax.f32 %v1827_v22, %v1859_v41  ;;  %v1779_v61 = vmul.f32 %v4438_v3, %v1518_v29  ;;  %v1520_v12 = vadd.f32 %v1519_v52, %v1466_v55 }
 0x219   : > { %v1964_v62 = vmul.f32 %v1925_v34, %v1890_v51  ;;  %v1834_v25 = vadd.f32 %v4447_v38, %v1778_v57  ;;  %v1522_v48 = vadd.f32 %v1521_v23, %v1468_v6  ;;  %v1933_v41 = vrot.slane %v4419_v26, %v1932_v45 }
 0x21a   : > { %v1965_v40 = vmul.f32 %v1929_v30, %v1891_v11  ;;  %v1835_v1 = vadd.f32 %v4447_v38, %v1779_v61  ;;  %v1786_v4 = vmul.f32 %v4435_v8, %v1520_v12 }
 0x21b   : > { %2188 = vrot.lane.b32.xlu1 %v4454_v54, %s3579_s17  ;;  %2128 = vrot.lane.b32.xlu0 %v4460_v5, %s3577_s15  ;;  %v4514_v53 = vpack.c.bf16 %v1964_v62, %v1956_v56  ;;  %v1866_v13 = vmul.f32 0.2, %v1834_v25  ;;  %v1787_v58 = vmul.f32 %v4435_v8, %v1522_v48  ;;  %v1937_v56 = vrot.slane %v4419_v26, %v1936_v16 }
 0x21c   : > { %v4517_v15 = vpack.c.bf16 %v1965_v40, %v1957_v18  ;;  %v1867_v52 = vmul.f32 0.2, %v1835_v1  ;;  %v1842_v23 = vadd.f32 %v4443_v36, %v1786_v4 }
 0x21d   : > { %v1898_v19 = vmax.f32 %v1834_v25, %v1866_v13  ;;  %v1843_v2 = vadd.f32 %v4443_v36, %v1787_v58 }
 0x21e   : > { %v1899_v0 = vmax.f32 %v1835_v1, %v1867_v52  ;;  %v1874_v9 = vmul.f32 0.2, %v1842_v23 }
 0x21f   : > { %2222 = vrot.lane.b32.xlu1 %v4454_v54, %s3580_s20  ;;  %2162 = vrot.lane.b32.xlu0 %v4460_v5, %s3578_s16  ;;  %v1875_v7 = vmul.f32 0.2, %v1843_v2  ;;  %v1972_v10 = vmul.f32 %v1925_v34, %v1898_v19 }
 0x220   : > { %v1906_v27 = vmax.f32 %v1842_v23, %v1874_v9  ;;  %v1973_v14 = vmul.f32 %v1929_v30, %v1899_v0 }
 0x221   : > { %v1907_v32 = vmax.f32 %v1843_v2, %v1875_v7 }
 0x222   : > { %v1980_v31 = vmul.f32 %v1925_v34, %v1906_v27 }
 0x223   : > { %2256 = vrot.lane.b32.xlu1 %v4454_v54, %s3581_s21  ;;  %2196 = vrot.lane.b32.xlu0 %v4460_v5, %s3579_s17  ;;  %v1981_v60 = vmul.f32 %v1929_v30, %v1907_v32 }
 0x224   : > { %v4529_v21 = vpack.c.bf16 %v1980_v31, %v1972_v10 }
 0x225   : > { %v4531_v35 = vpack.c.bf16 %v1981_v60, %v1973_v14 }
 0x227   : > { %2230 = vrot.lane.b32.xlu0 %v4460_v5, %s3580_s20 }
 0x22b   : > { %2264 = vrot.lane.b32.xlu0 %v4460_v5, %s3581_s21 }
 0x286   : > { %v1611_v24 = vpop.f32.mrb[16].mxu0 }
 0x287   : > { %v1764_v20 = vmul.f32 %v4410_v59, %v1611_v24  ;;  %v1613_v37 = vpop.f32.mrb[17].mxu0 }
 0x288   : > { %v1765_v54 = vmul.f32 %v4410_v59, %v1613_v37  ;;  %v1615_v39 = vpop.f32.mrb[18].mxu0 }
 0x289   : > { %v1820_v34 = vadd.f32 %v4426_v46, %v1764_v20  ;;  %v1772_v44 = vmul.f32 %v4412_v43, %v1615_v39  ;;  %v1617_v30 = vpop.f32.mrb[19].mxu0 }
 0x28a   : > { %v1821_v22 = vadd.f32 %v4426_v46, %v1765_v54  ;;  %v1773_v5 = vmul.f32 %v4412_v43, %v1617_v30 }
 0x28b   : > { %v1852_v50 = vmul.f32 0.2, %v1820_v34  ;;  %v1828_v42 = vadd.f32 %v4421_v63, %v1772_v44 }
 0x28c   : > { %v1853_v17 = vmul.f32 0.2, %v1821_v22  ;;  %v1829_v28 = vadd.f32 %v4421_v63, %v1773_v5 }
 0x28d   : > { %v1884_v49 = vmax.f32 %v1820_v34, %v1852_v50  ;;  %v1860_v29 = vmul.f32 0.2, %v1828_v42 }
 0x28e   : > { %v1885_v55 = vmax.f32 %v1821_v22, %v1853_v17  ;;  %v1861_v51 = vmul.f32 0.2, %v1829_v28  ;;  %v1621_v57 = vpop.f32.mrb[20].mxu0 }
 0x28f   : > { %v1892_v6 = vmax.f32 %v1828_v42, %v1860_v29  ;;  %v1780_v18 = vmul.f32 %v4438_v3, %v1621_v57  ;;  %v1623_v11 = vpop.f32.mrb[21].mxu0  ;;  %v1958_v25 = vmul.f32 %v1933_v41, %v1884_v49 }
 0x290   : > { %v1893_v61 = vmax.f32 %v1829_v28, %v1861_v51  ;;  %v1781_v12 = vmul.f32 %v4438_v3, %v1623_v11  ;;  %v1625_v62 = vpop.f32.mrb[22].mxu0  ;;  %v1959_v13 = vmul.f32 %v1937_v56, %v1885_v55 }
 0x291   : > { %v1966_v48 = vmul.f32 %v1933_v41, %v1892_v6  ;;  %v1836_v40 = vadd.f32 %v4447_v38, %v1780_v18  ;;  %v1788_v1 = vmul.f32 %v4435_v8, %v1625_v62  ;;  %v1627_v4 = vpop.f32.mrb[23].mxu0  ;;  %v1940_v6 = vsub.s32 6, %v4408_v47 }
 0x292   : > { %v1967_v58 = vmul.f32 %v1937_v56, %v1893_v61  ;;  %v1837_v52 = vadd.f32 %v4447_v38, %v1781_v12  ;;  %v1789_v23 = vmul.f32 %v4435_v8, %v1627_v4  ;;  %v1944_v12 = vsub.s32 7, %v4408_v47 }
 0x293   : > { %v4555_v19 = vpack.c.bf16 %v1966_v48, %v1958_v25  ;;  %v1868_v2 = vmul.f32 0.2, %v1836_v40  ;;  %v1844_v0 = vadd.f32 %v4443_v36, %v1788_v1  ;;  %v1941_v47 = vrot.slane %v4419_v26, %v1940_v6 }
 0x294   : > { %v4558_v9 = vpack.c.bf16 %v1967_v58, %v1959_v13  ;;  %v1869_v7 = vmul.f32 0.2, %v1837_v52  ;;  %v1845_v10 = vadd.f32 %v4443_v36, %v1789_v23  ;;  %v4600_v23 = vpop.permute.xlu1 %2016 }
 0x295   : > { %v1900_v27 = vmax.f32 %v1836_v40, %v1868_v2  ;;  %v1876_v14 = vmul.f32 0.2, %v1844_v0  ;;  %2832 = vmatprep.subr.bf16.mxu1 %v4555_v19  ;;  %2302 = vrot.lane.b32.xlu1 %v4555_v19, %s3574_s12 }
 0x296   : > { %v1901_v32 = vmax.f32 %v1837_v52, %v1869_v7  ;;  %v1877_v31 = vmul.f32 0.2, %v1845_v10  ;;  %2833 = vmatpush1.bf16.msra.mxu1 %v4514_v53  ;;  %2304 = vrot.lane.b32.xlu0 %v4558_v9, %s3574_s12 }
 0x297   : > { %v1908_v60 = vmax.f32 %v1844_v0, %v1876_v14  ;;  %v1974_v20 = vmul.f32 %v1933_v41, %v1900_v27  ;;  %v1945_v0 = vrot.slane %v4419_v26, %v1944_v12  ;;  %v4605_v14 = vpop.permute.xlu0 %2024 }
 0x298   : > { %v1909_v24 = vmax.f32 %v1845_v10, %v1877_v31  ;;  %v1975_v54 = vmul.f32 %v1937_v56, %v1901_v32 }
 0x299   : > { %v1982_v37 = vmul.f32 %v1933_v41, %v1908_v60  ;;  %2336 = vrot.lane.b32.xlu1 %v4555_v19, %s3575_s13 }
 0x29a   : > { %v1983_v39 = vmul.f32 %v1937_v56, %v1909_v24  ;;  %2338 = vrot.lane.b32.xlu0 %v4558_v9, %s3575_s13 }
 0x29b   : > { %v4571_v34 = vpack.c.bf16 %v1982_v37, %v1974_v20  ;;  %v1664_v45 = vpop.f32.mrb[16].mxu1 }
 0x29c   : > { %v4573_v44 = vpack.c.bf16 %v1983_v39, %v1975_v54  ;;  %v1666_v30 = vpop.f32.mrb[17].mxu1 }
 0x29d   : > { %2370 = vrot.lane.b32.xlu1 %v4555_v19, %s3576_s14  ;;  %2834 = vmatprep.subr.bf16.mxu1 %v4571_v34  ;;  %v1668_v22 = vpop.f32.mrb[18].mxu1 }
 0x29e   : > { %2835 = vmatpush1.bf16.msra.mxu1 %v4529_v21  ;;  %2372 = vrot.lane.b32.xlu0 %v4558_v9, %s3576_s14  ;;  %v1670_v16 = vpop.f32.mrb[19].mxu1 }
 0x29f   : > { %v1717_v5 = vpop.f32.mrb[24].mxu0 }
 0x2a0   : > { %v1718_v50 = vadd.f32 %v1717_v5, %v1664_v45  ;;  %v1719_v42 = vpop.f32.mrb[25].mxu0 }
 0x2a1   : > { %v1720_v17 = vadd.f32 %v1719_v42, %v1666_v30  ;;  %v1721_v28 = vpop.f32.mrb[26].mxu0  ;;  %2404 = vrot.lane.b32.xlu1 %v4555_v19, %s3577_s15 }
 0x2a2   : > { %v1766_v49 = vmul.f32 %v4410_v59, %v1718_v50  ;;  %v1722_v41 = vadd.f32 %v1721_v28, %v1668_v22  ;;  %v1723_v29 = vpop.f32.mrb[27].mxu0  ;;  %2406 = vrot.lane.b32.xlu0 %v4558_v9, %s3577_s15 }
 0x2a3   : > { %v1767_v55 = vmul.f32 %v4410_v59, %v1720_v17  ;;  %v1724_v56 = vadd.f32 %v1723_v29, %v1670_v16  ;;  %v1674_v51 = vpop.f32.mrb[20].mxu1  ;;  %v4622_v17 = vpop.permute.xlu1 %2050 }
 0x2a4   : > { %v1822_v57 = vadd.f32 %v4426_v46, %v1766_v49  ;;  %v1774_v18 = vmul.f32 %v4412_v43, %v1722_v41  ;;  %v1676_v11 = vpop.f32.mrb[21].mxu1  ;;  %v4627_v41 = vpop.permute.xlu0 %2058 }
 0x2a5   : > { %v1823_v61 = vadd.f32 %v4426_v46, %v1767_v55  ;;  %v1775_v62 = vmul.f32 %v4412_v43, %v1724_v56  ;;  %2312 = vrot.lane.b32.xlu1 %v4573_v44, %s3574_s12  ;;  %v1678_v25 = vpop.f32.mrb[22].mxu1 }
 0x2a6   : > { %v1854_v59 = vmul.f32 0.2, %v1822_v57  ;;  %v1830_v48 = vadd.f32 %v4421_v63, %v1774_v18  ;;  %2310 = vrot.lane.b32.xlu0 %v4571_v34, %s3574_s12  ;;  %v1680_v40 = vpop.f32.mrb[23].mxu1 }
 0x2a7   : > { %v1855_v1 = vmul.f32 0.2, %v1823_v61  ;;  %v1831_v4 = vadd.f32 %v4421_v63, %v1775_v62  ;;  %v1727_v13 = vpop.f32.mrb[28].mxu0 }
 0x2a8   : > { %v1886_v46 = vmax.f32 %v1822_v57, %v1854_v59  ;;  %v1862_v58 = vmul.f32 0.2, %v1830_v48  ;;  %v1728_v43 = vadd.f32 %v1727_v13, %v1674_v51  ;;  %v1729_v52 = vpop.f32.mrb[29].mxu0  ;;  %v4637_v12 = vpop.permute.xlu0 %2092 }
 0x2a9   : > { %v1887_v2 = vmax.f32 %v1823_v61, %v1855_v1  ;;  %v1863_v7 = vmul.f32 0.2, %v1831_v4  ;;  %v1730_v10 = vadd.f32 %v1729_v52, %v1676_v11  ;;  %v1731_v27 = vpop.f32.mrb[30].mxu0  ;;  %2346 = vrot.lane.b32.xlu1 %v4573_v44, %s3575_s13  ;;  %v4633_v11 = vpop.permute.xlu1 %2084 }
 0x2aa   : > { %v1894_v63 = vmax.f32 %v1830_v48, %v1862_v58  ;;  %v1782_v32 = vmul.f32 %v4438_v3, %v1728_v43  ;;  %v1732_v31 = vadd.f32 %v1731_v27, %v1678_v25  ;;  %v1733_v60 = vpop.f32.mrb[31].mxu0  ;;  %2344 = vrot.lane.b32.xlu0 %v4571_v34, %s3575_s13  ;;  %v1960_v37 = vmul.f32 %v1941_v47, %v1886_v46  ;;  %v4728_v27 = vld [vmem:[%s5466_s4 + $0x4] ss:$12 sps:$4 sm:$0xff]  }
 0x2ab   : > { %v1895_v24 = vmax.f32 %v1831_v4, %v1863_v7  ;;  %v1783_v20 = vmul.f32 %v4438_v3, %v1730_v10  ;;  %v1734_v26 = vadd.f32 %v1733_v60, %v1680_v40  ;;  %v1961_v30 = vmul.f32 %v1945_v0, %v1887_v2  ;;  %5475 = vst [vmem:[#allocation4_spill] sm:$0xff] %v4728_v27 }
 0x2ac   : > { %v1968_v54 = vmul.f32 %v1941_v47, %v1894_v63  ;;  %v1838_v39 = vadd.f32 %v4447_v38, %v1782_v32  ;;  %v1790_v45 = vmul.f32 %v4435_v8, %v1732_v31  ;;  %v4651_v48 = vpop.permute.xlu0 %2126  ;;  %2758 = vmatprep.mubr.bf16.mxu0 %v4728_v27  ;;  %2864 = vmatprep.mubr.bf16.mxu1 %v4728_v27 }
 0x2ad   : > { %v1969_v22 = vmul.f32 %v1945_v0, %v1895_v24  ;;  %v1839_v16 = vadd.f32 %v4447_v38, %v1783_v20  ;;  %v1791_v5 = vmul.f32 %v4435_v8, %v1734_v26  ;;  %2380 = vrot.lane.b32.xlu1 %v4573_v44, %s3576_s14  ;;  %v4649_v59 = vpop.permute.xlu1 %2118 }
 0x2ae   : > { %v4617_v50 = vpack.c.bf16 %v1968_v54, %v1960_v37  ;;  %v1870_v42 = vmul.f32 0.2, %v1838_v39  ;;  %v1846_v3 = vadd.f32 %v4443_v36, %v1790_v45  ;;  %2378 = vrot.lane.b32.xlu0 %v4571_v34, %s3576_s14 }
 0x2af   : > { %v4624_v28 = vpack.c.bf16 %v1969_v22, %v1961_v30  ;;  %v1871_v49 = vmul.f32 0.2, %v1839_v16  ;;  %v1847_v38 = vadd.f32 %v4443_v36, %v1791_v5 }
 0x2b0   : > { %v1902_v8 = vmax.f32 %v1838_v39, %v1870_v42  ;;  %v1878_v29 = vmul.f32 0.2, %v1846_v3  ;;  %v4661_v1 = vpop.permute.xlu0 %2160 }
 0x2b1   : > { %v1903_v55 = vmax.f32 %v1839_v16, %v1871_v49  ;;  %v1879_v56 = vmul.f32 0.2, %v1847_v38  ;;  %2022 = vrot.lane.b32.xlu1 %v4517_v15, %s3574_s12  ;;  %v4657_v40 = vpop.permute.xlu1 %2152 }
 0x2b2   : > { %v1910_v51 = vmax.f32 %v1846_v3, %v1878_v29  ;;  %2412 = vrot.lane.b32.xlu0 %v4571_v34, %s3577_s15  ;;  %v1976_v6 = vmul.f32 %v1941_v47, %v1902_v8 }
 0x2b3   : > { %v1911_v57 = vmax.f32 %v1847_v38, %v1879_v56  ;;  %v1977_v61 = vmul.f32 %v1945_v0, %v1903_v55 }
 0x2b4   : > { %v1984_v18 = vmul.f32 %v1941_v47, %v1910_v51  ;;  %v4671_v13 = vpop.permute.xlu0 %2194 }
 0x2b5   : > { %v1985_v36 = vmul.f32 %v1945_v0, %v1911_v57  ;;  %2056 = vrot.lane.b32.xlu1 %v4517_v15, %s3575_s13  ;;  %v4669_v4 = vpop.permute.xlu1 %2186 }
 0x2b6   : > { %v4639_v62 = vpack.c.bf16 %v1984_v18, %v1976_v6  ;;  %2020 = vrot.lane.b32.xlu0 %v4514_v53, %s3574_s12 }
 0x2b7   : > { %v4643_v25 = vpack.c.bf16 %v1985_v36, %v1977_v61 }
 0x2b8   : > { %v4681_v47 = vpop.permute.xlu0 %2228 }
 0x2b9   : > { %2090 = vrot.lane.b32.xlu1 %v4517_v15, %s3576_s14  ;;  %v4677_v46 = vpop.permute.xlu1 %2220 }
 0x2ba   : > { %2054 = vrot.lane.b32.xlu0 %v4514_v53, %s3575_s13 }
 0x2bc   : > { %v4691_v43 = vpop.permute.xlu0 %2262 }
 0x2bd   : > { %2124 = vrot.lane.b32.xlu1 %v4517_v15, %s3577_s15  ;;  %v4689_v58 = vpop.permute.xlu1 %2254 }
 0x2be   : > { %2088 = vrot.lane.b32.xlu0 %v4514_v53, %s3576_s14 }
 0x2c0   : > { %v4701_v2 = vpop.permute.xlu0 %2026 }
 0x2c1   : > { %2028 = vrot.lane.b32.xlu1 %v4529_v21, %s3574_s12  ;;  %v4697_v52 = vpop.permute.xlu1 %2018 }
 0x2c2   : > { %2122 = vrot.lane.b32.xlu0 %v4514_v53, %s3577_s15 }
 0x2c4   : > { %v4711_v0 = vpop.permute.xlu0 %2060 }
 0x2c5   : > { %2414 = vrot.lane.b32.xlu1 %v4573_v44, %s3577_s15 }
 0x2c6   : > { %2156 = vrot.lane.b32.xlu0 %v4514_v53, %s3578_s16 }
 0x2c8   : > { %v4721_v10 = vpop.permute.xlu0 %2094 }
 0x2c9   : > { %2062 = vrot.lane.b32.xlu1 %v4529_v21, %s3575_s13 }
 0x2ca   : > { %2190 = vrot.lane.b32.xlu0 %v4514_v53, %s3579_s17 }
 0x2cc   : > { %v4738_v63 = vpop.permute.xlu0 %2128 }
 0x2cd   : > { %2438 = vrot.lane.b32.xlu1 %v4555_v19, %s3578_s16 }
 0x2ce   : > { %2224 = vrot.lane.b32.xlu0 %v4514_v53, %s3580_s20 }
 0x2d0   : > { %v4748_v31 = vpop.permute.xlu0 %2162 }
 0x2d1   : > { %2096 = vrot.lane.b32.xlu1 %v4529_v21, %s3576_s14 }
 0x2d2   : > { %2258 = vrot.lane.b32.xlu0 %v4514_v53, %s3581_s21  ;;  %v4709_v53 = vpop.permute.xlu1 %2052 }
 0x2d4   : > { %v4758_v24 = vpop.permute.xlu0 %2196 }
 0x2d5   : > { %2130 = vrot.lane.b32.xlu1 %v4529_v21, %s3577_s15 }
 0x2d6   : > { %2440 = vrot.lane.b32.xlu0 %v4558_v9, %s3578_s16  ;;  %v4717_v7 = vpop.permute.xlu1 %2086 }
 0x2d8   : > { %v4768_v26 = vpop.permute.xlu0 %2230 }
 0x2d9   : > { %2164 = vrot.lane.b32.xlu1 %v4529_v21, %s3578_s16 }
 0x2da   : > { %2030 = vrot.lane.b32.xlu0 %v4531_v35, %s3574_s12 }
 0x2dc   : > { %v4778_v54 = vpop.permute.xlu0 %2264 }
 0x2dd   : > { %2198 = vrot.lane.b32.xlu1 %v4529_v21, %s3579_s17 }
 0x2de   : > { %2064 = vrot.lane.b32.xlu0 %v4531_v35, %s3575_s13 }
 0x2e1   : > { %2232 = vrot.lane.b32.xlu1 %v4529_v21, %s3580_s20 }
 0x2e2   : > { %2098 = vrot.lane.b32.xlu0 %v4531_v35, %s3576_s14 }
 0x2e5   : > { %2266 = vrot.lane.b32.xlu1 %v4529_v21, %s3581_s21  ;;  %v4736_v21 = vpop.permute.xlu1 %2120 }
 0x2e6   : > { %2132 = vrot.lane.b32.xlu0 %v4531_v35, %s3577_s15 }
 0x2e9   : > { %2158 = vrot.lane.b32.xlu1 %v4517_v15, %s3578_s16  ;;  %v4744_v32 = vpop.permute.xlu1 %2154 }
 0x2ea   : > { %2446 = vrot.lane.b32.xlu0 %v4571_v34, %s3578_s16 }
 0x2ed   : > { %2448 = vrot.lane.b32.xlu1 %v4573_v44, %s3578_s16  ;;  %v4756_v60 = vpop.permute.xlu1 %2188 }
 0x2ee   : > { %2166 = vrot.lane.b32.xlu0 %v4531_v35, %s3578_s16 }
 0x2f1   : > { %2472 = vrot.lane.b32.xlu1 %v4555_v19, %s3579_s17  ;;  %v4764_v20 = vpop.permute.xlu1 %2222 }
 0x2f2   : > { %2474 = vrot.lane.b32.xlu0 %v4558_v9, %s3579_s17 }
 0x2f5   : > { %2192 = vrot.lane.b32.xlu1 %v4517_v15, %s3579_s17  ;;  %v4776_v37 = vpop.permute.xlu1 %2256 }
 0x2f6   : > { %2308 = vrot.lane.b32.xlu0 %v4624_v28, %s3574_s12 }
 0x2f9   : > { %2306 = vrot.lane.b32.xlu1 %v4617_v50, %s3574_s12 }
 0x2fa   : > { %2342 = vrot.lane.b32.xlu0 %v4624_v28, %s3575_s13 }
 0x2fd   : > { %2340 = vrot.lane.b32.xlu1 %v4617_v50, %s3575_s13 }
 0x2fe   : > { %2376 = vrot.lane.b32.xlu0 %v4624_v28, %s3576_s14 }
 0x301   : > { %2374 = vrot.lane.b32.xlu1 %v4617_v50, %s3576_s14 }
 0x302   : > { %2410 = vrot.lane.b32.xlu0 %v4624_v28, %s3577_s15 }
 0x305   : > { %2408 = vrot.lane.b32.xlu1 %v4617_v50, %s3577_s15 }
 0x306   : > { %2444 = vrot.lane.b32.xlu0 %v4624_v28, %s3578_s16 }
 0x307   : > { %v2303_v39 = vpop.permute.xlu1 %2302 }
 0x308   : > { %v4784_v45 = vpop.permute.xlu0 %2304 }
 0x309   : > { %5476 = vst [vmem:[#allocation5_spill] sm:$0xff] %v4784_v45  ;;  %2442 = vrot.lane.b32.xlu1 %v4617_v50, %s3578_s16  ;;  %v2318_v30 = vsel %vm413_vm0, %v2303_v39, %v4784_v45 }
 0x30a   : > { %2478 = vrot.lane.b32.xlu0 %v4624_v28, %s3579_s17  ;;  %2836 = vmatprep.subr.bf16.mxu1 %v2318_v30  ;;  %v2032_v30 = vsel %vm413_vm0, %v4600_v23, %v4697_v52 }
 0x30b   : > { %v4792_v22 = vpop.permute.xlu1 %2336 }
 0x30c   : > { %v4794_v16 = vpop.permute.xlu0 %2338 }
 0x30d   : > { %2476 = vrot.lane.b32.xlu1 %v4617_v50, %s3579_s17 }
 0x30e   : > { %2314 = vrot.lane.b32.xlu0 %v4639_v62, %s3574_s12 }
 0x30f   : > { %v4800_v5 = vpop.permute.xlu1 %2370 }
 0x310   : > { %v4802_v42 = vpop.permute.xlu0 %2372 }
 0x311   : > { %2316 = vrot.lane.b32.xlu1 %v4643_v25, %s3574_s12 }
 0x312   : > { %2480 = vrot.lane.b32.xlu0 %v4571_v34, %s3579_s17 }
 0x313   : > { %v4808_v3 = vpop.permute.xlu1 %2404 }
 0x314   : > { %v4810_v49 = vpop.permute.xlu0 %2406 }
 0x315   : > { %2482 = vrot.lane.b32.xlu1 %v4573_v44, %s3579_s17 }
 0x316   : > { %2348 = vrot.lane.b32.xlu0 %v4639_v62, %s3575_s13 }
 0x317   : > { %v4816_v38 = vpop.permute.xlu1 %2312 }
 0x318   : > { %v2311_v8 = vpop.permute.xlu0 %2310 }
 0x319   : > { %2350 = vrot.lane.b32.xlu1 %v4643_v25, %s3575_s13  ;;  %v2321_v27 = vsel %vm413_vm0, %v2311_v8, %v4816_v38  ;;  %v2035_v8 = vsel %vm413_vm0, %v4605_v14, %v4701_v2  ;;  %v2066_v14 = vsel %vm458_vm1, %v4622_v17, %v4709_v53  ;;  %v2069_v17 = vsel %vm458_vm1, %v4627_v41, %v4711_v0 }
 0x31a   : > { %2382 = vrot.lane.b32.xlu0 %v4639_v62, %s3576_s14  ;;  %v2100_v41 = vsel %vm503_vm2, %v4633_v11, %v4717_v7 }
 0x31b   : > { %v4822_v29 = vpop.permute.xlu1 %2346 }
 0x31c   : > { %v4824_v55 = vpop.permute.xlu0 %2344 }
 0x31d   : > { %2384 = vrot.lane.b32.xlu1 %v4643_v25, %s3576_s14 }
 0x31e   : > { %2416 = vrot.lane.b32.xlu0 %v4639_v62, %s3577_s15 }
 0x31f   : > { %v4830_v56 = vpop.permute.xlu1 %2380 }
 0x320   : > { %v4832_v51 = vpop.permute.xlu0 %2378 }
 0x321   : > { %2418 = vrot.lane.b32.xlu1 %v4643_v25, %s3577_s15 }
 0x322   : > { %2450 = vrot.lane.b32.xlu0 %v4639_v62, %s3578_s16 }
 0x323   : > { %v2023_v57 = vpop.permute.xlu1 %2022 }
 0x324   : > { %v4838_v6 = vpop.permute.xlu0 %2412 }
 0x325   : > { %2452 = vrot.lane.b32.xlu1 %v4643_v25, %s3578_s16 }
 0x326   : > { %2484 = vrot.lane.b32.xlu0 %v4639_v62, %s3579_s17 }
 0x327   : > { %v4844_v18 = vpop.permute.xlu1 %2056 }
 0x328   : > { %v2021_v61 = vpop.permute.xlu0 %2020 }
 0x329   : > { %2486 = vrot.lane.b32.xlu1 %v4643_v25, %s3579_s17  ;;  %v2033_v36 = vsel %vm413_vm0, %v4697_v52, %v2021_v61  ;;  %v2034_v39 = vsel %vm413_vm0, %v2021_v61, %v2023_v57 }
 0x32a   : > { %2200 = vrot.lane.b32.xlu0 %v4531_v35, %s3579_s17  ;;  %2730 = vmatprep.subr.bf16.mxu0 %v2033_v36 }
 0x32b   : > { %2837 = vmatpush1.bf16.msra.mxu1 %v2034_v39  ;;  %v4856_v33 = vpop.permute.xlu1 %2090  ;;  %2731 = vmatpush1.bf16.msra.mxu0 %v2032_v30 }
 0x32c   : > { %2838 = vmatprep.subr.bf16.mxu1 %v2321_v27  ;;  %v4860_v45 = vpop.permute.xlu0 %2054 }
 0x32d   : > { %2506 = vrot.lane.b32.xlu1 %v4555_v19, %s3580_s20  ;;  %v2067_v36 = vsel %vm458_vm1, %v4709_v53, %v4860_v45 }
 0x32e   : > { %2508 = vrot.lane.b32.xlu0 %v4558_v9, %s3580_s20 }
 0x32f   : > { %v4866_v57 = vpop.permute.xlu1 %2124 }
 0x330   : > { %v4868_v61 = vpop.permute.xlu0 %2088 }
 0x331   : > { %2510 = vrot.lane.b32.xlu1 %v4617_v50, %s3580_s20  ;;  %v2101_v53 = vsel %vm503_vm2, %v4717_v7, %v4868_v61 }
 0x332   : > { %2512 = vrot.lane.b32.xlu0 %v4624_v28, %s3580_s20 }
 0x333   : > { %v2029_v23 = vpop.permute.xlu1 %2028 }
 0x334   : > { %v4874_v52 = vpop.permute.xlu0 %2122  ;;  %v2036_v27 = vsel %vm413_vm0, %v4701_v2, %v2029_v23 }
 0x335   : > { %2226 = vrot.lane.b32.xlu1 %v4517_v15, %s3580_s20  ;;  %2732 = vmatprep.subr.bf16.mxu0 %v2036_v27  ;;  %v2135_v11 = vsel %vm548_vm3, %v4736_v21, %v4874_v52 }
 0x336   : > { %2514 = vrot.lane.b32.xlu0 %v4571_v34, %s3580_s20  ;;  %2733 = vmatpush1.bf16.msra.mxu0 %v2035_v8 }
 0x337   : > { %v4888_v39 = vpop.permute.xlu1 %2414  ;;  %2734 = vmatprep.subr.bf16.mxu0 %v2067_v36 }
 0x338   : > { %v4890_v30 = vpop.permute.xlu0 %2156 }
 0x339   : > { %2516 = vrot.lane.b32.xlu1 %v4573_v44, %s3580_s20 }
 0x33a   : > { %2518 = vrot.lane.b32.xlu0 %v4639_v62, %s3580_s20  ;;  %2735 = vmatpush1.bf16.msra.mxu0 %v2066_v14 }
 0x33b   : > { %v4899_v2 = vpop.permute.xlu1 %2062 }
 0x33c   : > { %v4901_v27 = vpop.permute.xlu0 %2190  ;;  %v2070_v8 = vsel %vm458_vm1, %v4711_v0, %v4899_v2 }
 0x33d   : > { %2520 = vrot.lane.b32.xlu1 %v4643_v25, %s3580_s20  ;;  %2736 = vmatprep.subr.bf16.mxu0 %v2070_v8 }
 0x33e   : > { %2234 = vrot.lane.b32.xlu0 %v4531_v35, %s3580_s20  ;;  %2737 = vmatpush1.bf16.msra.mxu0 %v2069_v17 }
 0x33f   : > { %v4916_v36 = vpop.permute.xlu1 %2438  ;;  %2738 = vmatprep.subr.bf16.mxu0 %v2101_v53 }
 0x340   : > { %v4918_v14 = vpop.permute.xlu0 %2224 }
 0x341   : > { %2540 = vrot.lane.b32.xlu1 %v4555_v19, %s3581_s21  ;;  %v2103_v19 = vsel %vm503_vm2, %v4637_v12, %v4721_v10  ;;  %v2134_v12 = vsel %vm548_vm3, %v4649_v59, %v4736_v21  ;;  %v2352_v21 = vsel %vm458_vm1, %v4792_v22, %v4794_v16 }
 0x342   : > { %2542 = vrot.lane.b32.xlu0 %v4558_v9, %s3581_s21  ;;  %2739 = vmatpush1.bf16.msra.mxu0 %v2100_v41 }
 0x343   : > { %v4927_v0 = vpop.permute.xlu1 %2096 }
 0x344   : > { %v4929_v8 = vpop.permute.xlu0 %2258  ;;  %v2104_v17 = vsel %vm503_vm2, %v4721_v10, %v4927_v0 }
 0x345   : > { %2544 = vrot.lane.b32.xlu1 %v4617_v50, %s3581_s21  ;;  %2740 = vmatprep.subr.bf16.mxu0 %v2104_v17 }
 0x346   : > { %2546 = vrot.lane.b32.xlu0 %v4624_v28, %s3581_s21  ;;  %2741 = vmatpush1.bf16.msra.mxu0 %v2103_v19 }
 0x347   : > { %v4944_v7 = vpop.permute.xlu1 %2130  ;;  %2742 = vmatprep.subr.bf16.mxu0 %v2135_v11  ;;  %v3046_v11 = vld [vmem:[%s5467_s5 + $0x10] sm:$0xff] }
 0x348   : > { %v4946_v53 = vpop.permute.xlu0 %2440  ;;  %v2138_v28 = vsel %vm548_vm3, %v4738_v63, %v4944_v7 }
 0x349   : > { %2260 = vrot.lane.b32.xlu1 %v4517_v15, %s3581_s21  ;;  %v2137_v15 = vsel %vm548_vm3, %v4651_v48, %v4738_v63  ;;  %v2168_v48 = vsel %vm593_vm4, %v4657_v40, %v4744_v32  ;;  %v2068_v63 = vsel %vm458_vm1, %v4860_v45, %v4844_v18  ;;  %v3045_v40 = vld [vmem:[%s5467_s5 + $0x8] sm:$0xff]  ;;  %v2171_v45 = vsel %vm593_vm4, %v4661_v1, %v4748_v31 }
 0x34a   : > { %2548 = vrot.lane.b32.xlu0 %v4571_v34, %s3581_s21  ;;  %2743 = vmatpush1.bf16.msra.mxu0 %v2134_v12  ;;  %v2169_v34 = vsel %vm593_vm4, %v4744_v32, %v4890_v30  ;;  %v2386_v1 = vsel %vm503_vm2, %v4800_v5, %v4802_v42 }
 0x34b   : > { %v4958_v10 = vpop.permute.xlu1 %2164  ;;  %2744 = vmatprep.subr.bf16.mxu0 %v2138_v28  ;;  %v2202_v28 = vsel %vm638_vm5, %v4669_v4, %v4756_v60  ;;  %v2389_v4 = vsel %vm503_vm2, %v4832_v51, %v4830_v56  ;;  %v2237_v51 = vsel %vm683_vm6, %v4764_v20, %v4918_v14 }
 0x34c   : > { %v2031_v41 = vpop.permute.xlu0 %2030  ;;  %v2172_v22 = vsel %vm593_vm4, %v4748_v31, %v4958_v10  ;;  %v3047_v31 = vld [vmem:[%s5467_s5 + $0x18] sm:$0xff] }
 0x34d   : > { %v2037_v17 = vsel %vm413_vm0, %v2029_v23, %v2031_v41  ;;  %2550 = vrot.lane.b32.xlu1 %v4573_v44, %s3581_s21  ;;  %v2102_v41 = vsel %vm503_vm2, %v4868_v61, %v4856_v33  ;;  %v2205_v61 = vsel %vm638_vm5, %v4671_v13, %v4758_v24  ;;  %v2420_v13 = vsel %vm548_vm3, %v4808_v3, %v4810_v49 }
 0x34e   : > { %2552 = vrot.lane.b32.xlu0 %v4639_v62, %s3581_s21  ;;  %2745 = vmatpush1.bf16.msra.mxu0 %v2137_v15 }
 0x34f   : > { %2839 = vmatpush1.bf16.msra.mxu1 %v2037_v17  ;;  %v4971_v59 = vpop.permute.xlu1 %2198  ;;  %2746 = vmatprep.subr.bf16.mxu0 %v2169_v34  ;;  %v3092_v17 = vld [vmem:[%s5468_s6] sm:$0xff] }
 0x350   : > { %2840 = vmatprep.subr.bf16.mxu1 %v2352_v21  ;;  %v2065_v23 = vpop.permute.xlu0 %2064  ;;  %v2206_v5 = vsel %vm638_vm5, %v4758_v24, %v4971_v59  ;;  %v3094_v21 = vld [vmem:[%s5468_s6 + $0x10] sm:$0xff]  ;;  %v3095_v24 = vld [vmem:[%s5468_s6 + $0x18] sm:$0xff] }
 0x351   : > { %2554 = vrot.lane.b32.xlu1 %v4643_v25, %s3581_s21  ;;  %v3044_v25 = vld [vmem:[%s5467_s5] sm:$0xff]  ;;  %v2071_v18 = vsel %vm458_vm1, %v4899_v2, %v2065_v23 }
 0x352   : > { %2268 = vrot.lane.b32.xlu0 %v4531_v35, %s3581_s21  ;;  %2747 = vmatpush1.bf16.msra.mxu0 %v2168_v48  ;;  %v2355_v35 = vsel %vm458_vm1, %v4824_v55, %v4822_v29  ;;  %v2203_v55 = vsel %vm638_vm5, %v4756_v60, %v4901_v27  ;;  %v3093_v60 = vld [vmem:[%s5468_s6 + $0x8] sm:$0xff]  ;;  %v2236_v48 = vsel %vm683_vm6, %v4677_v46, %v4764_v20 }
 0x353   : > { %2841 = vmatpush1.bf16.msra.mxu1 %v2068_v63  ;;  %v4992_v19 = vpop.permute.xlu1 %2232  ;;  %2748 = vmatprep.subr.bf16.mxu0 %v2172_v22  ;;  %v2136_v63 = vsel %vm548_vm3, %v4874_v52, %v4866_v57  ;;  %v2239_v20 = vsel %vm683_vm6, %v4681_v47, %v4768_v26  ;;  %v5076_v57 = vld [vmem:[%s5466_s4] ss:$12 sps:$4 sm:$0xff]   ;;  %v5088_v47 = vld [vmem:[%s5466_s4 + $0x1c] ss:$12 sps:$4 sm:$0xff]  }
 0x354   : > { %2842 = vmatprep.subr.bf16.mxu1 %v2355_v35  ;;  %v2099_v32 = vpop.permute.xlu0 %2098  ;;  %v2240_v3 = vsel %vm683_vm6, %v4768_v26, %v4992_v19  ;;  %v3534_v52 = vld [vmem:[%s3642_s11] sm:$0xff]  ;;  %v3535_v26 = vld [vmem:[%s3642_s11 + $0x8] sm:$0xff] }
 0x355   : > { %3050 = vperm.xlu1 %3517, %v3044_v25   ;;  %v2105_v34 = vsel %vm503_vm2, %v4927_v0, %v2099_v32  ;;  %v2423_v25 = vsel %vm548_vm3, %v4838_v6, %v4888_v39  ;;  %v2271_v6 = vsel %vm728_vm7, %v4776_v37, %v4929_v8 }
 0x356   : > { %3055 = vperm.xlu0 %3516, %v3045_v40   ;;  %2749 = vmatpush1.bf16.msra.mxu0 %v2171_v45  ;;  %v2270_v45 = vsel %vm728_vm7, %v4689_v58, %v4776_v37 }
 0x357   : > { %2843 = vmatpush1.bf16.msra.mxu1 %v2071_v18  ;;  %v5011_v12 = vpop.permute.xlu1 %2266  ;;  %2750 = vmatprep.subr.bf16.mxu0 %v2203_v55  ;;  %v3536_v18 = vld [vmem:[%s3642_s11 + $0x10] sm:$0xff] }
 0x358   : > { %2844 = vmatprep.subr.bf16.mxu1 %v2386_v1  ;;  %v2133_v2 = vpop.permute.xlu0 %2132  ;;  %v3537_v1 = vld [vmem:[%s3642_s11 + $0x18] sm:$0xff] }
 0x359   : > { %3060 = vperm.xlu1 %3517, %v3046_v11   ;;  %v2139_v35 = vsel %vm548_vm3, %v4944_v7, %v2133_v2  ;;  %v2454_v7 = vsel %vm593_vm4, %v4916_v36, %v4946_v53  ;;  %v2274_v36 = vsel %vm728_vm7, %v4778_v54, %v5011_v12  ;;  %v3538_v2 = vld [vmem:[%s3642_s11 + $0x28] sm:$0xff] }
 0x35a   : > { %3065 = vperm.xlu0 %3516, %v3047_v31   ;;  %2751 = vmatpush1.bf16.msra.mxu0 %v2202_v28  ;;  %v5121_v31 = vld [vmem:[%s5466_s4 + $0x18] ss:$12 sps:$4 sm:$0xff]  }
 0x35b   : > { %2845 = vmatpush1.bf16.msra.mxu1 %v2102_v41  ;;  %v2159_v15 = vpop.permute.xlu1 %2158  ;;  %2752 = vmatprep.subr.bf16.mxu0 %v2206_v5 }
 0x35c   : > { %2846 = vmatprep.subr.bf16.mxu1 %v2389_v4  ;;  %v2447_v33 = vpop.permute.xlu0 %2446  ;;  %v2170_v55 = vsel %vm593_vm4, %v4890_v30, %v2159_v15  ;;  %v2273_v30 = vsel %vm728_vm7, %v4691_v43, %v4778_v54  ;;  %v3539_v54 = vld [vmem:[%s3642_s11 + $0x30] sm:$0xff]  ;;  %v5477_v15 = vmov 0  }
 0x35d   : > { %3098 = vperm.xlu1 %3517, %v3092_v17  }
 0x35e   : > { %3103 = vperm.xlu0 %3516, %v3093_v60   ;;  %2753 = vmatpush1.bf16.msra.mxu0 %v2205_v61  ;;  %v3541_v60 = vld [vmem:[%s3642_s11 + $0x40] sm:$0xff]  ;;  %v3542_v61 = vld [vmem:[%s3642_s11 + $0x50] sm:$0xff] }
 0x35f   : > { %2847 = vmatpush1.bf16.msra.mxu1 %v2105_v34  ;;  %v5048_v23 = vpop.permute.xlu1 %2448  ;;  %2754 = vmatprep.subr.bf16.mxu0 %v2237_v51  ;;  %v3543_v51 = vld [vmem:[%s3642_s11 + $0x58] sm:$0xff] }
 0x360   : > { %2848 = vmatprep.subr.bf16.mxu1 %v2420_v13  ;;  %v2167_v0 = vpop.permute.xlu0 %2166  ;;  %v2457_v58 = vsel %vm593_vm4, %v2447_v33, %v5048_v23  ;;  %v5151_v33 = vld [vmem:[%s5466_s4 + $0x8] ss:$12 sps:$4 sm:$0xff]  }
 0x361   : > { %3108 = vperm.xlu1 %3517, %v3094_v21   ;;  %v2173_v28 = vsel %vm593_vm4, %v4958_v10, %v2167_v0  ;;  %v3540_v10 = vld [vmem:[%s3642_s11 + $0x38] sm:$0xff]  ;;  %v3544_v21 = vld [vmem:[%s3642_s11 + $0x60] sm:$0xff]  ;;  %v3545_v0 = vld [vmem:[%s3642_s11 + $0x68] sm:$0xff] }
 0x362   : > { %3113 = vperm.xlu0 %3516, %v3095_v24   ;;  %2755 = vmatpush1.bf16.msra.mxu0 %v2236_v48  ;;  %v5177_v48 = vld [vmem:[%s5466_s4 + $0x20] ss:$12 sps:$4 sm:$0xff]  }
 0x363   : > { %2849 = vmatpush1.bf16.msra.mxu1 %v2136_v63  ;;  %v2473_v22 = vpop.permute.xlu1 %2472  ;;  %2756 = vmatprep.subr.bf16.mxu0 %v2240_v3  ;;  %v3546_v63 = vld [vmem:[%s3642_s11 + $0x78] sm:$0xff] }
 0x364   : > { %2850 = vmatprep.subr.bf16.mxu1 %v2423_v25  ;;  %v5068_v46 = vpop.permute.xlu0 %2474  ;;  %v5478_v25 = vld [vmem:[#allocation5_spill] sm:$0xff] }
 0x365   : > { %3156 = vrot.lane.b32.xlu1 %v3534_v52, %s3581_s21  ;;  %v2488_v5 = vsel %vm638_vm5, %v2473_v22, %v5068_v46  ;;  %v3547_v22 = vld [vmem:[%s3642_s11 + $0x80] sm:$0xff]  ;;  %v3548_v52 = vld [vmem:[%s3642_s11 + $0x88] sm:$0xff] }
 0x366   : > { %2757 = vmatpush1.bf16.msra.mxu0 %v2239_v20  ;;  %3158 = vrot.lane.b32.xlu0 %v3535_v26, %s3581_s21 }
 0x367   : > { %2851 = vmatpush1.bf16.msra.mxu1 %v2139_v35  ;;  %v2193_v40 = vpop.permute.xlu1 %2192  ;;  %2779 = vmatprep.subr.bf16.mxu0 %v2271_v6 }
 0x368   : > { %2852 = vmatprep.subr.bf16.mxu1 %v2454_v7  ;;  %v5095_v32 = vpop.permute.xlu0 %2308  ;;  %v2204_v17 = vsel %vm638_vm5, %v4901_v27, %v2193_v40  ;;  %v3549_v40 = vld [vmem:[%s3642_s11 + $0x90] sm:$0xff] }
 0x369   : > { %2759 = vmatmul.mubr.bf16.vlgmr.msra.gmra.mrb[32].mxu0 %v5076_v57  ;;  %3160 = vrot.lane.b32.xlu1 %v3536_v18, %s3581_s21 }
 0x36a   : > { %2780 = vmatpush1.bf16.msra.mxu0 %v2270_v45  ;;  %2768 = vmatprep.mubr.bf16.mxu0 %v5088_v47 }
 0x36b   : > { %2853 = vmatpush1.bf16.msra.mxu1 %v2170_v55  ;;  %v2307_v11 = vpop.permute.xlu1 %2306  ;;  %2781 = vmatprep.subr.bf16.mxu0 %v2274_v36 }
 0x36c   : > { %2854 = vmatprep.subr.bf16.mxu1 %v2457_v58  ;;  %v5111_v37 = vpop.permute.xlu0 %2342  ;;  %3162 = vrot.lane.b32.xlu0 %v3537_v1, %s3581_s21  ;;  %v2319_v20 = vsel %vm413_vm0, %v5478_v25, %v2307_v11  ;;  %v3552_v58 = vld [vmem:[%s3642_s11 + $0xb0] sm:$0xff] }
 0x36d   : > { %3164 = vrot.lane.b32.xlu1 %v3538_v2, %s3581_s21  ;;  %v3553_v2 = vld [vmem:[%s3642_s11 + $0xb8] sm:$0xff] }
 0x36e   : > { %2782 = vmatpush1.bf16.msra.mxu0 %v2273_v30 }
 0x36f   : > { %2855 = vmatpush1.bf16.msra.mxu1 %v2173_v28  ;;  %v5127_v41 = vpop.permute.xlu1 %2340  ;;  %2938 = vmatprep.subr.bf16.mxu0 %v4617_v50 }
 0x370   : > { %2856 = vmatprep.subr.bf16.mxu1 %v2488_v5  ;;  %v5132_v43 = vpop.permute.xlu0 %2376  ;;  %3166 = vrot.lane.b32.xlu0 %v3539_v54, %s3581_s21  ;;  %v2354_v45 = vsel %vm458_vm1, %v5127_v41, %v5111_v37  ;;  %v3554_v5 = vld [vmem:[%s3642_s11 + $0xc8] sm:$0xff] }
 0x371   : > { %2769 = vmatmul.mubr.bf16.gmra.mrb[36].mxu0 %v5121_v31  ;;  %3168 = vrot.lane.b32.xlu1 %v3540_v10, %s3581_s21  ;;  %v3555_v10 = vld [vmem:[%s3642_s11 + $0xd0] sm:$0xff] }
 0x372   : > { %2811 = vmatprep.mubr.bf16.mxu0 %v5477_v15 }
 0x373   : > { %2857 = vmatpush1.bf16.msra.mxu1 %v2204_v17  ;;  %v5142_v50 = vpop.permute.xlu1 %2374  ;;  %v3556_v17 = vld [vmem:[%s3642_s11 + $0xd8] sm:$0xff] }
 0x374   : > { %v5144_v4 = vpop.permute.xlu0 %2410  ;;  %3170 = vrot.lane.b32.xlu0 %v3541_v60, %s3581_s21 }
 0x375   : > { %3172 = vrot.lane.b32.xlu1 %v3542_v61, %s3581_s21 }
 0x377   : > { %v5155_v27 = vpop.permute.xlu1 %2408 }
 0x378   : > { %v5157_v34 = vpop.permute.xlu0 %2444  ;;  %3174 = vrot.lane.b32.xlu0 %v3543_v51, %s3581_s21  ;;  %v3557_v51 = vld [vmem:[%s3642_s11 + $0xe0] sm:$0xff] }
 0x379   : > { %3421 = vmatmul.mubr.msk.bf16.vlgmr.msra.gmra.mrb[32].mxu0 %vm1305_vm8, %v5151_v33  ;;  %3176 = vrot.lane.b32.xlu1 %v3544_v21, %s3581_s21 }
 0x37a   : > { %2939 = vmatpush1.bf16.msra.mxu0 %v4558_v9  ;;  %2821 = vmatprep.mubr.bf16.mxu0 %v5477_v15  ;;  %v2320_v9 = vsel %vm413_vm0, %v2307_v11, %v5095_v32  ;;  %v3550_v32 = vld [vmem:[%s3642_s11 + $0xa0] sm:$0xff]  ;;  %v3551_v11 = vld [vmem:[%s3642_s11 + $0xa8] sm:$0xff] }
 0x37b   : > { %2940 = vmatprep.subr.bf16.mxu0 %v4639_v62  ;;  %v5168_v13 = vpop.permute.xlu1 %2442 }
 0x37c   : > { %v5170_v24 = vpop.permute.xlu0 %2478  ;;  %3178 = vrot.lane.b32.xlu0 %v3545_v0, %s3581_s21  ;;  %v3558_v0 = vld [vmem:[%s3642_s11 + $0xf0] sm:$0xff] }
 0x37d   : > { %3180 = vrot.lane.b32.xlu1 %v3546_v63, %s3581_s21 }
 0x37e   : > { %2941 = vmatpush1.bf16.msra.mxu0 %v4573_v44  ;;  %v5479_v44 = vld [vmem:[#allocation4_spill] sm:$0xff] }
 0x37f   : > { %2942 = vmatprep.subr.bf16.mxu0 %v2320_v9  ;;  %v5184_v62 = vpop.permute.xlu1 %2476  ;;  %v3559_v9 = vld [vmem:[%s3642_s11 + $0xf8] sm:$0xff] }
 0x380   : > { %v2315_v3 = vpop.permute.xlu0 %2314  ;;  %3182 = vrot.lane.b32.xlu0 %v3547_v22, %s3581_s21 }
 0x381   : > { %3422 = vmatmul.mubr.msk.bf16.gmra.mrb[36].mxu0 %vm1305_vm8, %v5177_v48  ;;  %3184 = vrot.lane.b32.xlu1 %v3548_v52, %s3581_s21  ;;  %v2322_v7 = vsel %vm413_vm0, %v4816_v38, %v2315_v3  ;;  %v2353_v38 = vsel %vm458_vm1, %v4794_v16, %v5127_v41  ;;  %v2388_v16 = vsel %vm503_vm2, %v5142_v50, %v5132_v43 }
 0x382   : > { %2943 = vmatpush1.bf16.msra.mxu0 %v2319_v20  ;;  %2970 = vmatprep.mubr.bf16.mxu0 %v5479_v44  ;;  %v3561_v20 = vld [vmem:[%s3642_s11 + $0x108] sm:$0xff]  ;;  %v2456_v44 = vsel %vm593_vm4, %v5168_v13, %v5157_v34 }
 0x383   : > { %v2317_v35 = vpop.permute.xlu1 %2316 }
 0x384   : > { %v2481_v6 = vpop.permute.xlu0 %2480  ;;  %v2323_v26 = vsel %vm413_vm0, %v2315_v3, %v2317_v35  ;;  %3186 = vrot.lane.b32.xlu0 %v3549_v40, %s3581_s21  ;;  %v3560_v3 = vld [vmem:[%s3642_s11 + $0x100] sm:$0xff]  ;;  %v3564_v40 = vld [vmem:[%s3642_s11 + $0x128] sm:$0xff] }
 0x385   : > { %2944 = vmatprep.subr.bf16.mxu0 %v2323_v26  ;;  %3253 = vrot.lane.b32.xlu1 %v3550_v32, %s3581_s21  ;;  %v3563_v26 = vld [vmem:[%s3642_s11 + $0x120] sm:$0xff] }
 0x386   : > { %2945 = vmatpush1.bf16.msra.mxu0 %v2322_v7 }
 0x387   : > { %v5205_v18 = vpop.permute.xlu1 %2482  ;;  %2946 = vmatprep.subr.bf16.mxu0 %v2354_v45  ;;  %v3565_v45 = vld [vmem:[%s3642_s11 + $0x130] sm:$0xff] }
 0x388   : > { %v2349_v55 = vpop.permute.xlu0 %2348  ;;  %v2491_v36 = vsel %vm638_vm5, %v2481_v6, %v5205_v18  ;;  %3255 = vrot.lane.b32.xlu0 %v3551_v11, %s3581_s21 }
 0x389   : > { %2858 = vmatprep.subr.bf16.mxu1 %v2491_v36  ;;  %3257 = vrot.lane.b32.xlu1 %v3552_v58, %s3581_s21  ;;  %v2356_v28 = vsel %vm458_vm1, %v4822_v29, %v2349_v55  ;;  %v2387_v29 = vsel %vm503_vm2, %v4802_v42, %v5142_v50  ;;  %v2422_v42 = vsel %vm548_vm3, %v5155_v27, %v5144_v4 }
 0x38a   : > { %2947 = vmatpush1.bf16.msra.mxu0 %v2353_v38  ;;  %v2489_v38 = vsel %vm638_vm5, %v5068_v46, %v5184_v62 }
 0x38b   : > { %v2351_v37 = vpop.permute.xlu1 %2350 }
 0x38c   : > { %v2383_v1 = vpop.permute.xlu0 %2382  ;;  %v2357_v30 = vsel %vm458_vm1, %v2349_v55, %v2351_v37  ;;  %3259 = vrot.lane.b32.xlu0 %v3553_v2, %s3581_s21 }
 0x38d   : > { %2948 = vmatprep.subr.bf16.mxu0 %v2357_v30  ;;  %3261 = vrot.lane.b32.xlu1 %v3554_v5, %s3581_s21  ;;  %v2390_v21 = vsel %vm503_vm2, %v4830_v56, %v2383_v1  ;;  %v2421_v56 = vsel %vm548_vm3, %v4810_v49, %v5155_v27  ;;  %v3562_v27 = vld [vmem:[%s3642_s11 + $0x118] sm:$0xff]  ;;  %s3498_s11 = smul.u32 96, %s5481_s29 }
 0x38e   : > { %2949 = vmatpush1.bf16.msra.mxu0 %v2356_v28 }
 0x38f   : > { %v2385_v41 = vpop.permute.xlu1 %2384  ;;  %2950 = vmatprep.subr.bf16.mxu0 %v2388_v16  ;;  %s5357_s18 = scalar_lea.vmem %s5470_s8, %s3498_s11 }
 0x390   : > { %v2417_v54 = vpop.permute.xlu0 %2416  ;;  %3263 = vrot.lane.b32.xlu0 %v3555_v10, %s3581_s21  ;;  %v2391_v60 = vsel %vm503_vm2, %v2383_v1, %v2385_v41 }
 0x391   : > { %3265 = vrot.lane.b32.xlu1 %v3556_v17, %s3581_s21  ;;  %v2424_v52 = vsel %vm548_vm3, %v4888_v39, %v2417_v54  ;;  %v2455_v39 = vsel %vm593_vm4, %v4946_v53, %v5168_v13  ;;  %v2490_v53 = vsel %vm638_vm5, %v5184_v62, %v5170_v24 }
 0x392   : > { %2951 = vmatpush1.bf16.msra.mxu0 %v2387_v29 }
 0x393   : > { %v2419_v61 = vpop.permute.xlu1 %2418  ;;  %2952 = vmatprep.subr.bf16.mxu0 %v2391_v60 }
 0x394   : > { %v2451_v43 = vpop.permute.xlu0 %2450  ;;  %3267 = vrot.lane.b32.xlu0 %v3557_v51, %s3581_s21  ;;  %v2425_v22 = vsel %vm548_vm3, %v2417_v54, %v2419_v61 }
 0x395   : > { %3269 = vrot.lane.b32.xlu1 %v3558_v0, %s3581_s21  ;;  %v2458_v55 = vsel %vm593_vm4, %v5048_v23, %v2451_v43 }
 0x396   : > { %2953 = vmatpush1.bf16.msra.mxu0 %v2390_v21 }
 0x397   : > { %v2453_v50 = vpop.permute.xlu1 %2452  ;;  %2954 = vmatprep.subr.bf16.mxu0 %v2422_v42 }
 0x398   : > { %v2485_v63 = vpop.permute.xlu0 %2484  ;;  %3271 = vrot.lane.b32.xlu0 %v3559_v9, %s3581_s21  ;;  %v2459_v34 = vsel %vm593_vm4, %v2451_v43, %v2453_v50 }
 0x399   : > { %3273 = vrot.lane.b32.xlu1 %v3560_v3, %s3581_s21  ;;  %v2492_v24 = vsel %vm638_vm5, %v5205_v18, %v2485_v63 }
 0x39a   : > { %2955 = vmatpush1.bf16.msra.mxu0 %v2421_v56 }
 0x39b   : > { %v2487_v25 = vpop.permute.xlu1 %2486  ;;  %2956 = vmatprep.subr.bf16.mxu0 %v2425_v22 }
 0x39c   : > { %v2201_v4 = vpop.permute.xlu0 %2200  ;;  %3275 = vrot.lane.b32.xlu0 %v3561_v20, %s3581_s21  ;;  %v2493_v58 = vsel %vm638_vm5, %v2485_v63, %v2487_v25 }
 0x39d   : > { %v2207_v49 = vsel %vm638_vm5, %v4971_v59, %v2201_v4  ;;  %3277 = vrot.lane.b32.xlu1 %v3562_v27, %s3581_s21 }
 0x39e   : > { %2859 = vmatpush1.bf16.msra.mxu1 %v2207_v49  ;;  %2957 = vmatpush1.bf16.msra.mxu0 %v2424_v52 }
 0x39f   : > { %v2507_v35 = vpop.permute.xlu1 %2506  ;;  %2958 = vmatprep.subr.bf16.mxu0 %v2456_v44 }
 0x3a0   : > { %v2509_v6 = vpop.permute.xlu0 %2508  ;;  %3279 = vrot.lane.b32.xlu0 %v3563_v26, %s3581_s21 }
 0x3a1   : > { %v2522_v59 = vsel %vm683_vm6, %v2507_v35, %v2509_v6  ;;  %3281 = vrot.lane.b32.xlu1 %v3564_v40, %s3581_s21 }
 0x3a2   : > { %2860 = vmatprep.subr.bf16.mxu1 %v2522_v59  ;;  %2959 = vmatpush1.bf16.msra.mxu0 %v2455_v39 }
 0x3a3   : > { %v2511_v7 = vpop.permute.xlu1 %2510  ;;  %2960 = vmatprep.subr.bf16.mxu0 %v2459_v34 }
 0x3a4   : > { %v2513_v32 = vpop.permute.xlu0 %2512  ;;  %3283 = vrot.lane.b32.xlu0 %v3565_v45, %s3581_s21  ;;  %v2523_v46 = vsel %vm683_vm6, %v2509_v6, %v2511_v7 }
 0x3a6   : > { %2961 = vmatpush1.bf16.msra.mxu0 %v2458_v55 }
 0x3a7   : > { %v2227_v13 = vpop.permute.xlu1 %2226  ;;  %2962 = vmatprep.subr.bf16.mxu0 %v2490_v53 }
 0x3a8   : > { %v2238_v36 = vsel %vm683_vm6, %v4918_v14, %v2227_v13  ;;  %v2515_v11 = vpop.permute.xlu0 %2514  ;;  %v2524_v14 = vsel %vm683_vm6, %v2511_v7, %v2513_v32 }
 0x3a9   : > { %2861 = vmatpush1.bf16.msra.mxu1 %v2238_v36 }
 0x3aa   : > { %2963 = vmatpush1.bf16.msra.mxu0 %v2489_v38 }
 0x3ab   : > { %v2517_v23 = vpop.permute.xlu1 %2516  ;;  %2964 = vmatprep.subr.bf16.mxu0 %v2493_v58 }
 0x3ac   : > { %v2519_v37 = vpop.permute.xlu0 %2518  ;;  %v2525_v1 = vsel %vm683_vm6, %v2515_v11, %v2517_v23 }
 0x3ad   : > { %2862 = vmatprep.subr.bf16.mxu1 %v2525_v1  ;;  %v2526_v18 = vsel %vm683_vm6, %v2517_v23, %v2519_v37 }
 0x3ae   : > { %2965 = vmatpush1.bf16.msra.mxu0 %v2492_v24 }
 0x3af   : > { %v2521_v30 = vpop.permute.xlu1 %2520  ;;  %2966 = vmatprep.subr.bf16.mxu0 %v2524_v14 }
 0x3b0   : > { %v2235_v2 = vpop.permute.xlu0 %2234  ;;  %v2527_v28 = vsel %vm683_vm6, %v2519_v37, %v2521_v30 }
 0x3b1   : > { %v2241_v62 = vsel %vm683_vm6, %v4992_v19, %v2235_v2 }
 0x3b2   : > { %2863 = vmatpush1.bf16.msra.mxu1 %v2241_v62  ;;  %2967 = vmatpush1.bf16.msra.mxu0 %v2523_v46 }
 0x3b3   : > { %v2541_v5 = vpop.permute.xlu1 %2540  ;;  %2968 = vmatprep.subr.bf16.mxu0 %v2527_v28 }
 0x3b4   : > { %v2543_v16 = vpop.permute.xlu0 %2542 }
 0x3b5   : > { %v2556_v41 = vsel %vm728_vm7, %v2541_v5, %v2543_v16  ;;  %2865 = vmatmul.mubr.bf16.vlgmr.msra.gmra.mrb[24].mxu1 %v5076_v57 }
 0x3b6   : > { %2885 = vmatprep.subr.bf16.mxu1 %v2556_v41  ;;  %2969 = vmatpush1.bf16.msra.mxu0 %v2526_v18 }
 0x3b7   : > { %v2545_v54 = vpop.permute.xlu1 %2544  ;;  %2874 = vmatprep.mubr.bf16.mxu1 %v5088_v47 }
 0x3b8   : > { %v2547_v10 = vpop.permute.xlu0 %2546  ;;  %v2557_v29 = vsel %vm728_vm7, %v2543_v16, %v2545_v54 }
 0x3b9   : > { %2971 = vmatmul.mubr.bf16.vlgmr.msra.gmra.mrb[40].mxu0 %v5076_v57  ;;  %v2558_v19 = vsel %vm728_vm7, %v2545_v54, %v2547_v10 }
 0x3ba   : > { %2991 = vmatprep.subr.bf16.mxu0 %v2558_v19  ;;  %2980 = vmatprep.mubr.bf16.mxu0 %v5088_v47 }
 0x3bb   : > { %v2261_v17 = vpop.permute.xlu1 %2260  ;;  %2992 = vmatpush1.bf16.msra.mxu0 %v2557_v29 }
 0x3bc   : > { %v2272_v60 = vsel %vm728_vm7, %v4929_v8, %v2261_v17  ;;  %v2549_v61 = vpop.permute.xlu0 %2548 }
 0x3bd   : > { %2886 = vmatpush1.bf16.msra.mxu1 %v2272_v60 }
 0x3be   : > { %2875 = vmatmul.mubr.bf16.gmra.mrb[28].mxu1 %v5121_v31 }
 0x3bf   : > { %v2551_v43 = vpop.permute.xlu1 %2550  ;;  %2917 = vmatprep.mubr.bf16.mxu1 %v5477_v15 }
 0x3c0   : > { %v2553_v57 = vpop.permute.xlu0 %2552  ;;  %v2559_v51 = vsel %vm728_vm7, %v2549_v61, %v2551_v43 }
 0x3c1   : > { %2887 = vmatprep.subr.bf16.mxu1 %v2559_v51  ;;  %2981 = vmatmul.mubr.bf16.gmra.mrb[44].mxu0 %v5121_v31  ;;  %v2560_v8 = vsel %vm728_vm7, %v2551_v43, %v2553_v57 }
 0x3c2   : > { %3023 = vmatprep.mubr.bf16.mxu0 %v5477_v15 }
 0x3c3   : > { %v2555_v47 = vpop.permute.xlu1 %2554 }
 0x3c4   : > { %v2269_v21 = vpop.permute.xlu0 %2268  ;;  %v2561_v0 = vsel %vm728_vm7, %v2553_v57, %v2555_v47 }
 0x3c5   : > { %v2275_v42 = vsel %vm728_vm7, %v5011_v12, %v2269_v21  ;;  %2993 = vmatprep.subr.bf16.mxu0 %v2561_v0 }
 0x3c6   : > { %2888 = vmatpush1.bf16.msra.mxu1 %v2275_v42  ;;  %2994 = vmatpush1.bf16.msra.mxu0 %v2560_v8 }
 0x3c9   : > { %3423 = vmatmul.mubr.msk.bf16.vlgmr.msra.gmra.mrb[24].mxu1 %vm1305_vm8, %v5151_v33  ;;  %3425 = vmatmul.mubr.msk.bf16.vlgmr.msra.gmra.mrb[40].mxu0 %vm1305_vm8, %v5151_v33 }
 0x3ca   : > { %2927 = vmatprep.mubr.bf16.mxu1 %v5477_v15  ;;  %3033 = vmatprep.mubr.bf16.mxu0 %v5477_v15 }
 0x3d1   : > { %3424 = vmatmul.mubr.msk.bf16.gmra.mrb[28].mxu1 %vm1305_vm8, %v5177_v48  ;;  %3426 = vmatmul.mubr.msk.bf16.gmra.mrb[44].mxu0 %vm1305_vm8, %v5177_v48 }
 0x3d4   : > { %v5321_v12 = vpop.permute.xlu1 %3050 }
 0x3d5   : > { %v5323_v31 = vpop.permute.xlu0 %3055 }
 0x3d8   : > { %v5325_v50 = vpop.permute.xlu1 %3060 }
 0x3d9   : > { %v5327_v63 = vpop.permute.xlu0 %3065 }
 0x3dc   : > { %v5329_v9 = vpop.permute.xlu1 %3098 }
 0x3dd   : > { %v5331_v33 = vpop.permute.xlu0 %3103 }
 0x3e0   : > { %v5333_v56 = vpop.permute.xlu1 %3108 }
 0x3e1   : > { %v5335_v15 = vpop.permute.xlu0 %3113 }
 0x3e4   : > { %v3157_v3 = vpop.permute.xlu1 %3156 }
 0x3e5   : > { %v3159_v22 = vpop.permute.xlu0 %3158 }
 0x3e6   : > { %v3189_v32 = vsel %vm728_vm7, %v3157_v3, %v3159_v22 }
 0x3e8   : > { %v3161_v48 = vpop.permute.xlu1 %3160 }
 0x3e9   : > { %v3163_v25 = vpop.permute.xlu0 %3162  ;;  %v3190_v53 = vsel %vm728_vm7, %v3159_v22, %v3161_v48 }
 0x3ea   : > { %v5338_v4 = vsel %vm728_vm7, %v3161_v48, %v3163_v25 }
 0x3ec   : > { %v3165_v20 = vpop.permute.xlu1 %3164 }
 0x3ed   : > { %v3167_v52 = vpop.permute.xlu0 %3166 }
 0x3ee   : > { %v3192_v38 = vsel %vm728_vm7, %v3165_v20, %v3167_v52 }
 0x3f0   : > { %v3169_v49 = vpop.permute.xlu1 %3168 }
 0x3f1   : > { %v3171_v27 = vpop.permute.xlu0 %3170  ;;  %v3193_v1 = vsel %vm728_vm7, %v3167_v52, %v3169_v49 }
 0x3f2   : > { %v5341_v44 = vsel %vm728_vm7, %v3169_v49, %v3171_v27 }
 0x3f4   : > { %v3173_v35 = vpop.permute.xlu1 %3172 }
 0x3f5   : > { %v3175_v6 = vpop.permute.xlu0 %3174 }
 0x3f6   : > { %v3195_v41 = vsel %vm728_vm7, %v3173_v35, %v3175_v6 }
 0x3f8   : > { %v3177_v26 = vpop.permute.xlu1 %3176 }
 0x3f9   : > { %v3179_v39 = vpop.permute.xlu0 %3178  ;;  %v3196_v29 = vsel %vm728_vm7, %v3175_v6, %v3177_v26 }
 0x3fa   : > { %v5344_v59 = vsel %vm728_vm7, %v3177_v26, %v3179_v39 }
 0x3fc   : > { %v3181_v37 = vpop.permute.xlu1 %3180 }
 0x3fd   : > { %v3183_v18 = vpop.permute.xlu0 %3182 }
 0x3fe   : > { %v3198_v51 = vsel %vm728_vm7, %v3181_v37, %v3183_v18 }
 0x400   : > { %v5371_v19 = vpop.permute.xlu1 %3184 }
 0x401   : > { %v3199_v0 = vsel %vm728_vm7, %v3183_v18, %v5371_v19  ;;  %v3187_v48 = vpop.permute.xlu0 %3186 }
 0x404   : > { %v3254_v25 = vpop.permute.xlu1 %3253 }
 0x405   : > { %v3256_v20 = vpop.permute.xlu0 %3255 }
 0x408   : > { %v3258_v52 = vpop.permute.xlu1 %3257 }
 0x409   : > { %v3260_v49 = vpop.permute.xlu0 %3259 }
 0x40a   : > { %v3287_v37 = vsel %vm728_vm7, %v3258_v52, %v3260_v49 }
 0x40c   : > { %v3262_v27 = vpop.permute.xlu1 %3261 }
 0x40d   : > { %v3264_v35 = vpop.permute.xlu0 %3263 }
 0x410   : > { %v3266_v6 = vpop.permute.xlu1 %3265 }
 0x411   : > { %v3268_v26 = vpop.permute.xlu0 %3267 }
 0x414   : > { %v3270_v39 = vpop.permute.xlu1 %3269 }
 0x44c   : > { %v2813_v40 = vpop.f32.mrb[32].mxu0 }
 0x44d   : > { %v3068_v34 = vmul.f32 %v5321_v12, %v2813_v40  ;;  %v2815_v7 = vpop.f32.mrb[33].mxu0  ;;  %v3272_v40 = vpop.permute.xlu0 %3271 }
 0x44e   : > { %v3069_v45 = vmul.f32 %v5321_v12, %v2815_v7  ;;  %v2817_v55 = vpop.f32.mrb[34].mxu0 }
 0x44f   : > { %v3116_v13 = vadd.f32 %v5329_v9, %v3068_v34  ;;  %v3074_v36 = vmul.f32 %v5323_v31, %v2817_v55  ;;  %v2819_v11 = vpop.f32.mrb[35].mxu0  ;;  %v3274_v34 = vpop.permute.xlu1 %3273 }
 0x450   : > { %v3117_v58 = vadd.f32 %v5329_v9, %v3069_v45  ;;  %v3075_v23 = vmul.f32 %v5323_v31, %v2819_v11 }
 0x451   : > { %v3213_v24 = vadd.f32 %v3189_v32, %v3116_v13  ;;  %v3122_v14 = vadd.f32 %v5331_v33, %v3074_v36  ;;  %v3276_v7 = vpop.permute.xlu0 %3275  ;;  %v3285_v13 = vsel %vm728_vm7, %v3254_v25, %v3256_v20  ;;  %v3286_v36 = vsel %vm728_vm7, %v3256_v20, %v3258_v52 }
 0x452   : > { %v3214_v30 = vadd.f32 %v3190_v53, %v3117_v58  ;;  %v3123_v2 = vadd.f32 %v5331_v33, %v3075_v23  ;;  %v3293_v52 = vsel %vm728_vm7, %v3274_v34, %v3276_v7 }
 0x453   : > { %3225 = vst [vmem:[%s5357_s18] sm:$0xff] %v3213_v24  ;;  %v3216_v46 = vadd.f32 %v3192_v38, %v3122_v14  ;;  %v5387_v32 = vpop.permute.xlu1 %3277 }
 0x454   : > { %3226 = vst [vmem:[%s5357_s18 + $0x8] sm:$0xff] %v3214_v30  ;;  %v3217_v62 = vadd.f32 %v3193_v1, %v3123_v2  ;;  %v2823_v28 = vpop.f32.mrb[36].mxu0  ;;  %v3289_v1 = vsel %vm728_vm7, %v3264_v35, %v3266_v6 }
 0x455   : > { %3228 = vst [vmem:[%s5357_s18 + $0x18] sm:$0xff] %v3216_v46  ;;  %v3080_v5 = vmul.f32 %v5325_v50, %v2823_v28  ;;  %v2825_v16 = vpop.f32.mrb[37].mxu0  ;;  %v5389_v45 = vpop.permute.xlu0 %3279 }
 0x456   : > { %3229 = vst [vmem:[%s5357_s18 + $0x20] sm:$0xff] %v3217_v62  ;;  %v3081_v54 = vmul.f32 %v5325_v50, %v2825_v16  ;;  %v2827_v10 = vpop.f32.mrb[38].mxu0 }
 0x457   : > { %v3128_v17 = vadd.f32 %v5333_v56, %v3080_v5  ;;  %v3086_v60 = vmul.f32 %v5327_v63, %v2827_v10  ;;  %v2829_v61 = vpop.f32.mrb[39].mxu0 }
 0x458   : > { %v3129_v43 = vadd.f32 %v5333_v56, %v3081_v54  ;;  %v3087_v57 = vmul.f32 %v5327_v63, %v2829_v61 }
 0x459   : > { %v3219_v47 = vadd.f32 %v3195_v41, %v3128_v17  ;;  %v3134_v21 = vadd.f32 %v5335_v15, %v3086_v60 }
 0x45a   : > { %v3220_v8 = vadd.f32 %v3196_v29, %v3129_v43  ;;  %v3135_v42 = vadd.f32 %v5335_v15, %v3087_v57 }
 0x45b   : > { %3231 = vst [vmem:[%s5357_s18 + $0x30] sm:$0xff] %v3219_v47  ;;  %v3222_v3 = vadd.f32 %v3198_v51, %v3134_v21 }
 0x45c   : > { %3232 = vst [vmem:[%s5357_s18 + $0x38] sm:$0xff] %v3220_v8  ;;  %v3223_v22 = vadd.f32 %v3199_v0, %v3135_v42  ;;  %v3282_v0 = vpop.permute.xlu1 %3281  ;;  %v3284_v8 = vpop.permute.xlu0 %3283  ;;  %v3200_v42 = vsel %vm728_vm7, %v5371_v19, %v3187_v48 }
 0x45d   : > { %3234 = vst [vmem:[%s5357_s18 + $0x48] sm:$0xff] %v3222_v3 }
 0x45e   : > { %3235 = vst [vmem:[%s5357_s18 + $0x50] sm:$0xff] %v3223_v22 }
 0x49c   : > { %v2919_v55 = vpop.f32.mrb[24].mxu1  ;;  %v3025_v53 = vpop.f32.mrb[40].mxu0 }
 0x49d   : > { %v3070_v11 = vmul.f32 %v5321_v12, %v2919_v55  ;;  %v3072_v38 = vmul.f32 %v5321_v12, %v3025_v53  ;;  %v2921_v58 = vpop.f32.mrb[25].mxu1  ;;  %v3027_v23 = vpop.f32.mrb[41].mxu0  ;;  %v3295_v55 = vsel %vm728_vm7, %v5389_v45, %v3282_v0 }
 0x49e   : > { %v3071_v24 = vmul.f32 %v5321_v12, %v2921_v58  ;;  %v3073_v14 = vmul.f32 %v5321_v12, %v3027_v23  ;;  %v2923_v30 = vpop.f32.mrb[26].mxu1  ;;  %v3029_v2 = vpop.f32.mrb[42].mxu0 }
 0x49f   : > { %v3118_v46 = vadd.f32 %v5329_v9, %v3070_v11  ;;  %v3120_v62 = vadd.f32 %v5329_v9, %v3072_v38  ;;  %v3076_v28 = vmul.f32 %v5323_v31, %v2923_v30  ;;  %v3078_v5 = vmul.f32 %v5323_v31, %v3029_v2  ;;  %v2925_v16 = vpop.f32.mrb[27].mxu1  ;;  %v3031_v18 = vpop.f32.mrb[43].mxu0 }
 0x4a0   : > { %v3119_v41 = vadd.f32 %v5329_v9, %v3071_v24  ;;  %v3121_v54 = vadd.f32 %v5329_v9, %v3073_v14  ;;  %v3077_v12 = vmul.f32 %v5323_v31, %v2925_v16  ;;  %v3079_v10 = vmul.f32 %v5323_v31, %v3031_v18 }
 0x4a1   : > { %v3215_v29 = vadd.f32 %v5338_v4, %v3118_v46  ;;  %v3310_v17 = vadd.f32 %v3286_v36, %v3120_v62  ;;  %v3124_v60 = vadd.f32 %v5331_v33, %v3076_v28  ;;  %v3126_v61 = vadd.f32 %v5331_v33, %v3078_v5 }
 0x4a2   : > { %v3309_v43 = vadd.f32 %v3285_v13, %v3119_v41  ;;  %v3311_v57 = vadd.f32 %v3287_v37, %v3121_v54  ;;  %v3125_v51 = vadd.f32 %v5331_v33, %v3077_v12  ;;  %v3127_v47 = vadd.f32 %v5331_v33, %v3079_v10 }
 0x4a3   : > { %v3288_v9 = vsel %vm728_vm7, %v3262_v27, %v3264_v35  ;;  %v3290_v31 = vsel %vm728_vm7, %v3266_v6, %v3268_v26  ;;  %3227 = vst [vmem:[%s5357_s18 + $0x10] sm:$0xff] %v3215_v29  ;;  %3428 = vst [vmem:[%s5357_s18 + $0x68] sm:$0xff] %v3310_v17  ;;  %v3218_v4 = vadd.f32 %v5341_v44, %v3124_v60 }
 0x4a4   : > { %v3313_v21 = vadd.f32 %v3289_v1, %v3126_v61  ;;  %3427 = vst [vmem:[%s5357_s18 + $0x60] sm:$0xff] %v3309_v43  ;;  %3429 = vst [vmem:[%s5357_s18 + $0x70] sm:$0xff] %v3311_v57  ;;  %v3291_v33 = vsel %vm728_vm7, %v3270_v39, %v3272_v40  ;;  %v3312_v3 = vadd.f32 %v3288_v9, %v3125_v51  ;;  %v2929_v25 = vpop.f32.mrb[28].mxu1  ;;  %v3035_v20 = vpop.f32.mrb[44].mxu0 }
 0x4a5   : > { %v3314_v22 = vadd.f32 %v3290_v31, %v3127_v47  ;;  %3230 = vst [vmem:[%s5357_s18 + $0x28] sm:$0xff] %v3218_v4  ;;  %v3292_v44 = vsel %vm728_vm7, %v3272_v40, %v3274_v34  ;;  %v3082_v49 = vmul.f32 %v5325_v50, %v2929_v25  ;;  %v3084_v19 = vmul.f32 %v5325_v50, %v3035_v20  ;;  %v2931_v48 = vpop.f32.mrb[29].mxu1  ;;  %v3037_v27 = vpop.f32.mrb[45].mxu0 }
 0x4a6   : > { %3431 = vst [vmem:[%s5357_s18 + $0x80] sm:$0xff] %v3313_v21  ;;  %3430 = vst [vmem:[%s5357_s18 + $0x78] sm:$0xff] %v3312_v3  ;;  %v3083_v35 = vmul.f32 %v5325_v50, %v2931_v48  ;;  %v3085_v6 = vmul.f32 %v5325_v50, %v3037_v27  ;;  %v2933_v26 = vpop.f32.mrb[30].mxu1  ;;  %v3039_v39 = vpop.f32.mrb[46].mxu0  ;;  %v3296_v40 = vsel %vm728_vm7, %v3282_v0, %v3284_v8 }
 0x4a7   : > { %3432 = vst [vmem:[%s5357_s18 + $0x88] sm:$0xff] %v3314_v22  ;;  %v3130_v34 = vadd.f32 %v5333_v56, %v3082_v49  ;;  %v3132_v7 = vadd.f32 %v5333_v56, %v3084_v19  ;;  %v3088_v53 = vmul.f32 %v5327_v63, %v2933_v26  ;;  %v3090_v13 = vmul.f32 %v5327_v63, %v3039_v39  ;;  %v2935_v36 = vpop.f32.mrb[31].mxu1  ;;  %v3041_v11 = vpop.f32.mrb[47].mxu0 }
 0x4a8   : > { %v3131_v50 = vadd.f32 %v5333_v56, %v3083_v35  ;;  %v3133_v38 = vadd.f32 %v5333_v56, %v3085_v6  ;;  %v3089_v58 = vmul.f32 %v5327_v63, %v2935_v36  ;;  %v3091_v23 = vmul.f32 %v5327_v63, %v3041_v11 }
 0x4a9   : > { %v3221_v37 = vadd.f32 %v5344_v59, %v3130_v34  ;;  %v3316_v1 = vadd.f32 %v3292_v44, %v3132_v7  ;;  %v3136_v24 = vadd.f32 %v5335_v15, %v3088_v53  ;;  %v3138_v14 = vadd.f32 %v5335_v15, %v3090_v13 }
 0x4aa   : > { %v3315_v30 = vadd.f32 %v3291_v33, %v3131_v50  ;;  %v3317_v2 = vadd.f32 %v3293_v52, %v3133_v38  ;;  %v3137_v56 = vadd.f32 %v5335_v15, %v3089_v58  ;;  %v3139_v46 = vadd.f32 %v5335_v15, %v3091_v23 }
 0x4ab   : > { %3233 = vst [vmem:[%s5357_s18 + $0x40] sm:$0xff] %v3221_v37  ;;  %3434 = vst [vmem:[%s5357_s18 + $0x98] sm:$0xff] %v3316_v1  ;;  %v3224_v63 = vadd.f32 %v3200_v42, %v3136_v24  ;;  %v3294_v59 = vsel %vm728_vm7, %v5387_v32, %v5389_v45  ;;  %v3319_v62 = vadd.f32 %v3295_v55, %v3138_v14 }
 0x4ac   : > { %3433 = vst [vmem:[%s5357_s18 + $0x90] sm:$0xff] %v3315_v30  ;;  %3435 = vst [vmem:[%s5357_s18 + $0xa0] sm:$0xff] %v3317_v2  ;;  %v3318_v28 = vadd.f32 %v3294_v59, %v3137_v56  ;;  %v3320_v5 = vadd.f32 %v3296_v40, %v3139_v46 }
 0x4ad   : > { %3236 = vst [vmem:[%s5357_s18 + $0x58] sm:$0xff] %v3224_v63  ;;  %3437 = vst [vmem:[%s5357_s18 + $0xb0] sm:$0xff] %v3319_v62 }
 0x4ae   : > { %3436 = vst [vmem:[%s5357_s18 + $0xa8] sm:$0xff] %v3318_v28  ;;  %3438 = vst [vmem:[%s5357_s18 + $0xb8] sm:$0xff] %v3320_v5 }
 0x4af PF: > { %s18_s27 = sadd.s32 1, %s3572_s27  }
 0x4b0   : > { %p15_p4 = scmp.ge.s32.totalorder %s18_s27, 4  }
 0x4b2   :  { %17 = sbr.rel (!%p15_p4) target bundleno = 1 (0x1), region = 83 }

</bundles_post_ra>
